<compile_context>
chip_gen: v7x
topology: tpu7x:2x2x1
jax: 0.10.0
libtpu: 0.0.40
codegen_flags: <defaults>
</compile_context>

<pallas_src>
import functools
import math

import jax
import jax.numpy as jnp
from jax import lax
from jax.experimental import pallas as pl
from jax.experimental.pallas import tpu as pltpu


_BN_EPS = 1e-5
_LRELU_SLOPE = 0.01
_VMEM_LIMIT = 48 * 1024 * 1024     # safe on v7x (64 MiB physical) and v5e/v6e
_MM_TILE_M = 256                   # v7x-safe M tile; 512-1024 OK on v5e/v6e


def _round_up(x, m):
    return (x + m - 1) // m * m


def _vmem():
    return pl.BlockSpec(memory_space=pltpu.MemorySpace.VMEM)


def _cparams(parallel=None):
    kw = dict(vmem_limit_bytes=_VMEM_LIMIT)
    if parallel is not None:
        kw["dimension_semantics"] = parallel
    return pltpu.CompilerParams(**kw)


# ----------------------------------------------------------------------------
# Tiled matmul + bias (bf16 MXU operands, f32 accumulation)
# ----------------------------------------------------------------------------
def _matmul_bias_kernel(x_ref, w_ref, b_ref, o_ref):
    o_ref[...] = (jnp.dot(x_ref[...], w_ref[...],
                          preferred_element_type=jnp.float32) + b_ref[...])


def matmul_bias(x, w, b, *, tile_m=_MM_TILE_M):
    m, k = x.shape
    n = w.shape[1]
    mp = _round_up(m, 8)
    tm = min(tile_m, mp)
    mp = _round_up(mp, tm)
    xp = x if mp == m else jnp.pad(x, ((0, mp - m), (0, 0)))
    out = pl.pallas_call(
        _matmul_bias_kernel,
        out_shape=jax.ShapeDtypeStruct((mp, n), jnp.float32),
        grid=(mp // tm,),
        in_specs=[pl.BlockSpec((tm, k), lambda i: (i, 0)),
                  pl.BlockSpec((k, n), lambda i: (0, 0)),
                  pl.BlockSpec((1, n), lambda i: (0, 0))],
        out_specs=pl.BlockSpec((tm, n), lambda i: (i, 0)),
        compiler_params=_cparams(("parallel",)),
    )(xp.astype(jnp.bfloat16), w.astype(jnp.bfloat16),
      b.reshape(1, n).astype(jnp.float32))
    return out[:m]


# ----------------------------------------------------------------------------
# Fused forward DFT: frames @ [cos|-sin]  +  magnitude  +  10*log10(clamp)
# ----------------------------------------------------------------------------
def _dft_kernel(x_ref, basis_ref, ri_ref, lm_ref, *, bins):
    ri = jnp.dot(x_ref[...], basis_ref[...], preferred_element_type=jnp.float32)
    ri_ref[...] = ri
    re = ri[:, :bins]
    im = ri[:, bins:]
    mag = jnp.sqrt(re * re + im * im)
    lm_ref[...] = (10.0 / math.log(10.0)) * jnp.log(jnp.maximum(mag, 1e-8))


def dft_forward(frames, basis, bins, *, tile_m=_MM_TILE_M):
    m, k = frames.shape
    n2 = basis.shape[1]
    mp = _round_up(m, 8)
    tm = min(tile_m, mp)
    mp = _round_up(mp, tm)
    xpad = frames if mp == m else jnp.pad(frames, ((0, mp - m), (0, 0)))
    ri, lm = pl.pallas_call(
        functools.partial(_dft_kernel, bins=bins),
        out_shape=(jax.ShapeDtypeStruct((mp, n2), jnp.float32),
                   jax.ShapeDtypeStruct((mp, bins), jnp.float32)),
        grid=(mp // tm,),
        in_specs=[pl.BlockSpec((tm, k), lambda i: (i, 0)),
                  pl.BlockSpec((k, n2), lambda i: (0, 0))],
        out_specs=(pl.BlockSpec((tm, n2), lambda i: (i, 0)),
                   pl.BlockSpec((tm, bins), lambda i: (i, 0))),
        compiler_params=_cparams(("parallel",)),
    )(xpad.astype(jnp.bfloat16), basis)
    return ri[:m], lm[:m]


# ----------------------------------------------------------------------------
# Fused STFT conv layer: Conv2d(3x3, pad=(0,1)) -> MaxPool(2,1) -> BN1d -> LReLU
#   input  : (f*cin,  L+2)   rows = fi*cin + ci, cols = batch-major padded frames
#   output : (fp*cout, L+2)  same column layout, pad columns re-zeroed
# Whole tensor fits VMEM at these sizes; BN needs global batch stats so the
# layer runs as a single block (column tiling + 2-pass stats for large inputs).
# ----------------------------------------------------------------------------
def _stft_conv_kernel(xg_ref, w_ref, b_ref, g_ref, be_ref, mask_ref, o_ref,
                      *, cout, fp, L, inv_count):
    acc = jnp.dot(w_ref[0], xg_ref[:, 0:L], preferred_element_type=jnp.float32)
    acc = acc + jnp.dot(w_ref[1], xg_ref[:, 1:1 + L],
                        preferred_element_type=jnp.float32)
    acc = acc + jnp.dot(w_ref[2], xg_ref[:, 2:2 + L],
                        preferred_element_type=jnp.float32)
    acc = acc + b_ref[...]                                   # (cout*fo, L)
    mask = mask_ref[...]                                     # (1, L)
    for p in range(fp):
        blk = jnp.maximum(acc[(2 * p) * cout:(2 * p + 1) * cout, :],
                          acc[(2 * p + 1) * cout:(2 * p + 2) * cout, :])
        bm = blk * mask
        s1 = jnp.sum(jnp.sum(bm, axis=1, keepdims=True), axis=0, keepdims=True)
        s2 = jnp.sum(jnp.sum(bm * bm, axis=1, keepdims=True), axis=0,
                     keepdims=True)
        mean = s1 * inv_count
        var = s2 * inv_count - mean * mean
        y = (blk - mean) * lax.rsqrt(var + _BN_EPS) * g_ref[p:p + 1] \
            + be_ref[p:p + 1]
        y = jnp.where(y >= 0.0, y, _LRELU_SLOPE * y) * mask
        o_ref[p * cout:(p + 1) * cout, 1:1 + L] = y.astype(o_ref.dtype)
        o_ref[p * cout:(p + 1) * cout, 0:1] = jnp.zeros((cout, 1), o_ref.dtype)
        o_ref[p * cout:(p + 1) * cout, 1 + L:2 + L] = jnp.zeros((cout, 1),
                                                                o_ref.dtype)


def stft_conv_layer(xg, params, mask, *, batch, t_frames):
    Lg = xg.shape[1]
    L = Lg - 2
    cout, fp = params["cout"], params["fp"]
    inv_count = 1.0 / float(cout * batch * t_frames)
    kern = functools.partial(_stft_conv_kernel, cout=cout, fp=fp, L=L,
                             inv_count=inv_count)
    return pl.pallas_call(
        kern,
        out_shape=jax.ShapeDtypeStruct((fp * cout, Lg), jnp.bfloat16),
        in_specs=[_vmem() for _ in range(6)],
        out_specs=_vmem(),
        compiler_params=_cparams(),
    )(xg, params["bigw"], params["bias_col"], params["gamma"], params["beta"],
      mask)


# ----------------------------------------------------------------------------
# Fused wave conv layer: Conv1d(3, pad=1) -> BN1d(cout) -> LReLU  (single input,
# no more max(x, x) / duplicated DMA)
# ----------------------------------------------------------------------------
def _wave_conv_kernel(xg_ref, w_ref, b_ref, g_ref, be_ref, mask_ref, o_ref,
                      *, L, inv_count):
    acc = jnp.dot(w_ref[0], xg_ref[:, 0:L], preferred_element_type=jnp.float32)
    acc = acc + jnp.dot(w_ref[1], xg_ref[:, 1:1 + L],
                        preferred_element_type=jnp.float32)
    acc = acc + jnp.dot(w_ref[2], xg_ref[:, 2:2 + L],
                        preferred_element_type=jnp.float32)
    acc = acc + b_ref[...]                                   # (cout, L)
    mask = mask_ref[...]
    am = acc * mask
    s1 = jnp.sum(am, axis=1, keepdims=True)
    s2 = jnp.sum(am * am, axis=1, keepdims=True)
    mean = s1 * inv_count
    var = s2 * inv_count - mean * mean
    y = (acc - mean) * lax.rsqrt(var + _BN_EPS) * g_ref[...] + be_ref[...]
    y = jnp.where(y >= 0.0, y, _LRELU_SLOPE * y) * mask
    cout = y.shape[0]
    o_ref[:, 1:1 + L] = y.astype(o_ref.dtype)
    o_ref[:, 0:1] = jnp.zeros((cout, 1), o_ref.dtype)
    o_ref[:, 1 + L:2 + L] = jnp.zeros((cout, 1), o_ref.dtype)


def wave_conv_layer(xg, params, mask, *, batch, timesteps):
    Lg = xg.shape[1]
    L = Lg - 2
    inv_count = 1.0 / float(batch * timesteps)
    kern = functools.partial(_wave_conv_kernel, L=L, inv_count=inv_count)
    return pl.pallas_call(
        kern,
        out_shape=jax.ShapeDtypeStruct((params["cout"], Lg), jnp.bfloat16),
        in_specs=[_vmem() for _ in range(6)],
        out_specs=_vmem(),
        compiler_params=_cparams(),
    )(xg, params["w"], params["bias_col"], params["gamma"], params["beta"],
      mask)


# ----------------------------------------------------------------------------
# Fused tanh-blend (directly on re/im) + inverse DFT
# ----------------------------------------------------------------------------
def _blend_istft_kernel(coef_ref, ri_ref, dc_ref, ds_ref, o_ref,
                        *, blend, mb, bins):
    cm = jnp.tanh(coef_ref[...])                             # (blend*mb, bins)
    ri = ri_ref[...]
    wr = cm * ri[:, :bins]
    wi = cm * ri[:, bins:]
    acc_r = wr[0:mb, :]
    acc_i = wi[0:mb, :]
    for i in range(1, blend):
        acc_r = acc_r + wr[i * mb:(i + 1) * mb, :]
        acc_i = acc_i + wi[i * mb:(i + 1) * mb, :]
    o_ref[...] = (jnp.dot(acc_r.astype(dc_ref.dtype), dc_ref[...],
                          preferred_element_type=jnp.float32)
                  + jnp.dot(acc_i.astype(ds_ref.dtype), ds_ref[...],
                            preferred_element_type=jnp.float32))


# ----------------------------------------------------------------------------
# Fused linear_wave + tanh + final blend summation (reproduces the reference's
# `for i in range(i, self.blend)` quirk: only blend indices {0, blend-1} mix)
# ----------------------------------------------------------------------------
def _wave_tail_kernel(act_ref, w_ref, b_ref, wav_ref, o_ref, *, n_sel):
    act = act_ref[...]
    res = jnp.zeros(o_ref.shape, jnp.float32)
    for j in range(n_sel):
        z = jnp.dot(w_ref[j], act, preferred_element_type=jnp.float32) + b_ref[j]
        res = res + jnp.tanh(z) * wav_ref[j]
    o_ref[...] = res


# ----------------------------------------------------------------------------
# BlendNet (forward only, parameters initialized deterministically in-script)
# ----------------------------------------------------------------------------
class BlendNetPallas:
    def __init__(self, blend, layers, channels, nfft, hop, key):
        assert hop == nfft, "only hop == nfft (rectangular, non-overlapping) implemented"
        assert blend >= 2
        self.blend = blend
        self.layers = layers
        self.channels = channels
        self.nfft = nfft
        self.hop = hop
        self.bins = nfft // 2 + 1

        keys = iter(jax.random.split(key, 64))

        # ---- STFT-branch conv layers: precompute banded "BigW" tap matrices ----
        def stft_conv_params(cin, cout, f):
            fo = f - 2
            fp_ = fo // 2
            w = 0.1 * jax.random.normal(next(keys), (cout, cin, 3, 3), jnp.float32)
            b = 0.1 * jax.random.normal(next(keys), (cout,), jnp.float32)
            mats = []
            for kw in range(3):
                m = jnp.zeros((cout * fo, f * cin), jnp.float32)
                for kh in range(3):
                    for r in range(fo):
                        m = m.at[r * cout:(r + 1) * cout,
                                 (r + kh) * cin:(r + kh + 1) * cin].set(
                                     w[:, :, kh, kw])
                mats.append(m)
            return dict(
                cout=cout, fo=fo, fp=fp_,
                bigw=jnp.stack(mats, 0).astype(jnp.bfloat16),      # (3, cout*fo, f*cin)
                bias_col=jnp.tile(b, (fo,)).reshape(cout * fo, 1),
                gamma=jnp.ones((fp_, 1), jnp.float32),
                beta=jnp.zeros((fp_, 1), jnp.float32),
            )

        self.conv_stft = []
        f = self.bins
        cin, cout = blend * channels, 8
        for _ in range(layers):
            p = stft_conv_params(cin, cout, f)
            self.conv_stft.append(p)
            f, cin, cout = p["fp"], cout, 2 * cout

        cout_last = 2 ** (layers + 2)
        fp_last = self.conv_stft[-1]["fp"]
        lin_stft_in = fp_last * cout_last
        lin_stft_out = blend * self.bins * channels
        self.lin_stft_w = 0.1 * jax.random.normal(next(keys),
                                                  (lin_stft_in, lin_stft_out),
                                                  jnp.float32)
        self.lin_stft_b = 0.1 * jax.random.normal(next(keys), (lin_stft_out,),
                                                  jnp.float32)

        # ---- wave-branch conv layers ----
        def wave_conv_params(cin_, cout_):
            w = 0.1 * jax.random.normal(next(keys), (cout_, cin_, 3), jnp.float32)
            b = 0.1 * jax.random.normal(next(keys), (cout_,), jnp.float32)
            return dict(
                cout=cout_,
                w=jnp.transpose(w, (2, 0, 1)).astype(jnp.bfloat16),  # (3, cout, cin)
                bias_col=b.reshape(cout_, 1),
                gamma=jnp.ones((cout_, 1), jnp.float32),
                beta=jnp.zeros((cout_, 1), jnp.float32),
            )

        self.conv_wave = []
        cin, cout = (blend + 1) * channels, 8
        for _ in range(layers):
            self.conv_wave.append(wave_conv_params(cin, cout))
            cin, cout = cout, 2 * cout

        lin_wave_in = 2 ** (layers + 2)
        lin_wave_out = (blend + 1) * channels
        self.lin_wave_w = 0.1 * jax.random.normal(next(keys),
                                                  (lin_wave_in, lin_wave_out),
                                                  jnp.float32)
        self.lin_wave_b = 0.1 * jax.random.normal(next(keys), (lin_wave_out,),
                                                  jnp.float32)

        # Only blend indices {0, blend-1} are mixed (reference bug reproduced);
        # pre-select & permute the needed linear_wave rows.
        self.mix_idxs = [0] + list(range(blend - 1, blend))
        wsel, bsel = [], []
        for i in self.mix_idxs:
            cols = [ch * (blend + 1) + i for ch in range(channels)]
            wsel.append(jnp.stack([self.lin_wave_w[:, q] for q in cols], 0))
            bsel.append(jnp.stack([self.lin_wave_b[q] for q in cols],
                                  0).reshape(channels, 1))
        self.lin_wave_w_sel = jnp.stack(wsel, 0).astype(jnp.bfloat16)  # (n_sel, c, cw)
        self.lin_wave_b_sel = jnp.stack(bsel, 0)                       # (n_sel, c, 1)

        # ---- DFT / inverse-DFT bases (rectangular window, hop == nfft) ----
        n = jnp.arange(nfft, dtype=jnp.float32)[:, None]
        k = jnp.arange(self.bins, dtype=jnp.float32)[None, :]
        ang = 2.0 * jnp.pi * n * k / nfft                      # (nfft, bins)
        self.dft_basis = jnp.concatenate([jnp.cos(ang), -jnp.sin(ang)],
                                         axis=1).astype(jnp.bfloat16)
        wk = jnp.ones((self.bins,), jnp.float32).at[1:-1].set(2.0)
        self.idft_cos = ((wk[:, None] * jnp.cos(ang.T)) / nfft).astype(jnp.bfloat16)
        self.idft_sin = ((-wk[:, None] * jnp.sin(ang.T)) / nfft).astype(jnp.bfloat16)

    # ---------------- forward ----------------
    def forward(self, *args):
        assert len(args) == self.blend
        b, c, t = args[0].shape
        assert t % self.nfft == 0
        frames = t // self.nfft
        blend, bins = self.blend, self.bins

        # ---- fused forward DFT (+ magnitude + 10*log10) over ALL blend inputs ----
        x_all = jnp.stack(args, axis=0).astype(jnp.float32)    # (blend, b, c, t)
        fx = x_all.reshape(blend * b * c * frames, self.nfft)
        ri, logmag = dft_forward(fx, self.dft_basis, bins)     # (M,2*bins), (M,bins)

        # ---- STFT branch: rows = (freq, blend*c), cols = batch-major padded frames ----
        tp = frames + 2
        L = b * tp
        lm = logmag.reshape(blend, b, c, frames, bins)
        xc = jnp.transpose(lm, (4, 0, 2, 1, 3)).reshape(bins * blend * c, b, frames)
        xc = jnp.pad(xc, ((0, 0), (0, 0), (1, 1))).reshape(bins * blend * c, L)
        xc = jnp.pad(xc, ((0, 0), (1, 1))).astype(jnp.bfloat16)    # (f*cin, L+2)
        mask_s = jnp.tile(
            jnp.concatenate([jnp.zeros((1, 1), jnp.float32),
                             jnp.ones((1, frames), jnp.float32),
                             jnp.zeros((1, 1), jnp.float32)], axis=1), (1, b))
        for prm in self.conv_stft:
            xc = stft_conv_layer(xc, prm, mask_s, batch=b, t_frames=frames)

        # ---- linear_stft (tiled matmul) ----
        cout_l = self.conv_stft[-1]["cout"]
        fp_l = self.conv_stft[-1]["fp"]
        act = xc[:, 1:1 + L].reshape(fp_l, cout_l, b, tp)[:, :, :, 1:1 + frames]
        act = jnp.transpose(act, (2, 3, 1, 0)).reshape(b * frames, cout_l * fp_l)
        coef = matmul_bias(act, self.lin_stft_w, self.lin_stft_b)

        # ---- tanh-blend on re/im + inverse DFT, fused ----
        coef = coef.reshape(b, frames, bins, c, blend)
        coef = jnp.transpose(coef, (4, 0, 3, 1, 2)).reshape(blend * b * c * frames,
                                                            bins)
        mb = b * c * frames
        blend_frames = pl.pallas_call(
            functools.partial(_blend_istft_kernel, blend=blend, mb=mb, bins=bins),
            out_shape=jax.ShapeDtypeStruct((mb, self.nfft), jnp.float32),
            in_specs=[_vmem() for _ in range(4)],
            out_specs=_vmem(),
            compiler_params=_cparams(),
        )(coef, ri, self.idft_cos, self.idft_sin)
        blend_wave = blend_frames.reshape(b, c, t)

        # ---- wave branch: rows = channel, cols = batch-major padded time ----
        wave_args = list(args) + [blend_wave]
        xw = jnp.stack(wave_args, axis=0).astype(jnp.float32)   # (blend+1, b, c, t)
        xw = jnp.transpose(xw, (0, 2, 1, 3)).reshape((blend + 1) * c, b, t)
        tpw = t + 2
        Lw = b * tpw
        xw = jnp.pad(xw, ((0, 0), (0, 0), (1, 1))).reshape((blend + 1) * c, Lw)
        xw = jnp.pad(xw, ((0, 0), (1, 1))).astype(jnp.bfloat16)
        mask_w = jnp.tile(
            jnp.concatenate([jnp.zeros((1, 1), jnp.float32),
                             jnp.ones((1, t), jnp.float32),
                             jnp.zeros((1, 1), jnp.float32)], axis=1), (1, b))
        for prm in self.conv_wave:
            xw = wave_conv_layer(xw, prm, mask_w, batch=b, timesteps=t)

        # ---- fused linear_wave + tanh + final blend sum ----
        cw = self.conv_wave[-1]["cout"]
        act_w = xw[:, 1:1 + Lw].reshape(cw, b, tpw)[:, :, 1:1 + t].reshape(cw, b * t)
        wav_sel = jnp.stack(
            [jnp.transpose(wave_args[i], (1, 0, 2)).reshape(c, b * t)
             for i in self.mix_idxs], axis=0).astype(jnp.float32)
        out = pl.pallas_call(
            functools.partial(_wave_tail_kernel, n_sel=len(self.mix_idxs)),
            out_shape=jax.ShapeDtypeStruct((c, b * t), jnp.float32),
            in_specs=[_vmem() for _ in range(4)],
            out_specs=_vmem(),
            compiler_params=_cparams(),
        )(act_w, self.lin_wave_w_sel, self.lin_wave_b_sel, wav_sel)
        return jnp.transpose(out.reshape(c, b, t), (1, 0, 2))


if __name__ == "__main__":
    key = jax.random.PRNGKey(0)
    kp, kx = jax.random.split(key)

    blend, layers, channels, nfft, hop = 2, 2, 2, 32, 32
    batch, timesteps = 2, 128

    model = BlendNetPallas(blend, layers, channels, nfft, hop, kp)

    xs = jax.random.normal(kx, (blend, batch, channels, timesteps),
                           dtype=jnp.float32)
    args = [xs[i] for i in range(blend)]

    fwd = jax.jit(lambda *a: model.forward(*a))
    out = jax.block_until_ready(fwd(*args))
    assert out.shape == (batch, channels, timesteps), out.shape
    assert bool(jnp.all(jnp.isfinite(out)))
    print("KERNEL_OK")
</pallas_src>

<mosaic_0001>
module attributes {stable_mosaic.version = 11 : i64} {
  func.func @_dft_kernel(%arg0: i32, %arg1: memref<32x32xbf16, #tpu.memory_space<vmem>>, %arg2: memref<32x34xbf16, #tpu.memory_space<vmem>>, %arg3: memref<32x34xf32, #tpu.memory_space<vmem>>, %arg4: memref<32x17xf32, #tpu.memory_space<vmem>>) attributes {dimension_semantics = [#tpu.dimension_semantics<parallel>], iteration_bounds = array<i64: 1>, scalar_prefetch = 0 : i64, scratch_operands = 0 : i64, tpu.core_type = #tpu.core_type<tc>, window_params = [{transform_indices = @transform_0, window_bounds = array<i64: 32, 32>}, {pipeline_mode = #tpu.pipeline_mode<synchronous>, transform_indices = @transform_1, window_bounds = array<i64: 32, 34>}, {transform_indices = @transform_2, window_bounds = array<i64: 32, 34>}, {transform_indices = @transform_3, window_bounds = array<i64: 32, 17>}]} {
    %c0 = arith.constant 0 : index
    %c0_0 = arith.constant 0 : index
    %0 = vector.load %arg1[%c0, %c0_0] : memref<32x32xbf16, #tpu.memory_space<vmem>>, vector<32x32xbf16>
    %c0_1 = arith.constant 0 : index
    %c0_2 = arith.constant 0 : index
    %1 = vector.load %arg2[%c0_1, %c0_2] : memref<32x34xbf16, #tpu.memory_space<vmem>>, vector<32x34xbf16>
    %cst = arith.constant dense<0.000000e+00> : vector<32x34xf32>
    %2 = tpu.matmul %0, %1, %cst {dimension_numbers = #tpu.dot_dimension_numbers<[1], [0], [0], [1], [0, 0, 1, 1], [], []>} : vector<32x32xbf16>, vector<32x34xbf16>, vector<32x34xf32> -> vector<32x34xf32>
    %c0_3 = arith.constant 0 : index
    %c0_4 = arith.constant 0 : index
    %3 = vector.load %arg3[%c0_3, %c0_4] : memref<32x34xf32, #tpu.memory_space<vmem>>, vector<32x34xf32>
    tpu.vector_store %arg3[%c0_3, %c0_4], %2 {strides = array<i32>} : memref<32x34xf32, #tpu.memory_space<vmem>>, vector<32x34xf32>,
    %4 = vector.extract_strided_slice %2 {offsets = [0, 0], sizes = [32, 17], strides = [1, 1]} : vector<32x34xf32> to vector<32x17xf32>
    %5 = vector.extract_strided_slice %2 {offsets = [0, 17], sizes = [32, 17], strides = [1, 1]} : vector<32x34xf32> to vector<32x17xf32>
    %6 = arith.mulf %4, %4 : vector<32x17xf32>
    %7 = arith.mulf %5, %5 : vector<32x17xf32>
    %8 = arith.addf %6, %7 : vector<32x17xf32>
    %9 = math.sqrt %8 : vector<32x17xf32>
    %cst_5 = arith.constant 9.99999993E-9 : f32
    %10 = vector.broadcast %cst_5 : f32 to vector<32x17xf32>
    %11 = arith.maximumf %9, %10 : vector<32x17xf32>
    %12 = math.log %11 : vector<32x17xf32>
    %cst_6 = arith.constant 4.34294462 : f32
    %13 = vector.broadcast %cst_6 : f32 to vector<32x17xf32>
    %14 = arith.mulf %13, %12 : vector<32x17xf32>
    %c0_7 = arith.constant 0 : index
    %c0_8 = arith.constant 0 : index
    %15 = vector.load %arg4[%c0_7, %c0_8] : memref<32x17xf32, #tpu.memory_space<vmem>>, vector<32x17xf32>
    tpu.vector_store %arg4[%c0_7, %c0_8], %14 {strides = array<i32>} : memref<32x17xf32, #tpu.memory_space<vmem>>, vector<32x17xf32>,
    return
  }
  func.func @transform_0(%arg0: i32) -> (i32, i32) {
    %c0_i32 = arith.constant 0 : i32
    %c0_i32_0 = arith.constant 0 : i32
    return %arg0, %c0_i32 : i32, i32
  }
  func.func @transform_1(%arg0: i32) -> (i32, i32) {
    %c0_i32 = arith.constant 0 : i32
    %c0_i32_0 = arith.constant 0 : i32
    %c0_i32_1 = arith.constant 0 : i32
    return %c0_i32, %c0_i32_0 : i32, i32
  }
  func.func @transform_2(%arg0: i32) -> (i32, i32) {
    %c0_i32 = arith.constant 0 : i32
    %c0_i32_0 = arith.constant 0 : i32
    return %arg0, %c0_i32 : i32, i32
  }
  func.func @transform_3(%arg0: i32) -> (i32, i32) {
    %c0_i32 = arith.constant 0 : i32
    %c0_i32_0 = arith.constant 0 : i32
    return %arg0, %c0_i32 : i32, i32
  }
}

module attributes {stable_mosaic.version = 11 : i64} {
  func.func @_stft_conv_kernel(%arg0: memref<68x14xbf16, #tpu.memory_space<vmem>>, %arg1: memref<3x120x68xbf16, #tpu.memory_space<vmem>>, %arg2: memref<120x1xf32, #tpu.memory_space<vmem>>, %arg3: memref<7x1xf32, #tpu.memory_space<vmem>>, %arg4: memref<7x1xf32, #tpu.memory_space<vmem>>, %arg5: memref<1x12xf32, #tpu.memory_space<vmem>>, %arg6: memref<56x14xbf16, #tpu.memory_space<vmem>>) attributes {dimension_semantics = [], scalar_prefetch = 0 : i64, scratch_operands = 0 : i64, tpu.core_type = #tpu.core_type<tc>} {
    %c0 = arith.constant 0 : index
    %c0_0 = arith.constant 0 : index
    %c0_1 = arith.constant 0 : index
    %0 = vector.load %arg1[%c0, %c0_0, %c0_1] : memref<3x120x68xbf16, #tpu.memory_space<vmem>>, vector<1x120x68xbf16>
    %1 = vector.shape_cast %0 : vector<1x120x68xbf16> to vector<120x68xbf16>
    %c0_2 = arith.constant 0 : index
    %c0_3 = arith.constant 0 : index
    %2 = vector.load %arg0[%c0_2, %c0_3] : memref<68x14xbf16, #tpu.memory_space<vmem>>, vector<68x12xbf16>
    %cst = arith.constant dense<0.000000e+00> : vector<120x12xf32>
    %3 = tpu.matmul %1, %2, %cst {dimension_numbers = #tpu.dot_dimension_numbers<[1], [0], [0], [1], [0, 0, 1, 1], [], []>} : vector<120x68xbf16>, vector<68x12xbf16>, vector<120x12xf32> -> vector<120x12xf32>
    %c1 = arith.constant 1 : index
    %c0_4 = arith.constant 0 : index
    %c0_5 = arith.constant 0 : index
    %4 = vector.load %arg1[%c1, %c0_4, %c0_5] : memref<3x120x68xbf16, #tpu.memory_space<vmem>>, vector<1x120x68xbf16>
    %5 = vector.shape_cast %4 : vector<1x120x68xbf16> to vector<120x68xbf16>
    %c0_6 = arith.constant 0 : index
    %c1_7 = arith.constant 1 : index
    %6 = vector.load %arg0[%c0_6, %c1_7] : memref<68x14xbf16, #tpu.memory_space<vmem>>, vector<68x12xbf16>
    %cst_8 = arith.constant dense<0.000000e+00> : vector<120x12xf32>
    %7 = tpu.matmul %5, %6, %cst_8 {dimension_numbers = #tpu.dot_dimension_numbers<[1], [0], [0], [1], [0, 0, 1, 1], [], []>} : vector<120x68xbf16>, vector<68x12xbf16>, vector<120x12xf32> -> vector<120x12xf32>
    %8 = arith.addf %3, %7 : vector<120x12xf32>
    %c2 = arith.constant 2 : index
    %c0_9 = arith.constant 0 : index
    %c0_10 = arith.constant 0 : index
    %9 = vector.load %arg1[%c2, %c0_9, %c0_10] : memref<3x120x68xbf16, #tpu.memory_space<vmem>>, vector<1x120x68xbf16>
    %10 = vector.shape_cast %9 : vector<1x120x68xbf16> to vector<120x68xbf16>
    %c0_11 = arith.constant 0 : index
    %c2_12 = arith.constant 2 : index
    %11 = vector.load %arg0[%c0_11, %c2_12] : memref<68x14xbf16, #tpu.memory_space<vmem>>, vector<68x12xbf16>
    %cst_13 = arith.constant dense<0.000000e+00> : vector<120x12xf32>
    %12 = tpu.matmul %10, %11, %cst_13 {dimension_numbers = #tpu.dot_dimension_numbers<[1], [0], [0], [1], [0, 0, 1, 1], [], []>} : vector<120x68xbf16>, vector<68x12xbf16>, vector<120x12xf32> -> vector<120x12xf32>
    %13 = arith.addf %8, %12 : vector<120x12xf32>
    %c0_14 = arith.constant 0 : index
    %c0_15 = arith.constant 0 : index
    %14 = vector.load %arg2[%c0_14, %c0_15] : memref<120x1xf32, #tpu.memory_space<vmem>>, vector<120x1xf32>
    %15 = vector.broadcast %14 : vector<120x1xf32> to vector<120x12xf32>
    %16 = arith.addf %13, %15 : vector<120x12xf32>
    %c0_16 = arith.constant 0 : index
    %c0_17 = arith.constant 0 : index
    %17 = vector.load %arg5[%c0_16, %c0_17] : memref<1x12xf32, #tpu.memory_space<vmem>>, vector<1x12xf32>
    %18 = vector.extract_strided_slice %16 {offsets = [0, 0], sizes = [8, 12], strides = [1, 1]} : vector<120x12xf32> to vector<8x12xf32>
    %19 = vector.extract_strided_slice %16 {offsets = [8, 0], sizes = [8, 12], strides = [1, 1]} : vector<120x12xf32> to vector<8x12xf32>
    %20 = arith.maximumf %18, %19 : vector<8x12xf32>
    %21 = vector.broadcast %17 : vector<1x12xf32> to vector<8x12xf32>
    %22 = arith.mulf %20, %21 : vector<8x12xf32>
    %cst_18 = arith.constant dense<0.000000e+00> : vector<8xf32>
    %23 = vector.multi_reduction <add>, %22, %cst_18 [1] : vector<8x12xf32> to vector<8xf32>
    %24 = vector.shape_cast %23 : vector<8xf32> to vector<8x1xf32>
    %cst_19 = arith.constant dense<0.000000e+00> : vector<1xf32>
    %25 = vector.multi_reduction <add>, %24, %cst_19 [0] : vector<8x1xf32> to vector<1xf32>
    %26 = vector.shape_cast %25 : vector<1xf32> to vector<1x1xf32>
    %27 = arith.mulf %22, %22 : vector<8x12xf32>
    %cst_20 = arith.constant dense<0.000000e+00> : vector<8xf32>
    %28 = vector.multi_reduction <add>, %27, %cst_20 [1] : vector<8x12xf32> to vector<8xf32>
    %29 = vector.shape_cast %28 : vector<8xf32> to vector<8x1xf32>
    %cst_21 = arith.constant dense<0.000000e+00> : vector<1xf32>
    %30 = vector.multi_reduction <add>, %29, %cst_21 [0] : vector<8x1xf32> to vector<1xf32>
    %31 = vector.shape_cast %30 : vector<1xf32> to vector<1x1xf32>
    %cst_22 = arith.constant 1.562500e-02 : f32
    %32 = vector.broadcast %cst_22 : f32 to vector<1x1xf32>
    %33 = arith.mulf %26, %32 : vector<1x1xf32>
    %cst_23 = arith.constant 1.562500e-02 : f32
    %34 = vector.broadcast %cst_23 : f32 to vector<1x1xf32>
    %35 = arith.mulf %31, %34 : vector<1x1xf32>
    %36 = arith.mulf %33, %33 : vector<1x1xf32>
    %37 = arith.subf %35, %36 : vector<1x1xf32>
    %38 = vector.broadcast %33 : vector<1x1xf32> to vector<8x12xf32>
    %39 = arith.subf %20, %38 : vector<8x12xf32>
    %cst_24 = arith.constant 9.99999974E-6 : f32
    %40 = vector.broadcast %cst_24 : f32 to vector<1x1xf32>
    %41 = arith.addf %37, %40 : vector<1x1xf32>
    %42 = math.rsqrt %41 : vector<1x1xf32>
    %43 = vector.broadcast %42 : vector<1x1xf32> to vector<8x12xf32>
    %44 = arith.mulf %39, %43 : vector<8x12xf32>
    %c0_25 = arith.constant 0 : index
    %c0_26 = arith.constant 0 : index
    %45 = vector.load %arg3[%c0_25, %c0_26] : memref<7x1xf32, #tpu.memory_space<vmem>>, vector<1x1xf32>
    %46 = vector.broadcast %45 : vector<1x1xf32> to vector<8x12xf32>
    %47 = arith.mulf %44, %46 : vector<8x12xf32>
    %c0_27 = arith.constant 0 : index
    %c0_28 = arith.constant 0 : index
    %48 = vector.load %arg4[%c0_27, %c0_28] : memref<7x1xf32, #tpu.memory_space<vmem>>, vector<1x1xf32>
    %49 = vector.broadcast %48 : vector<1x1xf32> to vector<8x12xf32>
    %50 = arith.addf %47, %49 : vector<8x12xf32>
    %cst_29 = arith.constant 0.000000e+00 : f32
    %51 = vector.broadcast %cst_29 : f32 to vector<8x12xf32>
    %52 = arith.cmpf oge, %50, %51 : vector<8x12xf32>
    %cst_30 = arith.constant 0.00999999977 : f32
    %53 = vector.broadcast %cst_30 : f32 to vector<8x12xf32>
    %54 = arith.mulf %53, %50 : vector<8x12xf32>
    %55 = arith.select %52, %50, %54 : vector<8x12xi1>, vector<8x12xf32>
    %56 = vector.broadcast %17 : vector<1x12xf32> to vector<8x12xf32>
    %57 = arith.mulf %55, %56 : vector<8x12xf32>
    %58 = arith.truncf %57 : vector<8x12xf32> to vector<8x12xbf16>
    %c0_31 = arith.constant 0 : index
    %c1_32 = arith.constant 1 : index
    %59 = vector.load %arg6[%c0_31, %c1_32] : memref<56x14xbf16, #tpu.memory_space<vmem>>, vector<8x12xbf16>
    tpu.vector_store %arg6[%c0_31, %c1_32], %58 {strides = array<i32>} : memref<56x14xbf16, #tpu.memory_space<vmem>>, vector<8x12xbf16>,
    %cst_33 = arith.constant 0.000000e+00 : bf16
    %60 = vector.broadcast %cst_33 : bf16 to vector<8x1xbf16>
    %c0_34 = arith.constant 0 : index
    %c0_35 = arith.constant 0 : index
    %61 = vector.load %arg6[%c0_34, %c0_35] : memref<56x14xbf16, #tpu.memory_space<vmem>>, vector<8x1xbf16>
    tpu.vector_store %arg6[%c0_34, %c0_35], %60 {strides = array<i32>} : memref<56x14xbf16, #tpu.memory_space<vmem>>, vector<8x1xbf16>,
    %cst_36 = arith.constant 0.000000e+00 : bf16
    %62 = vector.broadcast %cst_36 : bf16 to vector<8x1xbf16>
    %c0_37 = arith.constant 0 : index
    %c13 = arith.constant 13 : index
    %63 = vector.load %arg6[%c0_37, %c13] : memref<56x14xbf16, #tpu.memory_space<vmem>>, vector<8x1xbf16>
    tpu.vector_store %arg6[%c0_37, %c13], %62 {strides = array<i32>} : memref<56x14xbf16, #tpu.memory_space<vmem>>, vector<8x1xbf16>,
    %64 = vector.extract_strided_slice %16 {offsets = [16, 0], sizes = [8, 12], strides = [1, 1]} : vector<120x12xf32> to vector<8x12xf32>
    %65 = vector.extract_strided_slice %16 {offsets = [24, 0], sizes = [8, 12], strides = [1, 1]} : vector<120x12xf32> to vector<8x12xf32>
    %66 = arith.maximumf %64, %65 : vector<8x12xf32>
    %67 = vector.broadcast %17 : vector<1x12xf32> to vector<8x12xf32>
    %68 = arith.mulf %66, %67 : vector<8x12xf32>
    %cst_38 = arith.constant dense<0.000000e+00> : vector<8xf32>
    %69 = vector.multi_reduction <add>, %68, %cst_38 [1] : vector<8x12xf32> to vector<8xf32>
    %70 = vector.shape_cast %69 : vector<8xf32> to vector<8x1xf32>
    %cst_39 = arith.constant dense<0.000000e+00> : vector<1xf32>
    %71 = vector.multi_reduction <add>, %70, %cst_39 [0] : vector<8x1xf32> to vector<1xf32>
    %72 = vector.shape_cast %71 : vector<1xf32> to vector<1x1xf32>
    %73 = arith.mulf %68, %68 : vector<8x12xf32>
    %cst_40 = arith.constant dense<0.000000e+00> : vector<8xf32>
    %74 = vector.multi_reduction <add>, %73, %cst_40 [1] : vector<8x12xf32> to vector<8xf32>
    %75 = vector.shape_cast %74 : vector<8xf32> to vector<8x1xf32>
    %cst_41 = arith.constant dense<0.000000e+00> : vector<1xf32>
    %76 = vector.multi_reduction <add>, %75, %cst_41 [0] : vector<8x1xf32> to vector<1xf32>
    %77 = vector.shape_cast %76 : vector<1xf32> to vector<1x1xf32>
    %cst_42 = arith.constant 1.562500e-02 : f32
    %78 = vector.broadcast %cst_42 : f32 to vector<1x1xf32>
    %79 = arith.mulf %72, %78 : vector<1x1xf32>
    %cst_43 = arith.constant 1.562500e-02 : f32
    %80 = vector.broadcast %cst_43 : f32 to vector<1x1xf32>
    %81 = arith.mulf %77, %80 : vector<1x1xf32>
    %82 = arith.mulf %79, %79 : vector<1x1xf32>
    %83 = arith.subf %81, %82 : vector<1x1xf32>
    %84 = vector.broadcast %79 : vector<1x1xf32> to vector<8x12xf32>
    %85 = arith.subf %66, %84 : vector<8x12xf32>
    %cst_44 = arith.constant 9.99999974E-6 : f32
    %86 = vector.broadcast %cst_44 : f32 to vector<1x1xf32>
    %87 = arith.addf %83, %86 : vector<1x1xf32>
    %88 = math.rsqrt %87 : vector<1x1xf32>
    %89 = vector.broadcast %88 : vector<1x1xf32> to vector<8x12xf32>
    %90 = arith.mulf %85, %89 : vector<8x12xf32>
    %c1_45 = arith.constant 1 : index
    %c0_46 = arith.constant 0 : index
    %91 = vector.load %arg3[%c1_45, %c0_46] : memref<7x1xf32, #tpu.memory_space<vmem>>, vector<1x1xf32>
    %92 = vector.broadcast %91 : vector<1x1xf32> to vector<8x12xf32>
    %93 = arith.mulf %90, %92 : vector<8x12xf32>
    %c1_47 = arith.constant 1 : index
    %c0_48 = arith.constant 0 : index
    %94 = vector.load %arg4[%c1_47, %c0_48] : memref<7x1xf32, #tpu.memory_space<vmem>>, vector<1x1xf32>
    %95 = vector.broadcast %94 : vector<1x1xf32> to vector<8x12xf32>
    %96 = arith.addf %93, %95 : vector<8x12xf32>
    %cst_49 = arith.constant 0.000000e+00 : f32
    %97 = vector.broadcast %cst_49 : f32 to vector<8x12xf32>
    %98 = arith.cmpf oge, %96, %97 : vector<8x12xf32>
    %cst_50 = arith.constant 0.00999999977 : f32
    %99 = vector.broadcast %cst_50 : f32 to vector<8x12xf32>
    %100 = arith.mulf %99, %96 : vector<8x12xf32>
    %101 = arith.select %98, %96, %100 : vector<8x12xi1>, vector<8x12xf32>
    %102 = vector.broadcast %17 : vector<1x12xf32> to vector<8x12xf32>
    %103 = arith.mulf %101, %102 : vector<8x12xf32>
    %104 = arith.truncf %103 : vector<8x12xf32> to vector<8x12xbf16>
    %c8 = arith.constant 8 : index
    %c1_51 = arith.constant 1 : index
    %105 = vector.load %arg6[%c8, %c1_51] : memref<56x14xbf16, #tpu.memory_space<vmem>>, vector<8x12xbf16>
    tpu.vector_store %arg6[%c8, %c1_51], %104 {strides = array<i32>} : memref<56x14xbf16, #tpu.memory_space<vmem>>, vector<8x12xbf16>,
    %cst_52 = arith.constant 0.000000e+00 : bf16
    %106 = vector.broadcast %cst_52 : bf16 to vector<8x1xbf16>
    %c8_53 = arith.constant 8 : index
    %c0_54 = arith.constant 0 : index
    %107 = vector.load %arg6[%c8_53, %c0_54] : memref<56x14xbf16, #tpu.memory_space<vmem>>, vector<8x1xbf16>
    tpu.vector_store %arg6[%c8_53, %c0_54], %106 {strides = array<i32>} : memref<56x14xbf16, #tpu.memory_space<vmem>>, vector<8x1xbf16>,
    %cst_55 = arith.constant 0.000000e+00 : bf16
    %108 = vector.broadcast %cst_55 : bf16 to vector<8x1xbf16>
    %c8_56 = arith.constant 8 : index
    %c13_57 = arith.constant 13 : index
    %109 = vector.load %arg6[%c8_56, %c13_57] : memref<56x14xbf16, #tpu.memory_space<vmem>>, vector<8x1xbf16>
    tpu.vector_store %arg6[%c8_56, %c13_57], %108 {strides = array<i32>} : memref<56x14xbf16, #tpu.memory_space<vmem>>, vector<8x1xbf16>,
    %110 = vector.extract_strided_slice %16 {offsets = [32, 0], sizes = [8, 12], strides = [1, 1]} : vector<120x12xf32> to vector<8x12xf32>
    %111 = vector.extract_strided_slice %16 {offsets = [40, 0], sizes = [8, 12], strides = [1, 1]} : vector<120x12xf32> to vector<8x12xf32>
    %112 = arith.maximumf %110, %111 : vector<8x12xf32>
    %113 = vector.broadcast %17 : vector<1x12xf32> to vector<8x12xf32>
    %114 = arith.mulf %112, %113 : vector<8x12xf32>
    %cst_58 = arith.constant dense<0.000000e+00> : vector<8xf32>
    %115 = vector.multi_reduction <add>, %114, %cst_58 [1] : vector<8x12xf32> to vector<8xf32>
    %116 = vector.shape_cast %115 : vector<8xf32> to vector<8x1xf32>
    %cst_59 = arith.constant dense<0.000000e+00> : vector<1xf32>
    %117 = vector.multi_reduction <add>, %116, %cst_59 [0] : vector<8x1xf32> to vector<1xf32>
    %118 = vector.shape_cast %117 : vector<1xf32> to vector<1x1xf32>
    %119 = arith.mulf %114, %114 : vector<8x12xf32>
    %cst_60 = arith.constant dense<0.000000e+00> : vector<8xf32>
    %120 = vector.multi_reduction <add>, %119, %cst_60 [1] : vector<8x12xf32> to vector<8xf32>
    %121 = vector.shape_cast %120 : vector<8xf32> to vector<8x1xf32>
    %cst_61 = arith.constant dense<0.000000e+00> : vector<1xf32>
    %122 = vector.multi_reduction <add>, %121, %cst_61 [0] : vector<8x1xf32> to vector<1xf32>
    %123 = vector.shape_cast %122 : vector<1xf32> to vector<1x1xf32>
    %cst_62 = arith.constant 1.562500e-02 : f32
    %124 = vector.broadcast %cst_62 : f32 to vector<1x1xf32>
    %125 = arith.mulf %118, %124 : vector<1x1xf32>
    %cst_63 = arith.constant 1.562500e-02 : f32
    %126 = vector.broadcast %cst_63 : f32 to vector<1x1xf32>
    %127 = arith.mulf %123, %126 : vector<1x1xf32>
    %128 = arith.mulf %125, %125 : vector<1x1xf32>
    %129 = arith.subf %127, %128 : vector<1x1xf32>
    %130 = vector.broadcast %125 : vector<1x1xf32> to vector<8x12xf32>
    %131 = arith.subf %112, %130 : vector<8x12xf32>
    %cst_64 = arith.constant 9.99999974E-6 : f32
    %132 = vector.broadcast %cst_64 : f32 to vector<1x1xf32>
    %133 = arith.addf %129, %132 : vector<1x1xf32>
    %134 = math.rsqrt %133 : vector<1x1xf32>
    %135 = vector.broadcast %134 : vector<1x1xf32> to vector<8x12xf32>
    %136 = arith.mulf %131, %135 : vector<8x12xf32>
    %c2_65 = arith.constant 2 : index
    %c0_66 = arith.constant 0 : index
    %137 = vector.load %arg3[%c2_65, %c0_66] : memref<7x1xf32, #tpu.memory_space<vmem>>, vector<1x1xf32>
    %138 = vector.broadcast %137 : vector<1x1xf32> to vector<8x12xf32>
    %139 = arith.mulf %136, %138 : vector<8x12xf32>
    %c2_67 = arith.constant 2 : index
    %c0_68 = arith.constant 0 : index
    %140 = vector.load %arg4[%c2_67, %c0_68] : memref<7x1xf32, #tpu.memory_space<vmem>>, vector<1x1xf32>
    %141 = vector.broadcast %140 : vector<1x1xf32> to vector<8x12xf32>
    %142 = arith.addf %139, %141 : vector<8x12xf32>
    %cst_69 = arith.constant 0.000000e+00 : f32
    %143 = vector.broadcast %cst_69 : f32 to vector<8x12xf32>
    %144 = arith.cmpf oge, %142, %143 : vector<8x12xf32>
    %cst_70 = arith.constant 0.00999999977 : f32
    %145 = vector.broadcast %cst_70 : f32 to vector<8x12xf32>
    %146 = arith.mulf %145, %142 : vector<8x12xf32>
    %147 = arith.select %144, %142, %146 : vector<8x12xi1>, vector<8x12xf32>
    %148 = vector.broadcast %17 : vector<1x12xf32> to vector<8x12xf32>
    %149 = arith.mulf %147, %148 : vector<8x12xf32>
    %150 = arith.truncf %149 : vector<8x12xf32> to vector<8x12xbf16>
    %c16 = arith.constant 16 : index
    %c1_71 = arith.constant 1 : index
    %151 = vector.load %arg6[%c16, %c1_71] : memref<56x14xbf16, #tpu.memory_space<vmem>>, vector<8x12xbf16>
    tpu.vector_store %arg6[%c16, %c1_71], %150 {strides = array<i32>} : memref<56x14xbf16, #tpu.memory_space<vmem>>, vector<8x12xbf16>,
    %cst_72 = arith.constant 0.000000e+00 : bf16
    %152 = vector.broadcast %cst_72 : bf16 to vector<8x1xbf16>
    %c16_73 = arith.constant 16 : index
    %c0_74 = arith.constant 0 : index
    %153 = vector.load %arg6[%c16_73, %c0_74] : memref<56x14xbf16, #tpu.memory_space<vmem>>, vector<8x1xbf16>
    tpu.vector_store %arg6[%c16_73, %c0_74], %152 {strides = array<i32>} : memref<56x14xbf16, #tpu.memory_space<vmem>>, vector<8x1xbf16>,
    %cst_75 = arith.constant 0.000000e+00 : bf16
    %154 = vector.broadcast %cst_75 : bf16 to vector<8x1xbf16>
    %c16_76 = arith.constant 16 : index
    %c13_77 = arith.constant 13 : index
    %155 = vector.load %arg6[%c16_76, %c13_77] : memref<56x14xbf16, #tpu.memory_space<vmem>>, vector<8x1xbf16>
    tpu.vector_store %arg6[%c16_76, %c13_77], %154 {strides = array<i32>} : memref<56x14xbf16, #tpu.memory_space<vmem>>, vector<8x1xbf16>,
    %156 = vector.extract_strided_slice %16 {offsets = [48, 0], sizes = [8, 12], strides = [1, 1]} : vector<120x12xf32> to vector<8x12xf32>
    %157 = vector.extract_strided_slice %16 {offsets = [56, 0], sizes = [8, 12], strides = [1, 1]} : vector<120x12xf32> to vector<8x12xf32>
    %158 = arith.maximumf %156, %157 : vector<8x12xf32>
    %159 = vector.broadcast %17 : vector<1x12xf32> to vector<8x12xf32>
    %160 = arith.mulf %158, %159 : vector<8x12xf32>
    %cst_78 = arith.constant dense<0.000000e+00> : vector<8xf32>
    %161 = vector.multi_reduction <add>, %160, %cst_78 [1] : vector<8x12xf32> to vector<8xf32>
    %162 = vector.shape_cast %161 : vector<8xf32> to vector<8x1xf32>
    %cst_79 = arith.constant dense<0.000000e+00> : vector<1xf32>
    %163 = vector.multi_reduction <add>, %162, %cst_79 [0] : vector<8x1xf32> to vector<1xf32>
    %164 = vector.shape_cast %163 : vector<1xf32> to vector<1x1xf32>
    %165 = arith.mulf %160, %160 : vector<8x12xf32>
    %cst_80 = arith.constant dense<0.000000e+00> : vector<8xf32>
    %166 = vector.multi_reduction <add>, %165, %cst_80 [1] : vector<8x12xf32> to vector<8xf32>
    %167 = vector.shape_cast %166 : vector<8xf32> to vector<8x1xf32>
    %cst_81 = arith.constant dense<0.000000e+00> : vector<1xf32>
    %168 = vector.multi_reduction <add>, %167, %cst_81 [0] : vector<8x1xf32> to vector<1xf32>
    %169 = vector.shape_cast %168 : vector<1xf32> to vector<1x1xf32>
    %cst_82 = arith.constant 1.562500e-02 : f32
    %170 = vector.broadcast %cst_82 : f32 to vector<1x1xf32>
    %171 = arith.mulf %164, %170 : vector<1x1xf32>
    %cst_83 = arith.constant 1.562500e-02 : f32
    %172 = vector.broadcast %cst_83 : f32 to vector<1x1xf32>
    %173 = arith.mulf %169, %172 : vector<1x1xf32>
    %174 = arith.mulf %171, %171 : vector<1x1xf32>
    %175 = arith.subf %173, %174 : vector<1x1xf32>
    %176 = vector.broadcast %171 : vector<1x1xf32> to vector<8x12xf32>
    %177 = arith.subf %158, %176 : vector<8x12xf32>
    %cst_84 = arith.constant 9.99999974E-6 : f32
    %178 = vector.broadcast %cst_84 : f32 to vector<1x1xf32>
    %179 = arith.addf %175, %178 : vector<1x1xf32>
    %180 = math.rsqrt %179 : vector<1x1xf32>
    %181 = vector.broadcast %180 : vector<1x1xf32> to vector<8x12xf32>
    %182 = arith.mulf %177, %181 : vector<8x12xf32>
    %c3 = arith.constant 3 : index
    %c0_85 = arith.constant 0 : index
    %183 = vector.load %arg3[%c3, %c0_85] : memref<7x1xf32, #tpu.memory_space<vmem>>, vector<1x1xf32>
    %184 = vector.broadcast %183 : vector<1x1xf32> to vector<8x12xf32>
    %185 = arith.mulf %182, %184 : vector<8x12xf32>
    %c3_86 = arith.constant 3 : index
    %c0_87 = arith.constant 0 : index
    %186 = vector.load %arg4[%c3_86, %c0_87] : memref<7x1xf32, #tpu.memory_space<vmem>>, vector<1x1xf32>
    %187 = vector.broadcast %186 : vector<1x1xf32> to vector<8x12xf32>
    %188 = arith.addf %185, %187 : vector<8x12xf32>
    %cst_88 = arith.constant 0.000000e+00 : f32
    %189 = vector.broadcast %cst_88 : f32 to vector<8x12xf32>
    %190 = arith.cmpf oge, %188, %189 : vector<8x12xf32>
    %cst_89 = arith.constant 0.00999999977 : f32
    %191 = vector.broadcast %cst_89 : f32 to vector<8x12xf32>
    %192 = arith.mulf %191, %188 : vector<8x12xf32>
    %193 = arith.select %190, %188, %192 : vector<8x12xi1>, vector<8x12xf32>
    %194 = vector.broadcast %17 : vector<1x12xf32> to vector<8x12xf32>
    %195 = arith.mulf %193, %194 : vector<8x12xf32>
    %196 = arith.truncf %195 : vector<8x12xf32> to vector<8x12xbf16>
    %c24 = arith.constant 24 : index
    %c1_90 = arith.constant 1 : index
    %197 = vector.load %arg6[%c24, %c1_90] : memref<56x14xbf16, #tpu.memory_space<vmem>>, vector<8x12xbf16>
    tpu.vector_store %arg6[%c24, %c1_90], %196 {strides = array<i32>} : memref<56x14xbf16, #tpu.memory_space<vmem>>, vector<8x12xbf16>,
    %cst_91 = arith.constant 0.000000e+00 : bf16
    %198 = vector.broadcast %cst_91 : bf16 to vector<8x1xbf16>
    %c24_92 = arith.constant 24 : index
    %c0_93 = arith.constant 0 : index
    %199 = vector.load %arg6[%c24_92, %c0_93] : memref<56x14xbf16, #tpu.memory_space<vmem>>, vector<8x1xbf16>
    tpu.vector_store %arg6[%c24_92, %c0_93], %198 {strides = array<i32>} : memref<56x14xbf16, #tpu.memory_space<vmem>>, vector<8x1xbf16>,
    %cst_94 = arith.constant 0.000000e+00 : bf16
    %200 = vector.broadcast %cst_94 : bf16 to vector<8x1xbf16>
    %c24_95 = arith.constant 24 : index
    %c13_96 = arith.constant 13 : index
    %201 = vector.load %arg6[%c24_95, %c13_96] : memref<56x14xbf16, #tpu.memory_space<vmem>>, vector<8x1xbf16>
    tpu.vector_store %arg6[%c24_95, %c13_96], %200 {strides = array<i32>} : memref<56x14xbf16, #tpu.memory_space<vmem>>, vector<8x1xbf16>,
    %202 = vector.extract_strided_slice %16 {offsets = [64, 0], sizes = [8, 12], strides = [1, 1]} : vector<120x12xf32> to vector<8x12xf32>
    %203 = vector.extract_strided_slice %16 {offsets = [72, 0], sizes = [8, 12], strides = [1, 1]} : vector<120x12xf32> to vector<8x12xf32>
    %204 = arith.maximumf %202, %203 : vector<8x12xf32>
    %205 = vector.broadcast %17 : vector<1x12xf32> to vector<8x12xf32>
    %206 = arith.mulf %204, %205 : vector<8x12xf32>
    %cst_97 = arith.constant dense<0.000000e+00> : vector<8xf32>
    %207 = vector.multi_reduction <add>, %206, %cst_97 [1] : vector<8x12xf32> to vector<8xf32>
    %208 = vector.shape_cast %207 : vector<8xf32> to vector<8x1xf32>
    %cst_98 = arith.constant dense<0.000000e+00> : vector<1xf32>
    %209 = vector.multi_reduction <add>, %208, %cst_98 [0] : vector<8x1xf32> to vector<1xf32>
    %210 = vector.shape_cast %209 : vector<1xf32> to vector<1x1xf32>
    %211 = arith.mulf %206, %206 : vector<8x12xf32>
    %cst_99 = arith.constant dense<0.000000e+00> : vector<8xf32>
    %212 = vector.multi_reduction <add>, %211, %cst_99 [1] : vector<8x12xf32> to vector<8xf32>
    %213 = vector.shape_cast %212 : vector<8xf32> to vector<8x1xf32>
    %cst_100 = arith.constant dense<0.000000e+00> : vector<1xf32>
    %214 = vector.multi_reduction <add>, %213, %cst_100 [0] : vector<8x1xf32> to vector<1xf32>
    %215 = vector.shape_cast %214 : vector<1xf32> to vector<1x1xf32>
    %cst_101 = arith.constant 1.562500e-02 : f32
    %216 = vector.broadcast %cst_101 : f32 to vector<1x1xf32>
    %217 = arith.mulf %210, %216 : vector<1x1xf32>
    %cst_102 = arith.constant 1.562500e-02 : f32
    %218 = vector.broadcast %cst_102 : f32 to vector<1x1xf32>
    %219 = arith.mulf %215, %218 : vector<1x1xf32>
    %220 = arith.mulf %217, %217 : vector<1x1xf32>
    %221 = arith.subf %219, %220 : vector<1x1xf32>
    %222 = vector.broadcast %217 : vector<1x1xf32> to vector<8x12xf32>
    %223 = arith.subf %204, %222 : vector<8x12xf32>
    %cst_103 = arith.constant 9.99999974E-6 : f32
    %224 = vector.broadcast %cst_103 : f32 to vector<1x1xf32>
    %225 = arith.addf %221, %224 : vector<1x1xf32>
    %226 = math.rsqrt %225 : vector<1x1xf32>
    %227 = vector.broadcast %226 : vector<1x1xf32> to vector<8x12xf32>
    %228 = arith.mulf %223, %227 : vector<8x12xf32>
    %c4 = arith.constant 4 : index
    %c0_104 = arith.constant 0 : index
    %229 = vector.load %arg3[%c4, %c0_104] : memref<7x1xf32, #tpu.memory_space<vmem>>, vector<1x1xf32>
    %230 = vector.broadcast %229 : vector<1x1xf32> to vector<8x12xf32>
    %231 = arith.mulf %228, %230 : vector<8x12xf32>
    %c4_105 = arith.constant 4 : index
    %c0_106 = arith.constant 0 : index
    %232 = vector.load %arg4[%c4_105, %c0_106] : memref<7x1xf32, #tpu.memory_space<vmem>>, vector<1x1xf32>
    %233 = vector.broadcast %232 : vector<1x1xf32> to vector<8x12xf32>
    %234 = arith.addf %231, %233 : vector<8x12xf32>
    %cst_107 = arith.constant 0.000000e+00 : f32
    %235 = vector.broadcast %cst_107 : f32 to vector<8x12xf32>
    %236 = arith.cmpf oge, %234, %235 : vector<8x12xf32>
    %cst_108 = arith.constant 0.00999999977 : f32
    %237 = vector.broadcast %cst_108 : f32 to vector<8x12xf32>
    %238 = arith.mulf %237, %234 : vector<8x12xf32>
    %239 = arith.select %236, %234, %238 : vector<8x12xi1>, vector<8x12xf32>
    %240 = vector.broadcast %17 : vector<1x12xf32> to vector<8x12xf32>
    %241 = arith.mulf %239, %240 : vector<8x12xf32>
    %242 = arith.truncf %241 : vector<8x12xf32> to vector<8x12xbf16>
    %c32 = arith.constant 32 : index
    %c1_109 = arith.constant 1 : index
    %243 = vector.load %arg6[%c32, %c1_109] : memref<56x14xbf16, #tpu.memory_space<vmem>>, vector<8x12xbf16>
    tpu.vector_store %arg6[%c32, %c1_109], %242 {strides = array<i32>} : memref<56x14xbf16, #tpu.memory_space<vmem>>, vector<8x12xbf16>,
    %cst_110 = arith.constant 0.000000e+00 : bf16
    %244 = vector.broadcast %cst_110 : bf16 to vector<8x1xbf16>
    %c32_111 = arith.constant 32 : index
    %c0_112 = arith.constant 0 : index
    %245 = vector.load %arg6[%c32_111, %c0_112] : memref<56x14xbf16, #tpu.memory_space<vmem>>, vector<8x1xbf16>
    tpu.vector_store %arg6[%c32_111, %c0_112], %244 {strides = array<i32>} : memref<56x14xbf16, #tpu.memory_space<vmem>>, vector<8x1xbf16>,
    %cst_113 = arith.constant 0.000000e+00 : bf16
    %246 = vector.broadcast %cst_113 : bf16 to vector<8x1xbf16>
    %c32_114 = arith.constant 32 : index
    %c13_115 = arith.constant 13 : index
    %247 = vector.load %arg6[%c32_114, %c13_115] : memref<56x14xbf16, #tpu.memory_space<vmem>>, vector<8x1xbf16>
    tpu.vector_store %arg6[%c32_114, %c13_115], %246 {strides = array<i32>} : memref<56x14xbf16, #tpu.memory_space<vmem>>, vector<8x1xbf16>,
    %248 = vector.extract_strided_slice %16 {offsets = [80, 0], sizes = [8, 12], strides = [1, 1]} : vector<120x12xf32> to vector<8x12xf32>
    %249 = vector.extract_strided_slice %16 {offsets = [88, 0], sizes = [8, 12], strides = [1, 1]} : vector<120x12xf32> to vector<8x12xf32>
    %250 = arith.maximumf %248, %249 : vector<8x12xf32>
    %251 = vector.broadcast %17 : vector<1x12xf32> to vector<8x12xf32>
    %252 = arith.mulf %250, %251 : vector<8x12xf32>
    %cst_116 = arith.constant dense<0.000000e+00> : vector<8xf32>
    %253 = vector.multi_reduction <add>, %252, %cst_116 [1] : vector<8x12xf32> to vector<8xf32>
    %254 = vector.shape_cast %253 : vector<8xf32> to vector<8x1xf32>
    %cst_117 = arith.constant dense<0.000000e+00> : vector<1xf32>
    %255 = vector.multi_reduction <add>, %254, %cst_117 [0] : vector<8x1xf32> to vector<1xf32>
    %256 = vector.shape_cast %255 : vector<1xf32> to vector<1x1xf32>
    %257 = arith.mulf %252, %252 : vector<8x12xf32>
    %cst_118 = arith.constant dense<0.000000e+00> : vector<8xf32>
    %258 = vector.multi_reduction <add>, %257, %cst_118 [1] : vector<8x12xf32> to vector<8xf32>
    %259 = vector.shape_cast %258 : vector<8xf32> to vector<8x1xf32>
    %cst_119 = arith.constant dense<0.000000e+00> : vector<1xf32>
    %260 = vector.multi_reduction <add>, %259, %cst_119 [0] : vector<8x1xf32> to vector<1xf32>
    %261 = vector.shape_cast %260 : vector<1xf32> to vector<1x1xf32>
    %cst_120 = arith.constant 1.562500e-02 : f32
    %262 = vector.broadcast %cst_120 : f32 to vector<1x1xf32>
    %263 = arith.mulf %256, %262 : vector<1x1xf32>
    %cst_121 = arith.constant 1.562500e-02 : f32
    %264 = vector.broadcast %cst_121 : f32 to vector<1x1xf32>
    %265 = arith.mulf %261, %264 : vector<1x1xf32>
    %266 = arith.mulf %263, %263 : vector<1x1xf32>
    %267 = arith.subf %265, %266 : vector<1x1xf32>
    %268 = vector.broadcast %263 : vector<1x1xf32> to vector<8x12xf32>
    %269 = arith.subf %250, %268 : vector<8x12xf32>
    %cst_122 = arith.constant 9.99999974E-6 : f32
    %270 = vector.broadcast %cst_122 : f32 to vector<1x1xf32>
    %271 = arith.addf %267, %270 : vector<1x1xf32>
    %272 = math.rsqrt %271 : vector<1x1xf32>
    %273 = vector.broadcast %272 : vector<1x1xf32> to vector<8x12xf32>
    %274 = arith.mulf %269, %273 : vector<8x12xf32>
    %c5 = arith.constant 5 : index
    %c0_123 = arith.constant 0 : index
    %275 = vector.load %arg3[%c5, %c0_123] : memref<7x1xf32, #tpu.memory_space<vmem>>, vector<1x1xf32>
    %276 = vector.broadcast %275 : vector<1x1xf32> to vector<8x12xf32>
    %277 = arith.mulf %274, %276 : vector<8x12xf32>
    %c5_124 = arith.constant 5 : index
    %c0_125 = arith.constant 0 : index
    %278 = vector.load %arg4[%c5_124, %c0_125] : memref<7x1xf32, #tpu.memory_space<vmem>>, vector<1x1xf32>
    %279 = vector.broadcast %278 : vector<1x1xf32> to vector<8x12xf32>
    %280 = arith.addf %277, %279 : vector<8x12xf32>
    %cst_126 = arith.constant 0.000000e+00 : f32
    %281 = vector.broadcast %cst_126 : f32 to vector<8x12xf32>
    %282 = arith.cmpf oge, %280, %281 : vector<8x12xf32>
    %cst_127 = arith.constant 0.00999999977 : f32
    %283 = vector.broadcast %cst_127 : f32 to vector<8x12xf32>
    %284 = arith.mulf %283, %280 : vector<8x12xf32>
    %285 = arith.select %282, %280, %284 : vector<8x12xi1>, vector<8x12xf32>
    %286 = vector.broadcast %17 : vector<1x12xf32> to vector<8x12xf32>
    %287 = arith.mulf %285, %286 : vector<8x12xf32>
    %288 = arith.truncf %287 : vector<8x12xf32> to vector<8x12xbf16>
    %c40 = arith.constant 40 : index
    %c1_128 = arith.constant 1 : index
    %289 = vector.load %arg6[%c40, %c1_128] : memref<56x14xbf16, #tpu.memory_space<vmem>>, vector<8x12xbf16>
    tpu.vector_store %arg6[%c40, %c1_128], %288 {strides = array<i32>} : memref<56x14xbf16, #tpu.memory_space<vmem>>, vector<8x12xbf16>,
    %cst_129 = arith.constant 0.000000e+00 : bf16
    %290 = vector.broadcast %cst_129 : bf16 to vector<8x1xbf16>
    %c40_130 = arith.constant 40 : index
    %c0_131 = arith.constant 0 : index
    %291 = vector.load %arg6[%c40_130, %c0_131] : memref<56x14xbf16, #tpu.memory_space<vmem>>, vector<8x1xbf16>
    tpu.vector_store %arg6[%c40_130, %c0_131], %290 {strides = array<i32>} : memref<56x14xbf16, #tpu.memory_space<vmem>>, vector<8x1xbf16>,
    %cst_132 = arith.constant 0.000000e+00 : bf16
    %292 = vector.broadcast %cst_132 : bf16 to vector<8x1xbf16>
    %c40_133 = arith.constant 40 : index
    %c13_134 = arith.constant 13 : index
    %293 = vector.load %arg6[%c40_133, %c13_134] : memref<56x14xbf16, #tpu.memory_space<vmem>>, vector<8x1xbf16>
    tpu.vector_store %arg6[%c40_133, %c13_134], %292 {strides = array<i32>} : memref<56x14xbf16, #tpu.memory_space<vmem>>, vector<8x1xbf16>,
    %294 = vector.extract_strided_slice %16 {offsets = [96, 0], sizes = [8, 12], strides = [1, 1]} : vector<120x12xf32> to vector<8x12xf32>
    %295 = vector.extract_strided_slice %16 {offsets = [104, 0], sizes = [8, 12], strides = [1, 1]} : vector<120x12xf32> to vector<8x12xf32>
    %296 = arith.maximumf %294, %295 : vector<8x12xf32>
    %297 = vector.broadcast %17 : vector<1x12xf32> to vector<8x12xf32>
    %298 = arith.mulf %296, %297 : vector<8x12xf32>
    %cst_135 = arith.constant dense<0.000000e+00> : vector<8xf32>
    %299 = vector.multi_reduction <add>, %298, %cst_135 [1] : vector<8x12xf32> to vector<8xf32>
    %300 = vector.shape_cast %299 : vector<8xf32> to vector<8x1xf32>
    %cst_136 = arith.constant dense<0.000000e+00> : vector<1xf32>
    %301 = vector.multi_reduction <add>, %300, %cst_136 [0] : vector<8x1xf32> to vector<1xf32>
    %302 = vector.shape_cast %301 : vector<1xf32> to vector<1x1xf32>
    %303 = arith.mulf %298, %298 : vector<8x12xf32>
    %cst_137 = arith.constant dense<0.000000e+00> : vector<8xf32>
    %304 = vector.multi_reduction <add>, %303, %cst_137 [1] : vector<8x12xf32> to vector<8xf32>
    %305 = vector.shape_cast %304 : vector<8xf32> to vector<8x1xf32>
    %cst_138 = arith.constant dense<0.000000e+00> : vector<1xf32>
    %306 = vector.multi_reduction <add>, %305, %cst_138 [0] : vector<8x1xf32> to vector<1xf32>
    %307 = vector.shape_cast %306 : vector<1xf32> to vector<1x1xf32>
    %cst_139 = arith.constant 1.562500e-02 : f32
    %308 = vector.broadcast %cst_139 : f32 to vector<1x1xf32>
    %309 = arith.mulf %302, %308 : vector<1x1xf32>
    %cst_140 = arith.constant 1.562500e-02 : f32
    %310 = vector.broadcast %cst_140 : f32 to vector<1x1xf32>
    %311 = arith.mulf %307, %310 : vector<1x1xf32>
    %312 = arith.mulf %309, %309 : vector<1x1xf32>
    %313 = arith.subf %311, %312 : vector<1x1xf32>
    %314 = vector.broadcast %309 : vector<1x1xf32> to vector<8x12xf32>
    %315 = arith.subf %296, %314 : vector<8x12xf32>
    %cst_141 = arith.constant 9.99999974E-6 : f32
    %316 = vector.broadcast %cst_141 : f32 to vector<1x1xf32>
    %317 = arith.addf %313, %316 : vector<1x1xf32>
    %318 = math.rsqrt %317 : vector<1x1xf32>
    %319 = vector.broadcast %318 : vector<1x1xf32> to vector<8x12xf32>
    %320 = arith.mulf %315, %319 : vector<8x12xf32>
    %c6 = arith.constant 6 : index
    %c0_142 = arith.constant 0 : index
    %321 = vector.load %arg3[%c6, %c0_142] : memref<7x1xf32, #tpu.memory_space<vmem>>, vector<1x1xf32>
    %322 = vector.broadcast %321 : vector<1x1xf32> to vector<8x12xf32>
    %323 = arith.mulf %320, %322 : vector<8x12xf32>
    %c6_143 = arith.constant 6 : index
    %c0_144 = arith.constant 0 : index
    %324 = vector.load %arg4[%c6_143, %c0_144] : memref<7x1xf32, #tpu.memory_space<vmem>>, vector<1x1xf32>
    %325 = vector.broadcast %324 : vector<1x1xf32> to vector<8x12xf32>
    %326 = arith.addf %323, %325 : vector<8x12xf32>
    %cst_145 = arith.constant 0.000000e+00 : f32
    %327 = vector.broadcast %cst_145 : f32 to vector<8x12xf32>
    %328 = arith.cmpf oge, %326, %327 : vector<8x12xf32>
    %cst_146 = arith.constant 0.00999999977 : f32
    %329 = vector.broadcast %cst_146 : f32 to vector<8x12xf32>
    %330 = arith.mulf %329, %326 : vector<8x12xf32>
    %331 = arith.select %328, %326, %330 : vector<8x12xi1>, vector<8x12xf32>
    %332 = vector.broadcast %17 : vector<1x12xf32> to vector<8x12xf32>
    %333 = arith.mulf %331, %332 : vector<8x12xf32>
    %334 = arith.truncf %333 : vector<8x12xf32> to vector<8x12xbf16>
    %c48 = arith.constant 48 : index
    %c1_147 = arith.constant 1 : index
    %335 = vector.load %arg6[%c48, %c1_147] : memref<56x14xbf16, #tpu.memory_space<vmem>>, vector<8x12xbf16>
    tpu.vector_store %arg6[%c48, %c1_147], %334 {strides = array<i32>} : memref<56x14xbf16, #tpu.memory_space<vmem>>, vector<8x12xbf16>,
    %cst_148 = arith.constant 0.000000e+00 : bf16
    %336 = vector.broadcast %cst_148 : bf16 to vector<8x1xbf16>
    %c48_149 = arith.constant 48 : index
    %c0_150 = arith.constant 0 : index
    %337 = vector.load %arg6[%c48_149, %c0_150] : memref<56x14xbf16, #tpu.memory_space<vmem>>, vector<8x1xbf16>
    tpu.vector_store %arg6[%c48_149, %c0_150], %336 {strides = array<i32>} : memref<56x14xbf16, #tpu.memory_space<vmem>>, vector<8x1xbf16>,
    %cst_151 = arith.constant 0.000000e+00 : bf16
    %338 = vector.broadcast %cst_151 : bf16 to vector<8x1xbf16>
    %c48_152 = arith.constant 48 : index
    %c13_153 = arith.constant 13 : index
    %339 = vector.load %arg6[%c48_152, %c13_153] : memref<56x14xbf16, #tpu.memory_space<vmem>>, vector<8x1xbf16>
    tpu.vector_store %arg6[%c48_152, %c13_153], %338 {strides = array<i32>} : memref<56x14xbf16, #tpu.memory_space<vmem>>, vector<8x1xbf16>,
    return
  }
}

module attributes {stable_mosaic.version = 11 : i64} {
  func.func @_stft_conv_kernel(%arg0: memref<56x14xbf16, #tpu.memory_space<vmem>>, %arg1: memref<3x80x56xbf16, #tpu.memory_space<vmem>>, %arg2: memref<80x1xf32, #tpu.memory_space<vmem>>, %arg3: memref<2x1xf32, #tpu.memory_space<vmem>>, %arg4: memref<2x1xf32, #tpu.memory_space<vmem>>, %arg5: memref<1x12xf32, #tpu.memory_space<vmem>>, %arg6: memref<32x14xbf16, #tpu.memory_space<vmem>>) attributes {dimension_semantics = [], scalar_prefetch = 0 : i64, scratch_operands = 0 : i64, tpu.core_type = #tpu.core_type<tc>} {
    %c0 = arith.constant 0 : index
    %c0_0 = arith.constant 0 : index
    %c0_1 = arith.constant 0 : index
    %0 = vector.load %arg1[%c0, %c0_0, %c0_1] : memref<3x80x56xbf16, #tpu.memory_space<vmem>>, vector<1x80x56xbf16>
    %1 = vector.shape_cast %0 : vector<1x80x56xbf16> to vector<80x56xbf16>
    %c0_2 = arith.constant 0 : index
    %c0_3 = arith.constant 0 : index
    %2 = vector.load %arg0[%c0_2, %c0_3] : memref<56x14xbf16, #tpu.memory_space<vmem>>, vector<56x12xbf16>
    %cst = arith.constant dense<0.000000e+00> : vector<80x12xf32>
    %3 = tpu.matmul %1, %2, %cst {dimension_numbers = #tpu.dot_dimension_numbers<[1], [0], [0], [1], [0, 0, 1, 1], [], []>} : vector<80x56xbf16>, vector<56x12xbf16>, vector<80x12xf32> -> vector<80x12xf32>
    %c1 = arith.constant 1 : index
    %c0_4 = arith.constant 0 : index
    %c0_5 = arith.constant 0 : index
    %4 = vector.load %arg1[%c1, %c0_4, %c0_5] : memref<3x80x56xbf16, #tpu.memory_space<vmem>>, vector<1x80x56xbf16>
    %5 = vector.shape_cast %4 : vector<1x80x56xbf16> to vector<80x56xbf16>
    %c0_6 = arith.constant 0 : index
    %c1_7 = arith.constant 1 : index
    %6 = vector.load %arg0[%c0_6, %c1_7] : memref<56x14xbf16, #tpu.memory_space<vmem>>, vector<56x12xbf16>
    %cst_8 = arith.constant dense<0.000000e+00> : vector<80x12xf32>
    %7 = tpu.matmul %5, %6, %cst_8 {dimension_numbers = #tpu.dot_dimension_numbers<[1], [0], [0], [1], [0, 0, 1, 1], [], []>} : vector<80x56xbf16>, vector<56x12xbf16>, vector<80x12xf32> -> vector<80x12xf32>
    %8 = arith.addf %3, %7 : vector<80x12xf32>
    %c2 = arith.constant 2 : index
    %c0_9 = arith.constant 0 : index
    %c0_10 = arith.constant 0 : index
    %9 = vector.load %arg1[%c2, %c0_9, %c0_10] : memref<3x80x56xbf16, #tpu.memory_space<vmem>>, vector<1x80x56xbf16>
    %10 = vector.shape_cast %9 : vector<1x80x56xbf16> to vector<80x56xbf16>
    %c0_11 = arith.constant 0 : index
    %c2_12 = arith.constant 2 : index
    %11 = vector.load %arg0[%c0_11, %c2_12] : memref<56x14xbf16, #tpu.memory_space<vmem>>, vector<56x12xbf16>
    %cst_13 = arith.constant dense<0.000000e+00> : vector<80x12xf32>
    %12 = tpu.matmul %10, %11, %cst_13 {dimension_numbers = #tpu.dot_dimension_numbers<[1], [0], [0], [1], [0, 0, 1, 1], [], []>} : vector<80x56xbf16>, vector<56x12xbf16>, vector<80x12xf32> -> vector<80x12xf32>
    %13 = arith.addf %8, %12 : vector<80x12xf32>
    %c0_14 = arith.constant 0 : index
    %c0_15 = arith.constant 0 : index
    %14 = vector.load %arg2[%c0_14, %c0_15] : memref<80x1xf32, #tpu.memory_space<vmem>>, vector<80x1xf32>
    %15 = vector.broadcast %14 : vector<80x1xf32> to vector<80x12xf32>
    %16 = arith.addf %13, %15 : vector<80x12xf32>
    %c0_16 = arith.constant 0 : index
    %c0_17 = arith.constant 0 : index
    %17 = vector.load %arg5[%c0_16, %c0_17] : memref<1x12xf32, #tpu.memory_space<vmem>>, vector<1x12xf32>
    %18 = vector.extract_strided_slice %16 {offsets = [0, 0], sizes = [16, 12], strides = [1, 1]} : vector<80x12xf32> to vector<16x12xf32>
    %19 = vector.extract_strided_slice %16 {offsets = [16, 0], sizes = [16, 12], strides = [1, 1]} : vector<80x12xf32> to vector<16x12xf32>
    %20 = arith.maximumf %18, %19 : vector<16x12xf32>
    %21 = vector.broadcast %17 : vector<1x12xf32> to vector<16x12xf32>
    %22 = arith.mulf %20, %21 : vector<16x12xf32>
    %cst_18 = arith.constant dense<0.000000e+00> : vector<16xf32>
    %23 = vector.multi_reduction <add>, %22, %cst_18 [1] : vector<16x12xf32> to vector<16xf32>
    %24 = vector.shape_cast %23 : vector<16xf32> to vector<16x1xf32>
    %cst_19 = arith.constant dense<0.000000e+00> : vector<1xf32>
    %25 = vector.multi_reduction <add>, %24, %cst_19 [0] : vector<16x1xf32> to vector<1xf32>
    %26 = vector.shape_cast %25 : vector<1xf32> to vector<1x1xf32>
    %27 = arith.mulf %22, %22 : vector<16x12xf32>
    %cst_20 = arith.constant dense<0.000000e+00> : vector<16xf32>
    %28 = vector.multi_reduction <add>, %27, %cst_20 [1] : vector<16x12xf32> to vector<16xf32>
    %29 = vector.shape_cast %28 : vector<16xf32> to vector<16x1xf32>
    %cst_21 = arith.constant dense<0.000000e+00> : vector<1xf32>
    %30 = vector.multi_reduction <add>, %29, %cst_21 [0] : vector<16x1xf32> to vector<1xf32>
    %31 = vector.shape_cast %30 : vector<1xf32> to vector<1x1xf32>
    %cst_22 = arith.constant 7.812500e-03 : f32
    %32 = vector.broadcast %cst_22 : f32 to vector<1x1xf32>
    %33 = arith.mulf %26, %32 : vector<1x1xf32>
    %cst_23 = arith.constant 7.812500e-03 : f32
    %34 = vector.broadcast %cst_23 : f32 to vector<1x1xf32>
    %35 = arith.mulf %31, %34 : vector<1x1xf32>
    %36 = arith.mulf %33, %33 : vector<1x1xf32>
    %37 = arith.subf %35, %36 : vector<1x1xf32>
    %38 = vector.broadcast %33 : vector<1x1xf32> to vector<16x12xf32>
    %39 = arith.subf %20, %38 : vector<16x12xf32>
    %cst_24 = arith.constant 9.99999974E-6 : f32
    %40 = vector.broadcast %cst_24 : f32 to vector<1x1xf32>
    %41 = arith.addf %37, %40 : vector<1x1xf32>
    %42 = math.rsqrt %41 : vector<1x1xf32>
    %43 = vector.broadcast %42 : vector<1x1xf32> to vector<16x12xf32>
    %44 = arith.mulf %39, %43 : vector<16x12xf32>
    %c0_25 = arith.constant 0 : index
    %c0_26 = arith.constant 0 : index
    %45 = vector.load %arg3[%c0_25, %c0_26] : memref<2x1xf32, #tpu.memory_space<vmem>>, vector<1x1xf32>
    %46 = vector.broadcast %45 : vector<1x1xf32> to vector<16x12xf32>
    %47 = arith.mulf %44, %46 : vector<16x12xf32>
    %c0_27 = arith.constant 0 : index
    %c0_28 = arith.constant 0 : index
    %48 = vector.load %arg4[%c0_27, %c0_28] : memref<2x1xf32, #tpu.memory_space<vmem>>, vector<1x1xf32>
    %49 = vector.broadcast %48 : vector<1x1xf32> to vector<16x12xf32>
    %50 = arith.addf %47, %49 : vector<16x12xf32>
    %cst_29 = arith.constant 0.000000e+00 : f32
    %51 = vector.broadcast %cst_29 : f32 to vector<16x12xf32>
    %52 = arith.cmpf oge, %50, %51 : vector<16x12xf32>
    %cst_30 = arith.constant 0.00999999977 : f32
    %53 = vector.broadcast %cst_30 : f32 to vector<16x12xf32>
    %54 = arith.mulf %53, %50 : vector<16x12xf32>
    %55 = arith.select %52, %50, %54 : vector<16x12xi1>, vector<16x12xf32>
    %56 = vector.broadcast %17 : vector<1x12xf32> to vector<16x12xf32>
    %57 = arith.mulf %55, %56 : vector<16x12xf32>
    %58 = arith.truncf %57 : vector<16x12xf32> to vector<16x12xbf16>
    %c0_31 = arith.constant 0 : index
    %c1_32 = arith.constant 1 : index
    %59 = vector.load %arg6[%c0_31, %c1_32] : memref<32x14xbf16, #tpu.memory_space<vmem>>, vector<16x12xbf16>
    tpu.vector_store %arg6[%c0_31, %c1_32], %58 {strides = array<i32>} : memref<32x14xbf16, #tpu.memory_space<vmem>>, vector<16x12xbf16>,
    %cst_33 = arith.constant 0.000000e+00 : bf16
    %60 = vector.broadcast %cst_33 : bf16 to vector<16x1xbf16>
    %c0_34 = arith.constant 0 : index
    %c0_35 = arith.constant 0 : index
    %61 = vector.load %arg6[%c0_34, %c0_35] : memref<32x14xbf16, #tpu.memory_space<vmem>>, vector<16x1xbf16>
    tpu.vector_store %arg6[%c0_34, %c0_35], %60 {strides = array<i32>} : memref<32x14xbf16, #tpu.memory_space<vmem>>, vector<16x1xbf16>,
    %cst_36 = arith.constant 0.000000e+00 : bf16
    %62 = vector.broadcast %cst_36 : bf16 to vector<16x1xbf16>
    %c0_37 = arith.constant 0 : index
    %c13 = arith.constant 13 : index
    %63 = vector.load %arg6[%c0_37, %c13] : memref<32x14xbf16, #tpu.memory_space<vmem>>, vector<16x1xbf16>
    tpu.vector_store %arg6[%c0_37, %c13], %62 {strides = array<i32>} : memref<32x14xbf16, #tpu.memory_space<vmem>>, vector<16x1xbf16>,
    %64 = vector.extract_strided_slice %16 {offsets = [32, 0], sizes = [16, 12], strides = [1, 1]} : vector<80x12xf32> to vector<16x12xf32>
    %65 = vector.extract_strided_slice %16 {offsets = [48, 0], sizes = [16, 12], strides = [1, 1]} : vector<80x12xf32> to vector<16x12xf32>
    %66 = arith.maximumf %64, %65 : vector<16x12xf32>
    %67 = vector.broadcast %17 : vector<1x12xf32> to vector<16x12xf32>
    %68 = arith.mulf %66, %67 : vector<16x12xf32>
    %cst_38 = arith.constant dense<0.000000e+00> : vector<16xf32>
    %69 = vector.multi_reduction <add>, %68, %cst_38 [1] : vector<16x12xf32> to vector<16xf32>
    %70 = vector.shape_cast %69 : vector<16xf32> to vector<16x1xf32>
    %cst_39 = arith.constant dense<0.000000e+00> : vector<1xf32>
    %71 = vector.multi_reduction <add>, %70, %cst_39 [0] : vector<16x1xf32> to vector<1xf32>
    %72 = vector.shape_cast %71 : vector<1xf32> to vector<1x1xf32>
    %73 = arith.mulf %68, %68 : vector<16x12xf32>
    %cst_40 = arith.constant dense<0.000000e+00> : vector<16xf32>
    %74 = vector.multi_reduction <add>, %73, %cst_40 [1] : vector<16x12xf32> to vector<16xf32>
    %75 = vector.shape_cast %74 : vector<16xf32> to vector<16x1xf32>
    %cst_41 = arith.constant dense<0.000000e+00> : vector<1xf32>
    %76 = vector.multi_reduction <add>, %75, %cst_41 [0] : vector<16x1xf32> to vector<1xf32>
    %77 = vector.shape_cast %76 : vector<1xf32> to vector<1x1xf32>
    %cst_42 = arith.constant 7.812500e-03 : f32
    %78 = vector.broadcast %cst_42 : f32 to vector<1x1xf32>
    %79 = arith.mulf %72, %78 : vector<1x1xf32>
    %cst_43 = arith.constant 7.812500e-03 : f32
    %80 = vector.broadcast %cst_43 : f32 to vector<1x1xf32>
    %81 = arith.mulf %77, %80 : vector<1x1xf32>
    %82 = arith.mulf %79, %79 : vector<1x1xf32>
    %83 = arith.subf %81, %82 : vector<1x1xf32>
    %84 = vector.broadcast %79 : vector<1x1xf32> to vector<16x12xf32>
    %85 = arith.subf %66, %84 : vector<16x12xf32>
    %cst_44 = arith.constant 9.99999974E-6 : f32
    %86 = vector.broadcast %cst_44 : f32 to vector<1x1xf32>
    %87 = arith.addf %83, %86 : vector<1x1xf32>
    %88 = math.rsqrt %87 : vector<1x1xf32>
    %89 = vector.broadcast %88 : vector<1x1xf32> to vector<16x12xf32>
    %90 = arith.mulf %85, %89 : vector<16x12xf32>
    %c1_45 = arith.constant 1 : index
    %c0_46 = arith.constant 0 : index
    %91 = vector.load %arg3[%c1_45, %c0_46] : memref<2x1xf32, #tpu.memory_space<vmem>>, vector<1x1xf32>
    %92 = vector.broadcast %91 : vector<1x1xf32> to vector<16x12xf32>
    %93 = arith.mulf %90, %92 : vector<16x12xf32>
    %c1_47 = arith.constant 1 : index
    %c0_48 = arith.constant 0 : index
    %94 = vector.load %arg4[%c1_47, %c0_48] : memref<2x1xf32, #tpu.memory_space<vmem>>, vector<1x1xf32>
    %95 = vector.broadcast %94 : vector<1x1xf32> to vector<16x12xf32>
    %96 = arith.addf %93, %95 : vector<16x12xf32>
    %cst_49 = arith.constant 0.000000e+00 : f32
    %97 = vector.broadcast %cst_49 : f32 to vector<16x12xf32>
    %98 = arith.cmpf oge, %96, %97 : vector<16x12xf32>
    %cst_50 = arith.constant 0.00999999977 : f32
    %99 = vector.broadcast %cst_50 : f32 to vector<16x12xf32>
    %100 = arith.mulf %99, %96 : vector<16x12xf32>
    %101 = arith.select %98, %96, %100 : vector<16x12xi1>, vector<16x12xf32>
    %102 = vector.broadcast %17 : vector<1x12xf32> to vector<16x12xf32>
    %103 = arith.mulf %101, %102 : vector<16x12xf32>
    %104 = arith.truncf %103 : vector<16x12xf32> to vector<16x12xbf16>
    %c16 = arith.constant 16 : index
    %c1_51 = arith.constant 1 : index
    %105 = vector.load %arg6[%c16, %c1_51] : memref<32x14xbf16, #tpu.memory_space<vmem>>, vector<16x12xbf16>
    tpu.vector_store %arg6[%c16, %c1_51], %104 {strides = array<i32>} : memref<32x14xbf16, #tpu.memory_space<vmem>>, vector<16x12xbf16>,
    %cst_52 = arith.constant 0.000000e+00 : bf16
    %106 = vector.broadcast %cst_52 : bf16 to vector<16x1xbf16>
    %c16_53 = arith.constant 16 : index
    %c0_54 = arith.constant 0 : index
    %107 = vector.load %arg6[%c16_53, %c0_54] : memref<32x14xbf16, #tpu.memory_space<vmem>>, vector<16x1xbf16>
    tpu.vector_store %arg6[%c16_53, %c0_54], %106 {strides = array<i32>} : memref<32x14xbf16, #tpu.memory_space<vmem>>, vector<16x1xbf16>,
    %cst_55 = arith.constant 0.000000e+00 : bf16
    %108 = vector.broadcast %cst_55 : bf16 to vector<16x1xbf16>
    %c16_56 = arith.constant 16 : index
    %c13_57 = arith.constant 13 : index
    %109 = vector.load %arg6[%c16_56, %c13_57] : memref<32x14xbf16, #tpu.memory_space<vmem>>, vector<16x1xbf16>
    tpu.vector_store %arg6[%c16_56, %c13_57], %108 {strides = array<i32>} : memref<32x14xbf16, #tpu.memory_space<vmem>>, vector<16x1xbf16>,
    return
  }
}

module attributes {stable_mosaic.version = 11 : i64} {
  func.func @_matmul_bias_kernel(%arg0: i32, %arg1: memref<8x32xbf16, #tpu.memory_space<vmem>>, %arg2: memref<32x68xbf16, #tpu.memory_space<vmem>>, %arg3: memref<1x68xf32, #tpu.memory_space<vmem>>, %arg4: memref<8x68xf32, #tpu.memory_space<vmem>>) attributes {dimension_semantics = [#tpu.dimension_semantics<parallel>], iteration_bounds = array<i64: 1>, scalar_prefetch = 0 : i64, scratch_operands = 0 : i64, tpu.core_type = #tpu.core_type<tc>, window_params = [{transform_indices = @transform_0, window_bounds = array<i64: 8, 32>}, {pipeline_mode = #tpu.pipeline_mode<synchronous>, transform_indices = @transform_1, window_bounds = array<i64: 32, 68>}, {pipeline_mode = #tpu.pipeline_mode<synchronous>, transform_indices = @transform_2, window_bounds = array<i64: 1, 68>}, {transform_indices = @transform_3, window_bounds = array<i64: 8, 68>}]} {
    %c0 = arith.constant 0 : index
    %c0_0 = arith.constant 0 : index
    %0 = vector.load %arg1[%c0, %c0_0] : memref<8x32xbf16, #tpu.memory_space<vmem>>, vector<8x32xbf16>
    %c0_1 = arith.constant 0 : index
    %c0_2 = arith.constant 0 : index
    %1 = vector.load %arg2[%c0_1, %c0_2] : memref<32x68xbf16, #tpu.memory_space<vmem>>, vector<32x68xbf16>
    %cst = arith.constant dense<0.000000e+00> : vector<8x68xf32>
    %2 = tpu.matmul %0, %1, %cst {dimension_numbers = #tpu.dot_dimension_numbers<[1], [0], [0], [1], [0, 0, 1, 1], [], []>} : vector<8x32xbf16>, vector<32x68xbf16>, vector<8x68xf32> -> vector<8x68xf32>
    %c0_3 = arith.constant 0 : index
    %c0_4 = arith.constant 0 : index
    %3 = vector.load %arg3[%c0_3, %c0_4] : memref<1x68xf32, #tpu.memory_space<vmem>>, vector<1x68xf32>
    %4 = vector.broadcast %3 : vector<1x68xf32> to vector<8x68xf32>
    %5 = arith.addf %2, %4 : vector<8x68xf32>
    %c0_5 = arith.constant 0 : index
    %c0_6 = arith.constant 0 : index
    %6 = vector.load %arg4[%c0_5, %c0_6] : memref<8x68xf32, #tpu.memory_space<vmem>>, vector<8x68xf32>
    tpu.vector_store %arg4[%c0_5, %c0_6], %5 {strides = array<i32>} : memref<8x68xf32, #tpu.memory_space<vmem>>, vector<8x68xf32>,
    return
  }
  func.func @transform_0(%arg0: i32) -> (i32, i32) {
    %c0_i32 = arith.constant 0 : i32
    %c0_i32_0 = arith.constant 0 : i32
    return %arg0, %c0_i32 : i32, i32
  }
  func.func @transform_1(%arg0: i32) -> (i32, i32) {
    %c0_i32 = arith.constant 0 : i32
    %c0_i32_0 = arith.constant 0 : i32
    %c0_i32_1 = arith.constant 0 : i32
    return %c0_i32, %c0_i32_0 : i32, i32
  }
  func.func @transform_2(%arg0: i32) -> (i32, i32) {
    %c0_i32 = arith.constant 0 : i32
    %c0_i32_0 = arith.constant 0 : i32
    %c0_i32_1 = arith.constant 0 : i32
    return %c0_i32, %c0_i32_0 : i32, i32
  }
  func.func @transform_3(%arg0: i32) -> (i32, i32) {
    %c0_i32 = arith.constant 0 : i32
    %c0_i32_0 = arith.constant 0 : i32
    return %arg0, %c0_i32 : i32, i32
  }
}

module attributes {stable_mosaic.version = 11 : i64} {
  func.func @_blend_istft_kernel(%arg0: memref<32x17xf32, #tpu.memory_space<vmem>>, %arg1: memref<32x34xf32, #tpu.memory_space<vmem>>, %arg2: memref<17x32xbf16, #tpu.memory_space<vmem>>, %arg3: memref<17x32xbf16, #tpu.memory_space<vmem>>, %arg4: memref<16x32xf32, #tpu.memory_space<vmem>>) attributes {dimension_semantics = [], scalar_prefetch = 0 : i64, scratch_operands = 0 : i64, tpu.core_type = #tpu.core_type<tc>} {
    %c0 = arith.constant 0 : index
    %c0_0 = arith.constant 0 : index
    %0 = vector.load %arg0[%c0, %c0_0] : memref<32x17xf32, #tpu.memory_space<vmem>>, vector<32x17xf32>
    %1 = math.tanh %0 : vector<32x17xf32>
    %c0_1 = arith.constant 0 : index
    %c0_2 = arith.constant 0 : index
    %2 = vector.load %arg1[%c0_1, %c0_2] : memref<32x34xf32, #tpu.memory_space<vmem>>, vector<32x34xf32>
    %3 = vector.extract_strided_slice %2 {offsets = [0, 0], sizes = [32, 17], strides = [1, 1]} : vector<32x34xf32> to vector<32x17xf32>
    %4 = arith.mulf %1, %3 : vector<32x17xf32>
    %5 = vector.extract_strided_slice %2 {offsets = [0, 17], sizes = [32, 17], strides = [1, 1]} : vector<32x34xf32> to vector<32x17xf32>
    %6 = arith.mulf %1, %5 : vector<32x17xf32>
    %7 = vector.extract_strided_slice %4 {offsets = [0, 0], sizes = [16, 17], strides = [1, 1]} : vector<32x17xf32> to vector<16x17xf32>
    %8 = vector.extract_strided_slice %6 {offsets = [0, 0], sizes = [16, 17], strides = [1, 1]} : vector<32x17xf32> to vector<16x17xf32>
    %9 = vector.extract_strided_slice %4 {offsets = [16, 0], sizes = [16, 17], strides = [1, 1]} : vector<32x17xf32> to vector<16x17xf32>
    %10 = arith.addf %7, %9 : vector<16x17xf32>
    %11 = vector.extract_strided_slice %6 {offsets = [16, 0], sizes = [16, 17], strides = [1, 1]} : vector<32x17xf32> to vector<16x17xf32>
    %12 = arith.addf %8, %11 : vector<16x17xf32>
    %13 = arith.truncf %10 : vector<16x17xf32> to vector<16x17xbf16>
    %c0_3 = arith.constant 0 : index
    %c0_4 = arith.constant 0 : index
    %14 = vector.load %arg2[%c0_3, %c0_4] : memref<17x32xbf16, #tpu.memory_space<vmem>>, vector<17x32xbf16>
    %cst = arith.constant dense<0.000000e+00> : vector<16x32xf32>
    %15 = tpu.matmul %13, %14, %cst {dimension_numbers = #tpu.dot_dimension_numbers<[1], [0], [0], [1], [0, 0, 1, 1], [], []>} : vector<16x17xbf16>, vector<17x32xbf16>, vector<16x32xf32> -> vector<16x32xf32>
    %16 = arith.truncf %12 : vector<16x17xf32> to vector<16x17xbf16>
    %c0_5 = arith.constant 0 : index
    %c0_6 = arith.constant 0 : index
    %17 = vector.load %arg3[%c0_5, %c0_6] : memref<17x32xbf16, #tpu.memory_space<vmem>>, vector<17x32xbf16>
    %cst_7 = arith.constant dense<0.000000e+00> : vector<16x32xf32>
    %18 = tpu.matmul %16, %17, %cst_7 {dimension_numbers = #tpu.dot_dimension_numbers<[1], [0], [0], [1], [0, 0, 1, 1], [], []>} : vector<16x17xbf16>, vector<17x32xbf16>, vector<16x32xf32> -> vector<16x32xf32>
    %19 = arith.addf %15, %18 : vector<16x32xf32>
    %c0_8 = arith.constant 0 : index
    %c0_9 = arith.constant 0 : index
    %20 = vector.load %arg4[%c0_8, %c0_9] : memref<16x32xf32, #tpu.memory_space<vmem>>, vector<16x32xf32>
    tpu.vector_store %arg4[%c0_8, %c0_9], %19 {strides = array<i32>} : memref<16x32xf32, #tpu.memory_space<vmem>>, vector<16x32xf32>,
    return
  }
}

module attributes {stable_mosaic.version = 11 : i64} {
  func.func @_wave_conv_kernel(%arg0: memref<8x262xbf16, #tpu.memory_space<vmem>>, %arg1: memref<3x16x8xbf16, #tpu.memory_space<vmem>>, %arg2: memref<16x1xf32, #tpu.memory_space<vmem>>, %arg3: memref<16x1xf32, #tpu.memory_space<vmem>>, %arg4: memref<16x1xf32, #tpu.memory_space<vmem>>, %arg5: memref<1x260xf32, #tpu.memory_space<vmem>>, %arg6: memref<16x262xbf16, #tpu.memory_space<vmem>>) attributes {dimension_semantics = [], scalar_prefetch = 0 : i64, scratch_operands = 0 : i64, tpu.core_type = #tpu.core_type<tc>} {
    %c0 = arith.constant 0 : index
    %c0_0 = arith.constant 0 : index
    %c0_1 = arith.constant 0 : index
    %0 = vector.load %arg1[%c0, %c0_0, %c0_1] : memref<3x16x8xbf16, #tpu.memory_space<vmem>>, vector<1x16x8xbf16>
    %1 = vector.shape_cast %0 : vector<1x16x8xbf16> to vector<16x8xbf16>
    %c0_2 = arith.constant 0 : index
    %c0_3 = arith.constant 0 : index
    %2 = vector.load %arg0[%c0_2, %c0_3] : memref<8x262xbf16, #tpu.memory_space<vmem>>, vector<8x260xbf16>
    %cst = arith.constant dense<0.000000e+00> : vector<16x260xf32>
    %3 = tpu.matmul %1, %2, %cst {dimension_numbers = #tpu.dot_dimension_numbers<[1], [0], [0], [1], [0, 0, 1, 1], [], []>} : vector<16x8xbf16>, vector<8x260xbf16>, vector<16x260xf32> -> vector<16x260xf32>
    %c1 = arith.constant 1 : index
    %c0_4 = arith.constant 0 : index
    %c0_5 = arith.constant 0 : index
    %4 = vector.load %arg1[%c1, %c0_4, %c0_5] : memref<3x16x8xbf16, #tpu.memory_space<vmem>>, vector<1x16x8xbf16>
    %5 = vector.shape_cast %4 : vector<1x16x8xbf16> to vector<16x8xbf16>
    %c0_6 = arith.constant 0 : index
    %c1_7 = arith.constant 1 : index
    %6 = vector.load %arg0[%c0_6, %c1_7] : memref<8x262xbf16, #tpu.memory_space<vmem>>, vector<8x260xbf16>
    %cst_8 = arith.constant dense<0.000000e+00> : vector<16x260xf32>
    %7 = tpu.matmul %5, %6, %cst_8 {dimension_numbers = #tpu.dot_dimension_numbers<[1], [0], [0], [1], [0, 0, 1, 1], [], []>} : vector<16x8xbf16>, vector<8x260xbf16>, vector<16x260xf32> -> vector<16x260xf32>
    %8 = arith.addf %3, %7 : vector<16x260xf32>
    %c2 = arith.constant 2 : index
    %c0_9 = arith.constant 0 : index
    %c0_10 = arith.constant 0 : index
    %9 = vector.load %arg1[%c2, %c0_9, %c0_10] : memref<3x16x8xbf16, #tpu.memory_space<vmem>>, vector<1x16x8xbf16>
    %10 = vector.shape_cast %9 : vector<1x16x8xbf16> to vector<16x8xbf16>
    %c0_11 = arith.constant 0 : index
    %c2_12 = arith.constant 2 : index
    %11 = vector.load %arg0[%c0_11, %c2_12] : memref<8x262xbf16, #tpu.memory_space<vmem>>, vector<8x260xbf16>
    %cst_13 = arith.constant dense<0.000000e+00> : vector<16x260xf32>
    %12 = tpu.matmul %10, %11, %cst_13 {dimension_numbers = #tpu.dot_dimension_numbers<[1], [0], [0], [1], [0, 0, 1, 1], [], []>} : vector<16x8xbf16>, vector<8x260xbf16>, vector<16x260xf32> -> vector<16x260xf32>
    %13 = arith.addf %8, %12 : vector<16x260xf32>
    %c0_14 = arith.constant 0 : index
    %c0_15 = arith.constant 0 : index
    %14 = vector.load %arg2[%c0_14, %c0_15] : memref<16x1xf32, #tpu.memory_space<vmem>>, vector<16x1xf32>
    %15 = vector.broadcast %14 : vector<16x1xf32> to vector<16x260xf32>
    %16 = arith.addf %13, %15 : vector<16x260xf32>
    %c0_16 = arith.constant 0 : index
    %c0_17 = arith.constant 0 : index
    %17 = vector.load %arg5[%c0_16, %c0_17] : memref<1x260xf32, #tpu.memory_space<vmem>>, vector<1x260xf32>
    %18 = vector.broadcast %17 : vector<1x260xf32> to vector<16x260xf32>
    %19 = arith.mulf %16, %18 : vector<16x260xf32>
    %cst_18 = arith.constant dense<0.000000e+00> : vector<16xf32>
    %20 = vector.multi_reduction <add>, %19, %cst_18 [1] : vector<16x260xf32> to vector<16xf32>
    %21 = vector.shape_cast %20 : vector<16xf32> to vector<16x1xf32>
    %22 = arith.mulf %19, %19 : vector<16x260xf32>
    %cst_19 = arith.constant dense<0.000000e+00> : vector<16xf32>
    %23 = vector.multi_reduction <add>, %22, %cst_19 [1] : vector<16x260xf32> to vector<16xf32>
    %24 = vector.shape_cast %23 : vector<16xf32> to vector<16x1xf32>
    %cst_20 = arith.constant 3.906250e-03 : f32
    %25 = vector.broadcast %cst_20 : f32 to vector<16x1xf32>
    %26 = arith.mulf %21, %25 : vector<16x1xf32>
    %cst_21 = arith.constant 3.906250e-03 : f32
    %27 = vector.broadcast %cst_21 : f32 to vector<16x1xf32>
    %28 = arith.mulf %24, %27 : vector<16x1xf32>
    %29 = arith.mulf %26, %26 : vector<16x1xf32>
    %30 = arith.subf %28, %29 : vector<16x1xf32>
    %31 = vector.broadcast %26 : vector<16x1xf32> to vector<16x260xf32>
    %32 = arith.subf %16, %31 : vector<16x260xf32>
    %cst_22 = arith.constant 9.99999974E-6 : f32
    %33 = vector.broadcast %cst_22 : f32 to vector<16x1xf32>
    %34 = arith.addf %30, %33 : vector<16x1xf32>
    %35 = math.rsqrt %34 : vector<16x1xf32>
    %36 = vector.broadcast %35 : vector<16x1xf32> to vector<16x260xf32>
    %37 = arith.mulf %32, %36 : vector<16x260xf32>
    %c0_23 = arith.constant 0 : index
    %c0_24 = arith.constant 0 : index
    %38 = vector.load %arg3[%c0_23, %c0_24] : memref<16x1xf32, #tpu.memory_space<vmem>>, vector<16x1xf32>
    %39 = vector.broadcast %38 : vector<16x1xf32> to vector<16x260xf32>
    %40 = arith.mulf %37, %39 : vector<16x260xf32>
    %c0_25 = arith.constant 0 : index
    %c0_26 = arith.constant 0 : index
    %41 = vector.load %arg4[%c0_25, %c0_26] : memref<16x1xf32, #tpu.memory_space<vmem>>, vector<16x1xf32>
    %42 = vector.broadcast %41 : vector<16x1xf32> to vector<16x260xf32>
    %43 = arith.addf %40, %42 : vector<16x260xf32>
    %cst_27 = arith.constant 0.000000e+00 : f32
    %44 = vector.broadcast %cst_27 : f32 to vector<16x260xf32>
    %45 = arith.cmpf oge, %43, %44 : vector<16x260xf32>
    %cst_28 = arith.constant 0.00999999977 : f32
    %46 = vector.broadcast %cst_28 : f32 to vector<16x260xf32>
    %47 = arith.mulf %46, %43 : vector<16x260xf32>
    %48 = arith.select %45, %43, %47 : vector<16x260xi1>, vector<16x260xf32>
    %49 = vector.broadcast %17 : vector<1x260xf32> to vector<16x260xf32>
    %50 = arith.mulf %48, %49 : vector<16x260xf32>
    %51 = arith.truncf %50 : vector<16x260xf32> to vector<16x260xbf16>
    %c0_29 = arith.constant 0 : index
    %c1_30 = arith.constant 1 : index
    %52 = vector.load %arg6[%c0_29, %c1_30] : memref<16x262xbf16, #tpu.memory_space<vmem>>, vector<16x260xbf16>
    tpu.vector_store %arg6[%c0_29, %c1_30], %51 {strides = array<i32>} : memref<16x262xbf16, #tpu.memory_space<vmem>>, vector<16x260xbf16>,
    %cst_31 = arith.constant 0.000000e+00 : bf16
    %53 = vector.broadcast %cst_31 : bf16 to vector<16x1xbf16>
    %c0_32 = arith.constant 0 : index
    %c0_33 = arith.constant 0 : index
    %54 = vector.load %arg6[%c0_32, %c0_33] : memref<16x262xbf16, #tpu.memory_space<vmem>>, vector<16x1xbf16>
    tpu.vector_store %arg6[%c0_32, %c0_33], %53 {strides = array<i32>} : memref<16x262xbf16, #tpu.memory_space<vmem>>, vector<16x1xbf16>,
    %cst_34 = arith.constant 0.000000e+00 : bf16
    %55 = vector.broadcast %cst_34 : bf16 to vector<16x1xbf16>
    %c0_35 = arith.constant 0 : index
    %c261 = arith.constant 261 : index
    %56 = vector.load %arg6[%c0_35, %c261] : memref<16x262xbf16, #tpu.memory_space<vmem>>, vector<16x1xbf16>
    tpu.vector_store %arg6[%c0_35, %c261], %55 {strides = array<i32>} : memref<16x262xbf16, #tpu.memory_space<vmem>>, vector<16x1xbf16>,
    return
  }
}

module attributes {stable_mosaic.version = 11 : i64} {
  func.func @_wave_conv_kernel(%arg0: memref<6x262xbf16, #tpu.memory_space<vmem>>, %arg1: memref<3x8x6xbf16, #tpu.memory_space<vmem>>, %arg2: memref<8x1xf32, #tpu.memory_space<vmem>>, %arg3: memref<8x1xf32, #tpu.memory_space<vmem>>, %arg4: memref<8x1xf32, #tpu.memory_space<vmem>>, %arg5: memref<1x260xf32, #tpu.memory_space<vmem>>, %arg6: memref<8x262xbf16, #tpu.memory_space<vmem>>) attributes {dimension_semantics = [], scalar_prefetch = 0 : i64, scratch_operands = 0 : i64, tpu.core_type = #tpu.core_type<tc>} {
    %c0 = arith.constant 0 : index
    %c0_0 = arith.constant 0 : index
    %c0_1 = arith.constant 0 : index
    %0 = vector.load %arg1[%c0, %c0_0, %c0_1] : memref<3x8x6xbf16, #tpu.memory_space<vmem>>, vector<1x8x6xbf16>
    %1 = vector.shape_cast %0 : vector<1x8x6xbf16> to vector<8x6xbf16>
    %c0_2 = arith.constant 0 : index
    %c0_3 = arith.constant 0 : index
    %2 = vector.load %arg0[%c0_2, %c0_3] : memref<6x262xbf16, #tpu.memory_space<vmem>>, vector<6x260xbf16>
    %cst = arith.constant dense<0.000000e+00> : vector<8x260xf32>
    %3 = tpu.matmul %1, %2, %cst {dimension_numbers = #tpu.dot_dimension_numbers<[1], [0], [0], [1], [0, 0, 1, 1], [], []>} : vector<8x6xbf16>, vector<6x260xbf16>, vector<8x260xf32> -> vector<8x260xf32>
    %c1 = arith.constant 1 : index
    %c0_4 = arith.constant 0 : index
    %c0_5 = arith.constant 0 : index
    %4 = vector.load %arg1[%c1, %c0_4, %c0_5] : memref<3x8x6xbf16, #tpu.memory_space<vmem>>, vector<1x8x6xbf16>
    %5 = vector.shape_cast %4 : vector<1x8x6xbf16> to vector<8x6xbf16>
    %c0_6 = arith.constant 0 : index
    %c1_7 = arith.constant 1 : index
    %6 = vector.load %arg0[%c0_6, %c1_7] : memref<6x262xbf16, #tpu.memory_space<vmem>>, vector<6x260xbf16>
    %cst_8 = arith.constant dense<0.000000e+00> : vector<8x260xf32>
    %7 = tpu.matmul %5, %6, %cst_8 {dimension_numbers = #tpu.dot_dimension_numbers<[1], [0], [0], [1], [0, 0, 1, 1], [], []>} : vector<8x6xbf16>, vector<6x260xbf16>, vector<8x260xf32> -> vector<8x260xf32>
    %8 = arith.addf %3, %7 : vector<8x260xf32>
    %c2 = arith.constant 2 : index
    %c0_9 = arith.constant 0 : index
    %c0_10 = arith.constant 0 : index
    %9 = vector.load %arg1[%c2, %c0_9, %c0_10] : memref<3x8x6xbf16, #tpu.memory_space<vmem>>, vector<1x8x6xbf16>
    %10 = vector.shape_cast %9 : vector<1x8x6xbf16> to vector<8x6xbf16>
    %c0_11 = arith.constant 0 : index
    %c2_12 = arith.constant 2 : index
    %11 = vector.load %arg0[%c0_11, %c2_12] : memref<6x262xbf16, #tpu.memory_space<vmem>>, vector<6x260xbf16>
    %cst_13 = arith.constant dense<0.000000e+00> : vector<8x260xf32>
    %12 = tpu.matmul %10, %11, %cst_13 {dimension_numbers = #tpu.dot_dimension_numbers<[1], [0], [0], [1], [0, 0, 1, 1], [], []>} : vector<8x6xbf16>, vector<6x260xbf16>, vector<8x260xf32> -> vector<8x260xf32>
    %13 = arith.addf %8, %12 : vector<8x260xf32>
    %c0_14 = arith.constant 0 : index
    %c0_15 = arith.constant 0 : index
    %14 = vector.load %arg2[%c0_14, %c0_15] : memref<8x1xf32, #tpu.memory_space<vmem>>, vector<8x1xf32>
    %15 = vector.broadcast %14 : vector<8x1xf32> to vector<8x260xf32>
    %16 = arith.addf %13, %15 : vector<8x260xf32>
    %c0_16 = arith.constant 0 : index
    %c0_17 = arith.constant 0 : index
    %17 = vector.load %arg5[%c0_16, %c0_17] : memref<1x260xf32, #tpu.memory_space<vmem>>, vector<1x260xf32>
    %18 = vector.broadcast %17 : vector<1x260xf32> to vector<8x260xf32>
    %19 = arith.mulf %16, %18 : vector<8x260xf32>
    %cst_18 = arith.constant dense<0.000000e+00> : vector<8xf32>
    %20 = vector.multi_reduction <add>, %19, %cst_18 [1] : vector<8x260xf32> to vector<8xf32>
    %21 = vector.shape_cast %20 : vector<8xf32> to vector<8x1xf32>
    %22 = arith.mulf %19, %19 : vector<8x260xf32>
    %cst_19 = arith.constant dense<0.000000e+00> : vector<8xf32>
    %23 = vector.multi_reduction <add>, %22, %cst_19 [1] : vector<8x260xf32> to vector<8xf32>
    %24 = vector.shape_cast %23 : vector<8xf32> to vector<8x1xf32>
    %cst_20 = arith.constant 3.906250e-03 : f32
    %25 = vector.broadcast %cst_20 : f32 to vector<8x1xf32>
    %26 = arith.mulf %21, %25 : vector<8x1xf32>
    %cst_21 = arith.constant 3.906250e-03 : f32
    %27 = vector.broadcast %cst_21 : f32 to vector<8x1xf32>
    %28 = arith.mulf %24, %27 : vector<8x1xf32>
    %29 = arith.mulf %26, %26 : vector<8x1xf32>
    %30 = arith.subf %28, %29 : vector<8x1xf32>
    %31 = vector.broadcast %26 : vector<8x1xf32> to vector<8x260xf32>
    %32 = arith.subf %16, %31 : vector<8x260xf32>
    %cst_22 = arith.constant 9.99999974E-6 : f32
    %33 = vector.broadcast %cst_22 : f32 to vector<8x1xf32>
    %34 = arith.addf %30, %33 : vector<8x1xf32>
    %35 = math.rsqrt %34 : vector<8x1xf32>
    %36 = vector.broadcast %35 : vector<8x1xf32> to vector<8x260xf32>
    %37 = arith.mulf %32, %36 : vector<8x260xf32>
    %c0_23 = arith.constant 0 : index
    %c0_24 = arith.constant 0 : index
    %38 = vector.load %arg3[%c0_23, %c0_24] : memref<8x1xf32, #tpu.memory_space<vmem>>, vector<8x1xf32>
    %39 = vector.broadcast %38 : vector<8x1xf32> to vector<8x260xf32>
    %40 = arith.mulf %37, %39 : vector<8x260xf32>
    %c0_25 = arith.constant 0 : index
    %c0_26 = arith.constant 0 : index
    %41 = vector.load %arg4[%c0_25, %c0_26] : memref<8x1xf32, #tpu.memory_space<vmem>>, vector<8x1xf32>
    %42 = vector.broadcast %41 : vector<8x1xf32> to vector<8x260xf32>
    %43 = arith.addf %40, %42 : vector<8x260xf32>
    %cst_27 = arith.constant 0.000000e+00 : f32
    %44 = vector.broadcast %cst_27 : f32 to vector<8x260xf32>
    %45 = arith.cmpf oge, %43, %44 : vector<8x260xf32>
    %cst_28 = arith.constant 0.00999999977 : f32
    %46 = vector.broadcast %cst_28 : f32 to vector<8x260xf32>
    %47 = arith.mulf %46, %43 : vector<8x260xf32>
    %48 = arith.select %45, %43, %47 : vector<8x260xi1>, vector<8x260xf32>
    %49 = vector.broadcast %17 : vector<1x260xf32> to vector<8x260xf32>
    %50 = arith.mulf %48, %49 : vector<8x260xf32>
    %51 = arith.truncf %50 : vector<8x260xf32> to vector<8x260xbf16>
    %c0_29 = arith.constant 0 : index
    %c1_30 = arith.constant 1 : index
    %52 = vector.load %arg6[%c0_29, %c1_30] : memref<8x262xbf16, #tpu.memory_space<vmem>>, vector<8x260xbf16>
    tpu.vector_store %arg6[%c0_29, %c1_30], %51 {strides = array<i32>} : memref<8x262xbf16, #tpu.memory_space<vmem>>, vector<8x260xbf16>,
    %cst_31 = arith.constant 0.000000e+00 : bf16
    %53 = vector.broadcast %cst_31 : bf16 to vector<8x1xbf16>
    %c0_32 = arith.constant 0 : index
    %c0_33 = arith.constant 0 : index
    %54 = vector.load %arg6[%c0_32, %c0_33] : memref<8x262xbf16, #tpu.memory_space<vmem>>, vector<8x1xbf16>
    tpu.vector_store %arg6[%c0_32, %c0_33], %53 {strides = array<i32>} : memref<8x262xbf16, #tpu.memory_space<vmem>>, vector<8x1xbf16>,
    %cst_34 = arith.constant 0.000000e+00 : bf16
    %55 = vector.broadcast %cst_34 : bf16 to vector<8x1xbf16>
    %c0_35 = arith.constant 0 : index
    %c261 = arith.constant 261 : index
    %56 = vector.load %arg6[%c0_35, %c261] : memref<8x262xbf16, #tpu.memory_space<vmem>>, vector<8x1xbf16>
    tpu.vector_store %arg6[%c0_35, %c261], %55 {strides = array<i32>} : memref<8x262xbf16, #tpu.memory_space<vmem>>, vector<8x1xbf16>,
    return
  }
}

module attributes {stable_mosaic.version = 11 : i64} {
  func.func @_wave_tail_kernel(%arg0: memref<16x256xbf16, #tpu.memory_space<vmem>>, %arg1: memref<2x2x16xbf16, #tpu.memory_space<vmem>>, %arg2: memref<2x2x1xf32, #tpu.memory_space<vmem>>, %arg3: memref<2x2x256xf32, #tpu.memory_space<vmem>>, %arg4: memref<2x256xf32, #tpu.memory_space<vmem>>) attributes {dimension_semantics = [], scalar_prefetch = 0 : i64, scratch_operands = 0 : i64, tpu.core_type = #tpu.core_type<tc>} {
    %c0 = arith.constant 0 : index
    %c0_0 = arith.constant 0 : index
    %0 = vector.load %arg0[%c0, %c0_0] : memref<16x256xbf16, #tpu.memory_space<vmem>>, vector<16x256xbf16>
    %cst = arith.constant 0.000000e+00 : f32
    %1 = vector.broadcast %cst : f32 to vector<2x256xf32>
    %c0_1 = arith.constant 0 : index
    %c0_2 = arith.constant 0 : index
    %c0_3 = arith.constant 0 : index
    %2 = vector.load %arg1[%c0_1, %c0_2, %c0_3] : memref<2x2x16xbf16, #tpu.memory_space<vmem>>, vector<1x2x16xbf16>
    %3 = vector.shape_cast %2 : vector<1x2x16xbf16> to vector<2x16xbf16>
    %cst_4 = arith.constant dense<0.000000e+00> : vector<2x256xf32>
    %4 = tpu.matmul %3, %0, %cst_4 {dimension_numbers = #tpu.dot_dimension_numbers<[1], [0], [0], [1], [0, 0, 1, 1], [], []>} : vector<2x16xbf16>, vector<16x256xbf16>, vector<2x256xf32> -> vector<2x256xf32>
    %c0_5 = arith.constant 0 : index
    %c0_6 = arith.constant 0 : index
    %c0_7 = arith.constant 0 : index
    %5 = vector.load %arg2[%c0_5, %c0_6, %c0_7] : memref<2x2x1xf32, #tpu.memory_space<vmem>>, vector<1x2x1xf32>
    %6 = vector.shape_cast %5 : vector<1x2x1xf32> to vector<2x1xf32>
    %7 = vector.broadcast %6 : vector<2x1xf32> to vector<2x256xf32>
    %8 = arith.addf %4, %7 : vector<2x256xf32>
    %9 = math.tanh %8 : vector<2x256xf32>
    %c0_8 = arith.constant 0 : index
    %c0_9 = arith.constant 0 : index
    %c0_10 = arith.constant 0 : index
    %10 = vector.load %arg3[%c0_8, %c0_9, %c0_10] : memref<2x2x256xf32, #tpu.memory_space<vmem>>, vector<1x2x256xf32>
    %11 = vector.shape_cast %10 : vector<1x2x256xf32> to vector<2x256xf32>
    %12 = arith.mulf %9, %11 : vector<2x256xf32>
    %13 = arith.addf %1, %12 : vector<2x256xf32>
    %c1 = arith.constant 1 : index
    %c0_11 = arith.constant 0 : index
    %c0_12 = arith.constant 0 : index
    %14 = vector.load %arg1[%c1, %c0_11, %c0_12] : memref<2x2x16xbf16, #tpu.memory_space<vmem>>, vector<1x2x16xbf16>
    %15 = vector.shape_cast %14 : vector<1x2x16xbf16> to vector<2x16xbf16>
    %cst_13 = arith.constant dense<0.000000e+00> : vector<2x256xf32>
    %16 = tpu.matmul %15, %0, %cst_13 {dimension_numbers = #tpu.dot_dimension_numbers<[1], [0], [0], [1], [0, 0, 1, 1], [], []>} : vector<2x16xbf16>, vector<16x256xbf16>, vector<2x256xf32> -> vector<2x256xf32>
    %c1_14 = arith.constant 1 : index
    %c0_15 = arith.constant 0 : index
    %c0_16 = arith.constant 0 : index
    %17 = vector.load %arg2[%c1_14, %c0_15, %c0_16] : memref<2x2x1xf32, #tpu.memory_space<vmem>>, vector<1x2x1xf32>
    %18 = vector.shape_cast %17 : vector<1x2x1xf32> to vector<2x1xf32>
    %19 = vector.broadcast %18 : vector<2x1xf32> to vector<2x256xf32>
    %20 = arith.addf %16, %19 : vector<2x256xf32>
    %21 = math.tanh %20 : vector<2x256xf32>
    %c1_17 = arith.constant 1 : index
    %c0_18 = arith.constant 0 : index
    %c0_19 = arith.constant 0 : index
    %22 = vector.load %arg3[%c1_17, %c0_18, %c0_19] : memref<2x2x256xf32, #tpu.memory_space<vmem>>, vector<1x2x256xf32>
    %23 = vector.shape_cast %22 : vector<1x2x256xf32> to vector<2x256xf32>
    %24 = arith.mulf %21, %23 : vector<2x256xf32>
    %25 = arith.addf %13, %24 : vector<2x256xf32>
    %c0_20 = arith.constant 0 : index
    %c0_21 = arith.constant 0 : index
    %26 = vector.load %arg4[%c0_20, %c0_21] : memref<2x256xf32, #tpu.memory_space<vmem>>, vector<2x256xf32>
    tpu.vector_store %arg4[%c0_20, %c0_21], %25 {strides = array<i32>} : memref<2x256xf32, #tpu.memory_space<vmem>>, vector<2x256xf32>,
    return
  }
}

</mosaic_0001>

<bundles_post_ra>
// kernel: _lambda_.8
= control target key start
LH: loop header
LB: loop body
LE: loop exit
PB: predicated region body
PF: predicated region fallthrough
CT: control target
= control target key end

     0   :  { %vm44_vm0 = vcmask 261120   ;;  %vm100_vm1 = vcmask 277504   ;;  %vm173_vm10 = vcmask 138240   ;;  %s282_s1 = inlined_call_operand.vmem [shape: bf16[32,34], index: 1, kind: input, shape index: {}]   ;;  %s283_s0 = inlined_call_operand.vmem [shape: bf16[32,32], index: 0, kind: input, shape index: {}]   ;;  %s284_s2 = inlined_call_operand.vmem [shape: f32[32,34], index: 2, kind: output, shape index: {0}]   ;;  %s285_s3 = inlined_call_operand.vmem [shape: f32[32,17], index: 3, kind: output, shape index: {1}]  }
   0x1   :  { %v205_v0 = vld [vmem:[%s282_s1] sm:$0xff]   ;;  %v206_v1 = vld [vmem:[%s282_s1 + $0x8] sm:$0xff]  }
   0x2   :  { %196 = vmatprep.subr.bf16.mxu0 %v205_v0  ;;  %v207_v2 = vld [vmem:[%s283_s0] sm:$0xff]   ;;  %v208_v3 = vld [vmem:[%s283_s0 + $0x8] sm:$0xff]   ;;  %s225_s0 = smov 111  }
   0x3   :  { %197 = vmatpush3.bf16.msra.mxu0 %v205_v0  ;;  %200 = vmatprep.mubr.msk.bf16.mxu0 %vm44_vm0, %v207_v2 }
   0x4   :  { %198 = vmatprep.subr.bf16.mxu0 %v206_v1 }
   0x7   :  { %199 = vmatpush3.bf16.msra.mxu0 %v206_v1 }
   0xa   :  { %201 = vmatmul.mubr.msk.bf16.vlgmr.msra.gmra.mrb[0].mxu0 %vm44_vm0, %v208_v3 }
  0xdd   :  { %v202_v4 = vpop.f32.mrb[0].mxu0 }
  0xde   :  { %103 = vst.msk [vmem:[%s284_s2 + $0x10] sm:$0xff] %vm100_vm1, %v202_v4  ;;  %v85_v5 = vpop.f32.mrb[1].mxu0  ;;  %v107_v6 = vmul.f32 %v202_v4, %v202_v4 }
  0xdf   :  { %101 = vst.msk [vmem:[%s284_s2] sm:$0xff] %vm100_vm1, %v85_v5  ;;  %v203_v7 = vpop.f32.mrb[2].mxu0  ;;  %v105_v8 = vmul.f32 %v85_v5, %v85_v5 }
  0xe0   :  { %104 = vst.msk [vmem:[%s284_s2 + $0x18] sm:$0xff] %vm100_vm1, %v203_v7  ;;  %117 = vrot.lane.b32.xlu1 %v107_v6, %s225_s0  ;;  %v88_v9 = vpop.f32.mrb[3].mxu0  ;;  %v108_v10 = vmul.f32 %v203_v7, %v203_v7 }
  0xe1   :  { %102 = vst.msk [vmem:[%s284_s2 + $0x8] sm:$0xff] %vm100_vm1, %v88_v9  ;;  %113 = vrot.lane.b32.xlu0 %v105_v8, %s225_s0  ;;  %v106_v11 = vmul.f32 %v88_v9, %v88_v9 }
  0xe4   :  { %119 = vrot.lane.b32.xlu1 %v108_v10, %s225_s0 }
  0xe5   :  { %115 = vrot.lane.b32.xlu0 %v106_v11, %s225_s0 }
 0x152   :  { %v118_v12 = vpop.permute.xlu1 %117 }
 0x153   :  { %v127_v13 = vadd.f32 %v118_v12, %v107_v6  ;;  %v114_v14 = vpop.permute.xlu0 %113 }
 0x154   :  { %v125_v15 = vadd.f32 %v114_v14, %v105_v8 }
 0x155   :  { %209 = vrsqrt.f32 %v127_v13  ;;  %vm145_vm2 = vcmp.eq.f32.partialorder %v127_v13, inf  ;;  %v148_v23 = vand.u32 2147483648, %v127_v13  ;;  %vm147_vm3 = vcmp.eq.f32.partialorder %v127_v13, 0.0 }
 0x156   :  { %211 = vrsqrt.f32 %v125_v15  ;;  %v120_v16 = vpop.permute.xlu1 %119  ;;  %vm131_vm4 = vcmp.eq.f32.partialorder %v125_v15, inf  ;;  %v134_v26 = vand.u32 2147483648, %v125_v15  ;;  %vm133_vm5 = vcmp.eq.f32.partialorder %v125_v15, 0.0 }
 0x157   :  { %v128_v17 = vadd.f32 %v120_v16, %v108_v10  ;;  %v116_v18 = vpop.permute.xlu0 %115 }
 0x158   :  { %v126_v19 = vadd.f32 %v116_v18, %v106_v11 }
 0x159   :  { %213 = vrsqrt.f32 %v128_v17  ;;  %vm152_vm6 = vcmp.eq.f32.partialorder %v128_v17, inf  ;;  %vm154_vm7 = vcmp.eq.f32.partialorder %v128_v17, 0.0  ;;  %v155_v35 = vand.u32 2147483648, %v128_v17 }
 0x15a   :  { %215 = vrsqrt.f32 %v126_v19  ;;  %vm138_vm8 = vcmp.eq.f32.partialorder %v126_v19, inf  ;;  %v141_v38 = vand.u32 2147483648, %v126_v19  ;;  %vm140_vm9 = vcmp.eq.f32.partialorder %v126_v19, 0.0 }
 0x15f   :  { %v210_v20 = vpop.eup %209 }
 0x160   :  { %v212_v21 = vpop.eup %211  ;;  %v144_v22 = vmul.f32 %v210_v20, %v127_v13 }
 0x161   :  { %v130_v24 = vmul.f32 %v212_v21, %v125_v15 }
 0x162   :  { %v146_v25 = vsel %vm145_vm2, %v127_v13, %v144_v22 }
 0x163   :  { %v214_v27 = vpop.eup %213  ;;  %v149_v28 = vsel %vm147_vm3, %v148_v23, %v146_v25  ;;  %v132_v29 = vsel %vm131_vm4, %v125_v15, %v130_v24 }
 0x164   :  { %v216_v30 = vpop.eup %215  ;;  %v159_v31 = vmax.f32 %v149_v28, 1e-08  ;;  %v135_v32 = vsel %vm133_vm5, %v134_v26, %v132_v29  ;;  %v151_v33 = vmul.f32 %v214_v27, %v128_v17 }
 0x165   :  { %v157_v34 = vmax.f32 %v135_v32, 1e-08  ;;  %v137_v36 = vmul.f32 %v216_v30, %v126_v19 }
 0x166   :  { %217 = vlog2.f32 %v159_v31  ;;  %v153_v37 = vsel %vm152_vm6, %v128_v17, %v151_v33 }
 0x167   :  { %219 = vlog2.f32 %v157_v34  ;;  %v156_v39 = vsel %vm154_vm7, %v155_v35, %v153_v37  ;;  %v139_v40 = vsel %vm138_vm8, %v126_v19, %v137_v36 }
 0x168   :  { %v160_v41 = vmax.f32 %v156_v39, 1e-08  ;;  %v142_v42 = vsel %vm140_vm9, %v141_v38, %v139_v40 }
 0x169   :  { %v158_v43 = vmax.f32 %v142_v42, 1e-08 }
 0x16a   :  { %221 = vlog2.f32 %v160_v41 }
 0x16b   :  { %223 = vlog2.f32 %v158_v43 }
 0x170   :  { %v218_v44 = vpop.eup %217 }
 0x171   :  { %v220_v45 = vpop.eup %219  ;;  %v166_v46 = vmul.f32 0.6931472, %v218_v44 }
 0x172   :  { %v162_v47 = vmul.f32 0.6931472, %v220_v45 }
 0x173   :  { %v171_v48 = vmul.f32 4.3429446, %v166_v46 }
 0x174   :  { %v222_v49 = vpop.eup %221  ;;  %v169_v50 = vmul.f32 4.3429446, %v162_v47 }
 0x175   :  { %v224_v51 = vpop.eup %223  ;;  %176 = vst.msk [vmem:[%s285_s3 + $0x10] sm:$0xff] %vm173_vm10, %v171_v48  ;;  %v168_v52 = vmul.f32 0.6931472, %v222_v49 }
 0x176   :  { %174 = vst.msk [vmem:[%s285_s3] sm:$0xff] %vm173_vm10, %v169_v50  ;;  %v164_v53 = vmul.f32 0.6931472, %v224_v51 }
 0x177   :  { %v172_v54 = vmul.f32 4.3429446, %v168_v52 }
 0x178   :  { %v170_v55 = vmul.f32 4.3429446, %v164_v53 }
 0x179   :  { %177 = vst.msk [vmem:[%s285_s3 + $0x18] sm:$0xff] %vm173_vm10, %v172_v54 }
 0x17a   :  { %175 = vst.msk [vmem:[%s285_s3 + $0x8] sm:$0xff] %vm173_vm10, %v170_v55 }

// kernel: _lambda_.11
= control target key start
LH: loop header
LB: loop body
LE: loop exit
PB: predicated region body
PF: predicated region fallthrough
CT: control target
= control target key end

     0   :  { %v108_v0 = vmov 0.0   ;;  %vm109_vm0 = vmmov 0   ;;  %vm39_vm1 = vcmask 261120   ;;  %vm83_vm2 = vcmask 556032   ;;  %s145_s1 = inlined_call_operand.vmem [shape: bf16[32,68], index: 1, kind: input, shape index: {}]   ;;  %s146_s0 = inlined_call_operand.vmem [shape: bf16[8,32], index: 0, kind: input, shape index: {}]   ;;  %s147_s2 = inlined_call_operand.vmem [shape: f32[1,68], index: 2, kind: input, shape index: {}]   ;;  %s148_s3 = inlined_call_operand.vmem [shape: f32[8,68], index: 3, kind: output, shape index: {}]  }
   0x1   :  { %96 = vmatprep.subr.bf16.mxu0 %v108_v0  ;;  %v106_v1 = vld [vmem:[%s145_s1] sm:$0xff]   ;;  %100 = vmatprep.mubr.msk.bf16.mxu0 %vm109_vm0, %v108_v0  ;;  %v107_v2 = vld [vmem:[%s145_s1 + $0x8] sm:$0xff]  }
   0x2   :  { %97 = vmatpush3.bf16.msra.mxu0 %v106_v1  ;;  %v15_v3 = vld [vmem:[%s146_s0] sm:$0xf] }
   0x3   :  { %98 = vmatprep.subr.bf16.mxu0 %v108_v0  ;;  %v89_v4 = vld [vmem:[%s147_s2] ss:$0 sm:$0xff] }
   0x6   :  { %99 = vmatpush3.bf16.msra.mxu0 %v107_v2 }
   0x9   :  { %101 = vmatmul.mubr.msk.bf16.vlgmr.msra.gmra.mrb[0].mxu0 %vm39_vm1, %v15_v3 }
  0xdc   :  { %v77_v5 = vpop.f32.mrb[0].mxu0 }
  0xdd   :  { %v78_v6 = vadd.f32 %v89_v4, %v77_v5  ;;  %v102_v7 = vpop.f32.mrb[1].mxu0 }
  0xde   :  { %v80_v8 = vpop.f32.mrb[2].mxu0 }
  0xdf   :  { %84 = vst.msk [vmem:[%s148_s3] sm:$0xff] %vm83_vm2, %v78_v6  ;;  %v103_v9 = vpop.f32.mrb[3].mxu0 }

// kernel: _lambda_.9
= control target key start
LH: loop header
LB: loop body
LE: loop exit
PB: predicated region body
PF: predicated region fallthrough
CT: control target
= control target key end

     0   :  { %s1459_s25 = smov 127   ;;  %vm139_vm0 = vcmask 556032   ;;  %s1460_s10 = smov 126   ;;  %vm164_vm1 = vcmask 1041408   ;;  %v1461_v16 = vmov 0   ;;  %vm738_vm2 = vcmask 97280   ;;  %s1943_s0 = inlined_call_operand.vmem [shape: bf16[68,14], index: 0, kind: input, shape index: {}]   ;;  %s1944_s1 = inlined_call_operand.vmem [shape: bf16[3,120,68], index: 1, kind: input, shape index: {}]   ;;  %s1945_s2 = inlined_call_operand.vmem [shape: f32[120,1], index: 2, kind: input, shape index: {}]   ;;  %s1946_s3 = inlined_call_operand.vmem [shape: f32[7,1], index: 3, kind: input, shape index: {}]   ;;  %s1947_s4 = inlined_call_operand.vmem [shape: f32[7,1], index: 4, kind: input, shape index: {}]   ;;  %s1948_s5 = inlined_call_operand.vmem [shape: f32[1,12], index: 5, kind: input, shape index: {}]   ;;  %s1949_s6 = inlined_call_operand.vmem [shape: bf16[56,14], index: 6, kind: output, shape index: {}]  }
   0x1   :  { %v1416_v0 = vld [vmem:[%s1943_s0 + $0x10] sm:$0xff]   ;;  %v1417_v1 = vld [vmem:[%s1943_s0] sm:$0xff]   ;;  %v1418_v2 = vld [vmem:[%s1943_s0 + $0x18] sm:$0xff]   ;;  %1415 = vset.pattern.permute.xlu1 %v1461_v16  ;;  %1414 = vset.pattern.permute.xlu0 %v1461_v16  ;;  %s1462_s14 = smov 1   ;;  %vm789_vm10 = vcmask 101384   ;;  %vm791_vm11 = vcmask 3072  }
   0x2   :  { %129 = vrot.lane.b32.xlu1 %v1416_v0, %s1459_s25  ;;  %125 = vrot.lane.b32.xlu0 %v1417_v1, %s1459_s25  ;;  %v1419_v3 = vld [vmem:[%s1943_s0 + $0x8] sm:$0xff]   ;;  %v1421_v4 = vld [vmem:[%s1944_s1] sm:$0xff]   ;;  %vm793_vm12 = vcmask 109672  }
   0x3   :  { %1292 = vmatprep.subr.bf16.mxu0 %v1417_v1  ;;  %v1420_v5 = vld [vmem:[%s1943_s0 + $0x20] ss:$0 sps:$4 sm:$0x33]   ;;  %1302 = vmatprep.mubr.msk.bf16.mxu0 %vm139_vm0, %v1421_v4  ;;  %v1422_v8 = vld [vmem:[%s1944_s1 + $0x8] sm:$0xff]   ;;  %v1423_v9 = vld [vmem:[%s1944_s1 + $0x10] sm:$0xff]  }
   0x4   :  { %1293 = vmatpush3.bf16.msra.mxu0 %v1417_v1  ;;  %v1427_v6 = vld [vmem:[%s1944_s1 + $0x3c] sm:$0xff]   ;;  %v330_v7 = vsel %vm164_vm1, %v1420_v5, 0  ;;  %v1426_v12 = vld [vmem:[%s1944_s1 + $0x28] sm:$0xff]   ;;  %v1428_v13 = vld [vmem:[%s1944_s1 + $0x30] sm:$0xff]  }
   0x5   :  { %1294 = vmatprep.subr.bf16.mxu0 %v1419_v3  ;;  %1276 = vmatprep.mubr.msk.bf16.mxu1 %vm139_vm0, %v1427_v6  ;;  %v1424_v10 = vld [vmem:[%s1944_s1 + $0x18] sm:$0xff]   ;;  %v1425_v11 = vld [vmem:[%s1944_s1 + $0x20] sm:$0xff]   ;;  %v632_v17 = vld [vmem:[%s1945_s2 + $0x8] sm:$0xff] }
   0x6   :  { %131 = vrot.lane.b32.xlu1 %v1418_v2, %s1459_s25  ;;  %127 = vrot.lane.b32.xlu0 %v1419_v3, %s1459_s25  ;;  %v1430_v14 = vld [vmem:[%s1944_s1 + $0x38] ss:$0 sps:$4 sm:$0xff]   ;;  %v631_v18 = vld [vmem:[%s1945_s2] sm:$0xff] }
   0x7   :  { %v1432_v15 = vld [vmem:[%s1944_s1 + $0x78] sm:$0xff]   ;;  %v633_v19 = vld [vmem:[%s1945_s2 + $0x10] sm:$0xff]  ;;  %v635_v21 = vld [vmem:[%s1945_s2 + $0x20] sm:$0xff] }
   0x8   :  { %1295 = vmatpush3.bf16.msra.mxu0 %v1419_v3  ;;  %v634_v20 = vld [vmem:[%s1945_s2 + $0x18] sm:$0xff]  ;;  %v636_v22 = vld [vmem:[%s1945_s2 + $0x28] sm:$0xff]  ;;  %v637_v23 = vld [vmem:[%s1945_s2 + $0x30] sm:$0xff] }
   0x9   :  { %1296 = vmatprep.subr.bf16.mxu0 %v1416_v0  ;;  %v638_v24 = vld [vmem:[%s1945_s2 + $0x38] sm:$0xff]  ;;  %v639_v25 = vld [vmem:[%s1945_s2 + $0x40] sm:$0xff]  ;;  %v640_v26 = vld [vmem:[%s1945_s2 + $0x48] sm:$0xff] }
   0xa   :  { %481 = vrot.lane.b32.xlu1 %v1417_v1, %s1460_s10  ;;  %133 = vrot.lane.b32.xlu0 %v1420_v5, %s1459_s25  ;;  %v641_v27 = vld [vmem:[%s1945_s2 + $0x50] sm:$0xff]  ;;  %v642_v28 = vld [vmem:[%s1945_s2 + $0x58] sm:$0xff] }
   0xb   :  { %v643_v29 = vld [vmem:[%s1945_s2 + $0x60] sm:$0xff]  ;;  %v644_v30 = vld [vmem:[%s1945_s2 + $0x68] sm:$0xff]  ;;  %v1433_v45 = vld [vmem:[%s1944_s1 + $0x54] sm:$0xff]  }
   0xc   :  { %1297 = vmatpush3.bf16.msra.mxu0 %v1416_v0  ;;  %v1429_v41 = vld [vmem:[%s1944_s1 + $0x44] sm:$0xff]   ;;  %v1431_v43 = vld [vmem:[%s1944_s1 + $0x4c] sm:$0xff]   ;;  %v1435_v47 = vld [vmem:[%s1944_s1 + $0x5c] sm:$0xff]  }
   0xd   :  { %1298 = vmatprep.subr.bf16.mxu0 %v1418_v2  ;;  %v1434_v46 = vld [vmem:[%s1944_s1 + $0x80] sm:$0xff]   ;;  %v1436_v48 = vld [vmem:[%s1944_s1 + $0x88] sm:$0xff]   ;;  %v1438_v50 = vld [vmem:[%s1944_s1 + $0x90] sm:$0xff]  }
   0xe   :  { %485 = vrot.lane.b32.xlu1 %v1416_v0, %s1460_s10  ;;  %483 = vrot.lane.b32.xlu0 %v1419_v3, %s1460_s10  ;;  %v1437_v49 = vld [vmem:[%s1944_s1 + $0x64] sm:$0xff]   ;;  %v1439_v51 = vld [vmem:[%s1944_s1 + $0x6c] sm:$0xff]  }
   0xf   :  { %v1440_v52 = vld [vmem:[%s1944_s1 + $0x74] ss:$0 sps:$4 sm:$0xff]   ;;  %v1441_v53 = vld [vmem:[%s1944_s1 + $0x98] sm:$0xff]   ;;  %v1442_v54 = vld [vmem:[%s1944_s1 + $0xa0] sm:$0xff]  }
  0x10   :  { %1299 = vmatpush3.bf16.msra.mxu0 %v1418_v2  ;;  %v1443_v55 = vld [vmem:[%s1944_s1 + $0xa8] sm:$0xff]   ;;  %v1444_v56 = vld [vmem:[%s1944_s1 + $0xb0] ss:$0 sps:$4 sm:$0xff]   ;;  %v766_v1 = vld [vmem:[%s1946_s3] sm:$0x1] }
  0x11   :  { %1379 = vmatprep.subr.msk.bf16.mxu0 %vm164_vm1, %v1420_v5  ;;  %v824_v3 = vld [vmem:[%s1946_s3 + $0x1] sm:$0x1]  ;;  %1382 = vpush %v766_v1  ;;  %v885_v6 = vld [vmem:[%s1947_s4 + $0x2] sm:$0x1] }
  0x12   :  { %489 = vrot.lane.b32.xlu1 %v1420_v5, %s1460_s10  ;;  %487 = vrot.lane.b32.xlu0 %v1418_v2, %s1460_s10  ;;  %v772_v2 = vld [vmem:[%s1947_s4] sm:$0x1]  ;;  %v830_v4 = vld [vmem:[%s1947_s4 + $0x1] sm:$0x1] }
  0x13   :  { %1384 = vpush %v772_v2  ;;  %v879_v5 = vld [vmem:[%s1946_s3 + $0x2] sm:$0x1] }
  0x14   :  { %1301 = vmatpush3.bf16.msra.mxu0 %v330_v7  ;;  %1386 = vpush %v824_v3  ;;  %v934_v7 = vld [vmem:[%s1946_s3 + $0x3] sm:$0x1] }
  0x15   :  { %1388 = vpush %v830_v4 }
  0x16   :  { %652 = vperm.xlu1 %1415, %v632_v17   ;;  %647 = vperm.xlu0 %1414, %v631_v18   ;;  %1390 = vpush %v879_v5 }
  0x17   :  { %1303 = vmatmul.mubr.msk.bf16.vlgmr.msra.gmra.mrb[0].mxu0 %vm139_vm0, %v1422_v8  ;;  %v940_v8 = vld [vmem:[%s1947_s4 + $0x3] sm:$0x1]  ;;  %1392 = vpush %v885_v6 }
  0x18   :  { %1306 = vmatprep.mubr.msk.bf16.mxu0 %vm139_vm0, %v1423_v9  ;;  %1394 = vpush %v934_v7 }
  0x19   :  { %1396 = vpush %v940_v8 }
  0x1a   :  { %657 = vperm.xlu1 %1415, %v633_v19   ;;  %662 = vperm.xlu0 %1414, %v634_v20  }
  0x1e   :  { %667 = vperm.xlu1 %1415, %v635_v21   ;;  %672 = vperm.xlu0 %1414, %v636_v22  }
  0x1f   :  { %1307 = vmatmul.mubr.msk.bf16.gmra.mrb[4].mxu0 %vm139_vm0, %v1424_v10 }
  0x20   :  { %1310 = vmatprep.mubr.msk.bf16.mxu0 %vm139_vm0, %v1425_v11 }
  0x22   :  { %677 = vperm.xlu1 %1415, %v637_v23   ;;  %682 = vperm.xlu0 %1414, %v638_v24  }
  0x26   :  { %687 = vperm.xlu1 %1415, %v639_v25   ;;  %692 = vperm.xlu0 %1414, %v640_v26  }
  0x27   :  { %1311 = vmatmul.mubr.msk.bf16.gmra.mrb[8].mxu0 %vm139_vm0, %v1426_v12 }
  0x28   :  { %1314 = vmatprep.mubr.msk.bf16.mxu0 %vm139_vm0, %v1428_v13 }
  0x2a   :  { %697 = vperm.xlu1 %1415, %v641_v27   ;;  %702 = vperm.xlu0 %1414, %v642_v28  }
  0x2e   :  { %707 = vperm.xlu1 %1415, %v643_v29   ;;  %712 = vperm.xlu0 %1414, %v644_v30  }
  0x2f   :  { %1315 = vmatmul.mubr.msk.bf16.gmra.mrb[12].mxu0 %vm139_vm0, %v1430_v14 }
  0x30   :  { %1328 = vmatprep.mubr.msk.bf16.mxu0 %vm139_vm0, %v1432_v15 }
  0x74   :  { %v130_v31 = vpop.permute.xlu1 %129  ;;  %v126_v32 = vpop.permute.xlu0 %125 }
  0x75   :  { %1266 = vmatprep.subr.bf16.mxu1 %v126_v32 }
  0x76   :  { %1267 = vmatpush3.bf16.msra.mxu1 %v126_v32 }
  0x78   :  { %v132_v33 = vpop.permute.xlu1 %131  ;;  %v128_v34 = vpop.permute.xlu0 %127 }
  0x79   :  { %1268 = vmatprep.subr.bf16.mxu1 %v128_v34 }
  0x7a   :  { %1269 = vmatpush3.bf16.msra.mxu1 %v128_v34 }
  0x7b   :  { %1270 = vmatprep.subr.bf16.mxu1 %v130_v31 }
  0x7c   :  { %v482_v35 = vpop.permute.xlu1 %481  ;;  %v134_v36 = vpop.permute.xlu0 %133 }
  0x7d   :  { %1318 = vmatprep.subr.bf16.mxu0 %v482_v35  ;;  %v166_v40 = vsel %vm164_vm1, %v134_v36, 0 }
  0x7e   :  { %1319 = vmatpush3.bf16.msra.mxu0 %v482_v35  ;;  %1271 = vmatpush3.bf16.msra.mxu1 %v130_v31 }
  0x7f   :  { %1272 = vmatprep.subr.bf16.mxu1 %v132_v33 }
  0x80   :  { %v484_v37 = vpop.permute.xlu0 %483  ;;  %v486_v38 = vpop.permute.xlu1 %485 }
  0x81   :  { %1320 = vmatprep.subr.bf16.mxu0 %v484_v37 }
  0x82   :  { %1273 = vmatpush3.bf16.msra.mxu1 %v132_v33  ;;  %1321 = vmatpush3.bf16.msra.mxu0 %v484_v37 }
  0x83   :  { %1378 = vmatprep.subr.msk.bf16.mxu1 %vm164_vm1, %v134_v36  ;;  %1322 = vmatprep.subr.bf16.mxu0 %v486_v38  ;;  %v1697_v36 = vld [vmem:[%s1948_s5] ss:$0 sm:$0xff] }
  0x84   :  { %v488_v39 = vpop.permute.xlu0 %487  ;;  %v490_v42 = vpop.permute.xlu1 %489 }
  0x85   :  { %v520_v44 = vsel %vm164_vm1, %v490_v42, 0 }
  0x86   :  { %1275 = vmatpush3.bf16.msra.mxu1 %v166_v40  ;;  %1323 = vmatpush3.bf16.msra.mxu0 %v486_v38 }
  0x87   :  { %1344 = vmatprep.subr.bf16.mxu1 %v482_v35  ;;  %1324 = vmatprep.subr.bf16.mxu0 %v488_v39 }
  0x89   :  { %1277 = vmatmul.mubr.msk.bf16.vlgmr.msra.gmra.mrb[0].mxu1 %vm139_vm0, %v1429_v41 }
  0x8a   :  { %1349 = vmatpush3.bf16.msra.mxu1 %v482_v35  ;;  %1325 = vmatpush3.bf16.msra.mxu0 %v488_v39 }
  0x8b   :  { %1345 = vmatprep.subr.bf16.mxu1 %v484_v37  ;;  %1380 = vmatprep.subr.msk.bf16.mxu0 %vm164_vm1, %v490_v42 }
  0x8c   :  { %1280 = vmatprep.mubr.msk.bf16.mxu1 %vm139_vm0, %v1431_v43 }
  0x8e   :  { %1350 = vmatpush3.bf16.msra.mxu1 %v484_v37  ;;  %1327 = vmatpush3.bf16.msra.mxu0 %v520_v44 }
  0x8f   :  { %1346 = vmatprep.subr.bf16.mxu1 %v486_v38 }
  0x91   :  { %1281 = vmatmul.mubr.msk.bf16.gmra.mrb[4].mxu1 %vm139_vm0, %v1433_v45  ;;  %1329 = vmatmul.mubr.msk.bf16.vlgmr.msra.gmra.mrb[0].mxu0 %vm139_vm0, %v1434_v46 }
  0x92   :  { %1351 = vmatpush3.bf16.msra.mxu1 %v486_v38  ;;  %1284 = vmatprep.mubr.msk.bf16.mxu1 %vm139_vm0, %v1435_v47 }
  0x93   :  { %1347 = vmatprep.subr.bf16.mxu1 %v488_v39  ;;  %1332 = vmatprep.mubr.msk.bf16.mxu0 %vm139_vm0, %v1436_v48 }
  0x95   :  { %v653_v9 = vpop.permute.xlu1 %652  ;;  %v648_v11 = vpop.permute.xlu0 %647 }
  0x96   :  { %1352 = vmatpush3.bf16.msra.mxu1 %v488_v39 }
  0x97   :  { %1381 = vmatprep.subr.msk.bf16.mxu1 %vm164_vm1, %v490_v42 }
  0x99   :  { %1285 = vmatmul.mubr.msk.bf16.gmra.mrb[8].mxu1 %vm139_vm0, %v1437_v49  ;;  %1333 = vmatmul.mubr.msk.bf16.gmra.mrb[4].mxu0 %vm139_vm0, %v1438_v50  ;;  %v658_v15 = vpop.permute.xlu1 %657  ;;  %v663_v17 = vpop.permute.xlu0 %662 }
  0x9a   :  { %1353 = vmatpush3.bf16.msra.mxu1 %v520_v44  ;;  %1288 = vmatprep.mubr.msk.bf16.mxu1 %vm139_vm0, %v1439_v51 }
  0x9d   :  { %v668_v32 = vpop.permute.xlu1 %667  ;;  %v673_v33 = vpop.permute.xlu0 %672 }
  0xa1   :  { %1289 = vmatmul.mubr.msk.bf16.gmra.mrb[12].mxu1 %vm139_vm0, %v1440_v52 }
  0xa2   :  { %1336 = vmatprep.mubr.msk.bf16.mxu1 %vm139_vm0, %v1441_v53 }
  0xa9   :  { %1337 = vmatmul.mubr.msk.bf16.vlgmr.msra.gmra.mrb[16].mxu1 %vm139_vm0, %v1442_v54 }
  0xaa   :  { %1340 = vmatprep.mubr.msk.bf16.mxu1 %vm139_vm0, %v1443_v55 }
  0xb1   :  { %1341 = vmatmul.mubr.msk.bf16.gmra.mrb[20].mxu1 %vm139_vm0, %v1444_v56  ;;  %v678_v56 = vpop.permute.xlu1 %677 }
  0xfa   :  { %v1312_v57 = vpop.f32.mrb[8].mxu0 }
  0xfb   :  { %v1660_v58 = vpop.f32.mrb[9].mxu0 }
  0xfc   :  { %v1662_v59 = vpop.f32.mrb[10].mxu0 }
  0xfd   :  { %v1664_v60 = vpop.f32.mrb[11].mxu0 }
 0x102   :  { %v1316_v61 = vpop.f32.mrb[12].mxu0 }
 0x103   :  { %v1666_v62 = vpop.f32.mrb[13].mxu0 }
 0x104   :  { %v1317_v63 = vpop.f32.mrb[14].mxu0 }
 0x105   :  { %v1668_v0 = vpop.f32.mrb[15].mxu0 }
 0x15c   :  { %v1278_v10 = vpop.f32.mrb[0].mxu1 }
 0x15d   :  { %v202_v12 = vpop.f32.mrb[1].mxu1 }
 0x15e   :  { %v1279_v13 = vpop.f32.mrb[2].mxu1 }
 0x15f   :  { %v205_v14 = vpop.f32.mrb[3].mxu1 }
 0x164   :  { %v1330_v18 = vpop.f32.mrb[0].mxu0  ;;  %v1282_v19 = vpop.f32.mrb[4].mxu1 }
 0x165   :  { %v1354_v20 = vadd.f32 %v1330_v18, %v1278_v10  ;;  %v556_v21 = vpop.f32.mrb[1].mxu0  ;;  %v218_v22 = vpop.f32.mrb[5].mxu1 }
 0x166   :  { %v1355_v23 = vadd.f32 %v556_v21, %v202_v12  ;;  %v1331_v24 = vpop.f32.mrb[2].mxu0  ;;  %v1283_v25 = vpop.f32.mrb[6].mxu1 }
 0x167   :  { %v1356_v26 = vadd.f32 %v1331_v24, %v1279_v13  ;;  %v559_v27 = vpop.f32.mrb[3].mxu0  ;;  %v221_v28 = vpop.f32.mrb[7].mxu1  ;;  %v717_v30 = vadd.f32 %v1354_v20, %v658_v15 }
 0x168   :  { %v1357_v29 = vadd.f32 %v559_v27, %v205_v14  ;;  %v715_v34 = vadd.f32 %v1355_v23, %v648_v11 }
 0x169   :  { %v718_v31 = vadd.f32 %v1356_v26, %v663_v17 }
 0x16a   :  { %v716_v35 = vadd.f32 %v1357_v29, %v653_v9 }
 0x16b   :  { %v1699_v37 = vmax.f32 %v717_v30, %v718_v31 }
 0x16c   :  { %v1701_v38 = vmax.f32 %v715_v34, %v716_v35  ;;  %v1286_v39 = vpop.f32.mrb[8].mxu1  ;;  %v1334_v40 = vpop.f32.mrb[4].mxu0 }
 0x16d   :  { %v407_v41 = vadd.f32 %v1312_v57, %v1286_v39  ;;  %v1358_v42 = vadd.f32 %v1334_v40, %v1282_v19  ;;  %v234_v43 = vpop.f32.mrb[9].mxu1  ;;  %v572_v44 = vpop.f32.mrb[5].mxu0  ;;  %v796_v45 = vmul.f32 %v1697_v36, %v1699_v37 }
 0x16e   :  { %v399_v46 = vadd.f32 %v1660_v58, %v234_v43  ;;  %v1359_v47 = vadd.f32 %v572_v44, %v218_v22  ;;  %v1287_v48 = vpop.f32.mrb[10].mxu1  ;;  %v1335_v49 = vpop.f32.mrb[6].mxu0  ;;  %v737_v50 = vmul.f32 %v1697_v36, %v1701_v38 }
 0x16f   :  { %v410_v51 = vadd.f32 %v1662_v59, %v1287_v48  ;;  %v1360_v52 = vadd.f32 %v1335_v49, %v1283_v25  ;;  %v237_v53 = vpop.f32.mrb[11].mxu1  ;;  %v575_v54 = vpop.f32.mrb[7].mxu0  ;;  %v797_v55 = vsel %vm738_vm2, %v796_v45, 0.0  ;;  %v721_v1 = vadd.f32 %v1358_v42, %v678_v56 }
 0x170   :  { %v683_v57 = vpop.permute.xlu0 %682  ;;  %v402_v61 = vadd.f32 %v1664_v60, %v237_v53  ;;  %v1361_v63 = vadd.f32 %v575_v54, %v221_v28  ;;  %798 = vadd.xlane.f32.xlu1 %v797_v55  ;;  %v748_v58 = vmul.f32 %v737_v50, %v737_v50  ;;  %v719_v3 = vadd.f32 %v1359_v47, %v668_v32  ;;  %v688_v19 = vpop.permute.xlu1 %687 }
 0x171   :  { %v722_v2 = vadd.f32 %v1360_v52, %v683_v57  ;;  %v806_v6 = vmul.f32 %v796_v45, %v796_v45  ;;  %v739_v59 = vsel %vm738_vm2, %v737_v50, 0.0 }
 0x172   :  { %v720_v4 = vadd.f32 %v1361_v63, %v673_v33  ;;  %v749_v5 = vsel %vm738_vm2, %v748_v58, 0.0  ;;  %v995_v63 = vld [vmem:[%s1947_s4 + $0x4] sm:$0x1]  ;;  %v1044_v58 = vld [vmem:[%s1946_s3 + $0x5] sm:$0x1] }
 0x173   :  { %750 = vadd.xlane.f32.xlu0 %v749_v5  ;;  %v1713_v7 = vmax.f32 %v721_v1, %v722_v2  ;;  %v807_v13 = vsel %vm738_vm2, %v806_v6, 0.0  ;;  %v1050_v2 = vld [vmem:[%s1947_s4 + $0x5] sm:$0x1] }
 0x174   :  { %v1290_v8 = vpop.f32.mrb[12].mxu1  ;;  %740 = vadd.xlane.f32.xlu1 %v739_v59  ;;  %v1715_v9 = vmax.f32 %v719_v3, %v720_v4  ;;  %v693_v20 = vpop.permute.xlu0 %692 }
 0x175   :  { %v250_v60 = vpop.f32.mrb[13].mxu1  ;;  %v906_v10 = vmul.f32 %v1697_v36, %v1713_v7  ;;  %v698_v31 = vpop.permute.xlu1 %697 }
 0x176   :  { %v415_v11 = vadd.f32 %v1666_v62, %v250_v60  ;;  %v1291_v12 = vpop.f32.mrb[14].mxu1  ;;  %v851_v17 = vmul.f32 %v1697_v36, %v1715_v9  ;;  %v1099_v60 = vld [vmem:[%s1946_s3 + $0x6] sm:$0x1] }
 0x177   :  { %v253_v14 = vpop.f32.mrb[15].mxu1  ;;  %808 = vadd.xlane.f32.xlu0 %v807_v13  ;;  %v907_v15 = vsel %vm738_vm2, %v906_v10, 0.0  ;;  %v916_v22 = vmul.f32 %v906_v10, %v906_v10  ;;  %v1105_v10 = vld [vmem:[%s1947_s4 + $0x6] sm:$0x1] }
 0x178   :  { %v418_v18 = vadd.f32 %v1668_v0, %v253_v14  ;;  %908 = vadd.xlane.f32.xlu1 %v907_v15  ;;  %v852_v21 = vsel %vm738_vm2, %v851_v17, 0.0  ;;  %v861_v30 = vmul.f32 %v851_v17, %v851_v17  ;;  %v703_v32 = vpop.permute.xlu0 %702 }
 0x179   :  { %v917_v29 = vsel %vm738_vm2, %v916_v22, 0.0  ;;  %v708_v52 = vpop.permute.xlu1 %707 }
 0x17a   :  { %v862_v40 = vsel %vm738_vm2, %v861_v30, 0.0 }
 0x17c   :  { %v1338_v23 = vpop.f32.mrb[16].mxu1  ;;  %853 = vadd.xlane.f32.xlu1 %v852_v21  ;;  %v713_v53 = vpop.permute.xlu0 %712 }
 0x17d   :  { %v627_v62 = vadd.f32 %v1338_v23, %v407_v41  ;;  %v588_v24 = vpop.f32.mrb[17].mxu1 }
 0x17e   :  { %v625_v25 = vadd.f32 %v588_v24, %v399_v46  ;;  %v1339_v26 = vpop.f32.mrb[18].mxu1 }
 0x17f   :  { %v628_v27 = vadd.f32 %v1339_v26, %v410_v51  ;;  %v591_v28 = vpop.f32.mrb[19].mxu1  ;;  %v725_v33 = vadd.f32 %v698_v31, %v627_v62 }
 0x180   :  { %v626_v0 = vadd.f32 %v591_v28, %v402_v61  ;;  %918 = vadd.xlane.f32.xlu1 %v917_v29  ;;  %v723_v35 = vadd.f32 %v688_v19, %v625_v25  ;;  %v989_v61 = vld [vmem:[%s1946_s3 + $0x4] sm:$0x1]  ;;  %s1774_s3 = spop %1382 }
 0x181   :  { %v726_v34 = vadd.f32 %v703_v32, %v628_v27  ;;  %1398 = vpush %v989_v61  ;;  %s1780_s4 = spop %1384 }
 0x182   :  { %v724_v39 = vadd.f32 %v693_v20, %v626_v0  ;;  %1400 = vpush %v995_v63  ;;  %s1782_s1 = spop %1386 }
 0x183   :  { %v1728_v42 = vmax.f32 %v725_v33, %v726_v34  ;;  %1402 = vpush %v1044_v58  ;;  %s1784_s10 = spop %1388 }
 0x184   :  { %v1342_v41 = vpop.f32.mrb[20].mxu1  ;;  %863 = vadd.xlane.f32.xlu1 %v862_v40  ;;  %v1730_v43 = vmax.f32 %v723_v35, %v724_v39  ;;  %1404 = vpush %v1050_v2  ;;  %s1791_s11 = spop %1390 }
 0x185   :  { %v604_v44 = vpop.f32.mrb[21].mxu1  ;;  %v1016_v45 = vmul.f32 %v1697_v36, %v1728_v42  ;;  %1406 = vpush %v1099_v60  ;;  %s1796_s12 = spop %1392 }
 0x186   :  { %v629_v46 = vadd.f32 %v604_v44, %v415_v11  ;;  %v1343_v47 = vpop.f32.mrb[22].mxu1  ;;  %v961_v48 = vmul.f32 %v1697_v36, %v1730_v43  ;;  %1408 = vpush %v1105_v10  ;;  %s1799_s0 = spop %1394 }
 0x187   :  { %v607_v49 = vpop.f32.mrb[23].mxu1  ;;  %v1017_v50 = vsel %vm738_vm2, %v1016_v45, 0.0  ;;  %v1026_v57 = vmul.f32 %v1016_v45, %v1016_v45  ;;  %s1809_s13 = spop %1396 }
 0x188   :  { %v630_v51 = vadd.f32 %v607_v49, %v418_v18  ;;  %1018 = vadd.xlane.f32.xlu1 %v1017_v50  ;;  %v727_v54 = vadd.f32 %v708_v52, %v629_v46  ;;  %v962_v56 = vsel %vm738_vm2, %v961_v48, 0.0  ;;  %v971_v4 = vmul.f32 %v961_v48, %v961_v48 }
 0x189   :  { %v1027_v3 = vsel %vm738_vm2, %v1026_v57, 0.0 }
 0x18a   :  { %v728_v55 = vadd.f32 %v713_v53, %v630_v51  ;;  %v972_v5 = vsel %vm738_vm2, %v971_v4, 0.0 }
 0x18c   :  { %963 = vadd.xlane.f32.xlu1 %v962_v56  ;;  %v1747_v1 = vmax.f32 %v727_v54, %v728_v55 }
 0x18e   :  { %v1071_v6 = vmul.f32 %v1697_v36, %v1747_v1 }
 0x190   :  { %1028 = vadd.xlane.f32.xlu1 %v1027_v3  ;;  %v1072_v59 = vsel %vm738_vm2, %v1071_v6, 0.0  ;;  %v1081_v8 = vmul.f32 %v1071_v6, %v1071_v6 }
 0x192   :  { %v1082_v11 = vsel %vm738_vm2, %v1081_v8, 0.0 }
 0x194   :  { %973 = vadd.xlane.f32.xlu1 %v972_v5 }
 0x198   :  { %1073 = vadd.xlane.f32.xlu1 %v1072_v59 }
 0x19c   :  { %1083 = vadd.xlane.f32.xlu1 %v1082_v11 }
 0x1b2   :  { %s1824_s15 = spop %1398 }
 0x1b3   :  { %s1827_s16 = spop %1400 }
 0x1b4   :  { %s1403_s17 = spop %1402 }
 0x1b5   :  { %s1405_s18 = spop %1404 }
 0x1b6   :  { %s1407_s19 = spop %1406 }
 0x1b7   :  { %s1409_s20 = spop %1408 }
 0x1fd   :  { %v799_v12 = vpop.xlane.xlu1 %798 }
 0x1fe   :  { %v800_v13 = vrot.slane %v799_v12, 4 }
 0x200   :  { %v801_v14 = vadd.f32 %v800_v13, %v799_v12  ;;  %v751_v15 = vpop.xlane.xlu0 %750 }
 0x201   :  { %v752_v17 = vrot.slane %v751_v15, 4  ;;  %v741_v18 = vpop.xlane.xlu1 %740 }
 0x202   :  { %v802_v19 = vrot.slane %v801_v14, 2  ;;  %v742_v20 = vrot.slane %v741_v18, 4 }
 0x203   :  { %v753_v21 = vadd.f32 %v752_v17, %v751_v15 }
 0x204   :  { %v803_v22 = vadd.f32 %v802_v19, %v801_v14  ;;  %v743_v23 = vadd.f32 %v742_v20, %v741_v18  ;;  %v809_v62 = vpop.xlane.xlu0 %808 }
 0x205   :  { %v754_v24 = vrot.slane %v753_v21, 2  ;;  %v810_v25 = vrot.slane %v809_v62, 4  ;;  %v909_v26 = vpop.xlane.xlu1 %908 }
 0x206   :  { %v804_v27 = vrot.slane %v803_v22, 1  ;;  %v744_v28 = vrot.slane %v743_v23, 2  ;;  %v910_v29 = vrot.slane %v909_v26, 4 }
 0x207   :  { %v755_v30 = vadd.f32 %v754_v24, %v753_v21  ;;  %v811_v31 = vadd.f32 %v810_v25, %v809_v62 }
 0x208   :  { %v745_v32 = vadd.f32 %v744_v28, %v743_v23  ;;  %v911_v0 = vadd.f32 %v910_v29, %v909_v26  ;;  %v805_v33 = vadd.f32 %v804_v27, %v803_v22 }
 0x209   :  { %v756_v34 = vrot.slane %v755_v30, 1  ;;  %v812_v35 = vrot.slane %v811_v31, 2  ;;  %v854_v39 = vpop.xlane.xlu1 %853 }
 0x20a   :  { %v746_v40 = vrot.slane %v745_v32, 1  ;;  %v912_v41 = vrot.slane %v911_v0, 2  ;;  %v855_v44 = vrot.slane %v854_v39, 4  ;;  %v1764_v50 = vmul.f32 0.015625, %v805_v33 }
 0x20b   :  { %v813_v45 = vadd.f32 %v812_v35, %v811_v31  ;;  %v757_v46 = vadd.f32 %v756_v34, %v755_v30 }
 0x20c   :  { %v747_v47 = vadd.f32 %v746_v40, %v745_v32  ;;  %v913_v48 = vadd.f32 %v912_v41, %v911_v0  ;;  %v856_v49 = vadd.f32 %v855_v44, %v854_v39  ;;  %v818_v3 = vmul.f32 %v1764_v50, %v1764_v50 }
 0x20d   :  { %v814_v51 = vrot.slane %v813_v45, 1  ;;  %v919_v52 = vpop.xlane.xlu1 %918  ;;  %v759_v61 = vmul.f32 0.015625, %v757_v46 }
 0x20e   :  { %v1766_v53 = vmul.f32 0.015625, %v747_v47  ;;  %v914_v54 = vrot.slane %v913_v48, 1  ;;  %v857_v55 = vrot.slane %v856_v49, 2  ;;  %v920_v56 = vrot.slane %v919_v52, 4 }
 0x20f   :  { %v815_v57 = vadd.f32 %v814_v51, %v813_v45 }
 0x210   :  { %v760_v63 = vmul.f32 %v1766_v53, %v1766_v53  ;;  %v858_v58 = vadd.f32 %v857_v55, %v856_v49  ;;  %v921_v2 = vadd.f32 %v920_v56, %v919_v52  ;;  %v915_v59 = vadd.f32 %v914_v54, %v913_v48 }
 0x211   :  { %v817_v4 = vmul.f32 0.015625, %v815_v57  ;;  %v864_v5 = vpop.xlane.xlu1 %863  ;;  %v762_v47 = vsub.f32 %v1701_v38, %v1766_v53  ;;  %v769_v48 = vstv %s1774_s3 }
 0x212   :  { %v761_v6 = vsub.f32 %v759_v61, %v760_v63  ;;  %v922_v8 = vrot.slane %v921_v2, 2  ;;  %v859_v10 = vrot.slane %v858_v58, 1  ;;  %v865_v11 = vrot.slane %v864_v5, 4 }
 0x213   :  { %v819_v60 = vsub.f32 %v817_v4, %v818_v3  ;;  %v1772_v18 = vmul.f32 0.015625, %v915_v59  ;;  %v775_v63 = vstv %s1780_s4  ;;  %v827_v3 = vstv %s1782_s1 }
 0x214   :  { %v763_v12 = vadd.f32 1e-05, %v761_v6  ;;  %v923_v13 = vadd.f32 %v922_v8, %v921_v2  ;;  %v866_v15 = vadd.f32 %v865_v11, %v864_v5  ;;  %v860_v21 = vadd.f32 %v859_v10, %v858_v58 }
 0x215   :  { %v821_v14 = vadd.f32 1e-05, %v819_v60  ;;  %v1019_v17 = vpop.xlane.xlu1 %1018  ;;  %v928_v26 = vmul.f32 %v1772_v18, %v1772_v18  ;;  %v820_v58 = vsub.f32 %v1699_v37, %v1764_v50  ;;  %v833_v10 = vstv %s1784_s10 }
 0x216   :  { %1445 = vrsqrt.f32 %v763_v12  ;;  %v924_v19 = vrot.slane %v923_v13, 1  ;;  %v1020_v20 = vrot.slane %v1019_v17, 4  ;;  %v867_v22 = vrot.slane %v866_v15, 2 }
 0x217   :  { %1447 = vrsqrt.f32 %v821_v14  ;;  %v1778_v30 = vmul.f32 0.015625, %v860_v21  ;;  %v930_v21 = vsub.f32 %v1713_v7, %v1772_v18 }
 0x218   :  { %v925_v23 = vadd.f32 %v924_v19, %v923_v13  ;;  %v1021_v62 = vadd.f32 %v1020_v20, %v1019_v17  ;;  %v868_v24 = vadd.f32 %v867_v22, %v866_v15  ;;  %v937_v17 = vstv %s1799_s0 }
 0x219   :  { %v964_v25 = vpop.xlane.xlu1 %963  ;;  %v873_v45 = vmul.f32 %v1778_v30, %v1778_v30 }
 0x21a   :  { %v927_v27 = vmul.f32 0.015625, %v925_v23  ;;  %v1022_v28 = vrot.slane %v1021_v62, 2  ;;  %v965_v29 = vrot.slane %v964_v25, 4  ;;  %v869_v31 = vrot.slane %v868_v24, 1 }
 0x21c   :  { %v929_v32 = vsub.f32 %v927_v27, %v928_v26  ;;  %v1023_v0 = vadd.f32 %v1022_v28, %v1021_v62  ;;  %v966_v33 = vadd.f32 %v965_v29, %v964_v25  ;;  %v870_v34 = vadd.f32 %v869_v31, %v868_v24 }
 0x21d   :  { %v1029_v35 = vpop.xlane.xlu1 %1028 }
 0x21e   :  { %v931_v39 = vadd.f32 1e-05, %v929_v32  ;;  %v1024_v40 = vrot.slane %v1023_v0, 1  ;;  %v967_v41 = vrot.slane %v966_v33, 2  ;;  %v1030_v44 = vrot.slane %v1029_v35, 4 }
 0x21f   :  { %v872_v46 = vmul.f32 0.015625, %v870_v34 }
 0x220   :  { %v1446_v49 = vpop.eup %1445  ;;  %1449 = vrsqrt.f32 %v931_v39  ;;  %v1025_v51 = vadd.f32 %v1024_v40, %v1023_v0  ;;  %v968_v52 = vadd.f32 %v967_v41, %v966_v33  ;;  %v1031_v54 = vadd.f32 %v1030_v44, %v1029_v35 }
 0x221   :  { %v1448_v55 = vpop.eup %1447  ;;  %v874_v56 = vsub.f32 %v872_v46, %v873_v45  ;;  %v765_v57 = vmul.f32 %v1446_v49, %v762_v47  ;;  %v974_v61 = vpop.xlane.xlu1 %973  ;;  %v943_v33 = vstv %s1809_s13 }
 0x222   :  { %v969_v38 = vrot.slane %v968_v52, 1  ;;  %v1032_v53 = vrot.slane %v1031_v54, 2  ;;  %v975_v2 = vrot.slane %v974_v61, 4  ;;  %v823_v6 = vmul.f32 %v1448_v55, %v820_v58 }
 0x223   :  { %v876_v4 = vadd.f32 1e-05, %v874_v56  ;;  %v771_v5 = vmul.f32 %v769_v48, %v765_v57  ;;  %v1801_v59 = vmul.f32 0.015625, %v1025_v51  ;;  %v875_v56 = vsub.f32 %v1715_v9, %v1778_v30 }
 0x224   :  { %v1033_v8 = vadd.f32 %v1032_v53, %v1031_v54  ;;  %v976_v60 = vadd.f32 %v975_v2, %v974_v61  ;;  %v970_v11 = vadd.f32 %v969_v38, %v968_v52  ;;  %v829_v50 = vmul.f32 %v827_v3, %v823_v6 }
 0x225   :  { %1451 = vrsqrt.f32 %v876_v4  ;;  %v777_v37 = vadd.f32 %v775_v63, %v771_v5  ;;  %v1074_v12 = vpop.xlane.xlu1 %1073  ;;  %v1038_v22 = vmul.f32 %v1801_v59, %v1801_v59  ;;  %v882_v57 = vstv %s1791_s11 }
 0x226   :  { %v1034_v13 = vrot.slane %v1033_v8, 1  ;;  %v977_v14 = vrot.slane %v976_v60, 2  ;;  %v1075_v15 = vrot.slane %v1074_v12, 4  ;;  %v835_v20 = vadd.f32 %v833_v10, %v829_v50 }
 0x227   :  { %vm778_vm3 = vcmp.ge.f32.partialorder %v777_v37, 0.0  ;;  %v779_v19 = vmul.f32 0.01, %v777_v37  ;;  %v1811_v25 = vmul.f32 0.015625, %v970_v11  ;;  %v888_v9 = vstv %s1796_s12 }
 0x228   :  { %v1035_v23 = vadd.f32 %v1034_v13, %v1033_v8  ;;  %v978_v62 = vadd.f32 %v977_v14, %v976_v60  ;;  %v1076_v24 = vadd.f32 %v1075_v15, %v1074_v12  ;;  %vm836_vm4 = vcmp.ge.f32.partialorder %v835_v20, 0.0 }
 0x229   :  { %v837_v26 = vmul.f32 0.01, %v835_v20  ;;  %v1084_v27 = vpop.xlane.xlu1 %1083  ;;  %v780_v28 = vsel %vm778_vm3, %v777_v37, %v779_v19  ;;  %v983_v45 = vmul.f32 %v1811_v25, %v1811_v25  ;;  %v1040_v15 = vsub.f32 %v1728_v42, %v1801_v59 }
 0x22a   :  { %v1450_v29 = vpop.eup %1449  ;;  %v1037_v31 = vmul.f32 0.015625, %v1035_v23  ;;  %v979_v32 = vrot.slane %v978_v62, 1  ;;  %v1077_v0 = vrot.slane %v1076_v24, 2  ;;  %v1085_v7 = vrot.slane %v1084_v27, 4 }
 0x22b   :  { %v933_v18 = vmul.f32 %v1450_v29, %v930_v21  ;;  %v781_v34 = vmul.f32 %v1697_v36, %v780_v28  ;;  %v838_v35 = vsel %vm836_vm4, %v835_v20, %v837_v26  ;;  %v1047_v21 = vstv %s1403_s17 }
 0x22c   :  { %v1039_v39 = vsub.f32 %v1037_v31, %v1038_v22  ;;  %v980_v40 = vadd.f32 %v979_v32, %v978_v62  ;;  %v1078_v41 = vadd.f32 %v1077_v0, %v1076_v24  ;;  %v1086_v44 = vadd.f32 %v1085_v7, %v1084_v27 }
 0x22d   :  { %v939_v46 = vmul.f32 %v937_v17, %v933_v18  ;;  %v1220_v47 = vpack.c.bf16 %v781_v34, %v781_v34  ;;  %v839_v48 = vmul.f32 %v1697_v36, %v838_v35  ;;  %v1053_v24 = vstv %s1405_s18 }
 0x22e   :  { %v1041_v49 = vadd.f32 1e-05, %v1039_v39  ;;  %v982_v51 = vmul.f32 0.015625, %v980_v40  ;;  %v1079_v52 = vrot.slane %v1078_v41, 1  ;;  %v1087_v54 = vrot.slane %v1086_v44, 2 }
 0x22f   :  { %v1452_v55 = vpop.eup %1451  ;;  %v945_v61 = vadd.f32 %v943_v33, %v939_v46  ;;  %786 = vrot.lane.b32.xlu0 %v1220_v47, %s1462_s14  ;;  %v1221_v63 = vpack.c.bf16 %v839_v48, %v839_v48  ;;  %v985_v26 = vsub.f32 %v1730_v43, %v1811_v25  ;;  %v992_v29 = vstv %s1824_s15 }
 0x230   :  { %1453 = vrsqrt.f32 %v1041_v49  ;;  %v984_v58 = vsub.f32 %v982_v51, %v983_v45  ;;  %v1080_v38 = vadd.f32 %v1079_v52, %v1078_v41  ;;  %v1088_v53 = vadd.f32 %v1087_v54, %v1086_v44 }
 0x231   :  { %v878_v2 = vmul.f32 %v1452_v55, %v875_v56  ;;  %vm946_vm5 = vcmp.ge.f32.partialorder %v945_v61, 0.0  ;;  %v947_v3 = vmul.f32 0.01, %v945_v61  ;;  %844 = vrot.lane.b32.xlu1 %v1221_v63, %s1462_s14  ;;  %v998_v0 = vstv %s1827_s16 }
 0x232   :  { %v986_v4 = vadd.f32 1e-05, %v984_v58  ;;  %v1091_v5 = vmul.f32 0.015625, %v1080_v38  ;;  %v1089_v6 = vrot.slane %v1088_v53, 1  ;;  %v1102_v35 = vstv %s1407_s19 }
 0x233   :  { %v884_v30 = vmul.f32 %v882_v57, %v878_v2  ;;  %v948_v8 = vsel %vm946_vm5, %v945_v61, %v947_v3  ;;  %v1108_v44 = vstv %s1409_s20 }
 0x234   :  { %1455 = vrsqrt.f32 %v986_v4  ;;  %v1090_v60 = vadd.f32 %v1089_v6, %v1088_v53  ;;  %v949_v10 = vmul.f32 %v1697_v36, %v948_v8  ;;  %v1093_v37 = vmul.f32 %v1091_v5, %v1091_v5 }
 0x235   :  { %v890_v11 = vadd.f32 %v888_v9, %v884_v30  ;;  %v1095_v43 = vsub.f32 %v1747_v1, %v1091_v5 }
 0x236   :  { %v1092_v50 = vmul.f32 0.015625, %v1090_v60  ;;  %v1223_v12 = vpack.c.bf16 %v949_v10, %v949_v10 }
 0x237   :  { %vm891_vm6 = vcmp.ge.f32.partialorder %v890_v11, 0.0  ;;  %v892_v13 = vmul.f32 0.01, %v890_v11 }
 0x238   :  { %v1094_v14 = vsub.f32 %v1092_v50, %v1093_v37  ;;  %954 = vrot.lane.b32.xlu1 %v1223_v12, %s1462_s14 }
 0x239   :  { %v893_v17 = vsel %vm891_vm6, %v890_v11, %v892_v13 }
 0x23a   :  { %v1454_v19 = vpop.eup %1453  ;;  %v1096_v20 = vadd.f32 1e-05, %v1094_v14  ;;  %v894_v22 = vmul.f32 %v1697_v36, %v893_v17 }
 0x23b   :  { %v1043_v23 = vmul.f32 %v1454_v19, %v1040_v15 }
 0x23c   :  { %1457 = vrsqrt.f32 %v1096_v20  ;;  %v1222_v62 = vpack.c.bf16 %v894_v22, %v894_v22 }
 0x23d   :  { %v1049_v27 = vmul.f32 %v1047_v21, %v1043_v23 }
 0x23e   :  { %v1456_v28 = vpop.eup %1455  ;;  %899 = vrot.lane.b32.xlu0 %v1222_v62, %s1462_s14 }
 0x23f   :  { %v988_v42 = vmul.f32 %v1456_v28, %v985_v26  ;;  %v1055_v59 = vadd.f32 %v1053_v24, %v1049_v27 }
 0x241   :  { %v994_v31 = vmul.f32 %v992_v29, %v988_v42  ;;  %vm1056_vm7 = vcmp.ge.f32.partialorder %v1055_v59, 0.0  ;;  %v1057_v32 = vmul.f32 0.01, %v1055_v59 }
 0x243   :  { %v1000_v7 = vadd.f32 %v998_v0, %v994_v31  ;;  %v1058_v18 = vsel %vm1056_vm7, %v1055_v59, %v1057_v32 }
 0x244   :  { %v1059_v33 = vmul.f32 %v1697_v36, %v1058_v18 }
 0x245   :  { %vm1001_vm8 = vcmp.ge.f32.partialorder %v1000_v7, 0.0  ;;  %v1002_v34 = vmul.f32 0.01, %v1000_v7 }
 0x246   :  { %v1458_v25 = vpop.eup %1457  ;;  %v1225_v39 = vpack.c.bf16 %v1059_v33, %v1059_v33 }
 0x247   :  { %v1098_v40 = vmul.f32 %v1458_v25, %v1095_v43  ;;  %v1003_v41 = vsel %vm1001_vm8, %v1000_v7, %v1002_v34 }
 0x248   :  { %1064 = vrot.lane.b32.xlu1 %v1225_v39, %s1462_s14  ;;  %v1004_v45 = vmul.f32 %v1697_v36, %v1003_v41 }
 0x249   :  { %v1104_v46 = vmul.f32 %v1102_v35, %v1098_v40 }
 0x24a   :  { %v1224_v47 = vpack.c.bf16 %v1004_v45, %v1004_v45 }
 0x24b   :  { %v1110_v48 = vadd.f32 %v1108_v44, %v1104_v46 }
 0x24c   :  { %1009 = vrot.lane.b32.xlu1 %v1224_v47, %s1462_s14 }
 0x24d   :  { %vm1111_vm9 = vcmp.ge.f32.partialorder %v1110_v48, 0.0  ;;  %v1112_v49 = vmul.f32 0.01, %v1110_v48 }
 0x24f   :  { %v1113_v51 = vsel %vm1111_vm9, %v1110_v48, %v1112_v49 }
 0x250   :  { %v1114_v1 = vmul.f32 %v1697_v36, %v1113_v51 }
 0x252   :  { %v1226_v52 = vpack.c.bf16 %v1114_v1, %v1114_v1 }
 0x254   :  { %1119 = vrot.lane.b32.xlu1 %v1226_v52, %s1462_s14 }
 0x2a1   :  { %v787_v54 = vpop.permute.xlu0 %786 }
 0x2a2   :  { %790 = vst.msk [vmem:[%s1949_s6] sm:$0xf] %vm789_vm10, %v787_v54 }
 0x2a3   :  { %792 = vst.msk [vmem:[%s1949_s6] sm:$0xf] %vm791_vm11, %v1461_v16  ;;  %v845_v55 = vpop.permute.xlu1 %844 }
 0x2a4   :  { %794 = vst.msk [vmem:[%s1949_s6] sm:$0xf] %vm793_vm12, %v1461_v16 }
 0x2a5   :  { %847 = vst.msk [vmem:[%s1949_s6 + $0x4] sm:$0xf] %vm789_vm10, %v845_v55 }
 0x2a6   :  { %848 = vst.msk [vmem:[%s1949_s6 + $0x4] sm:$0xf] %vm791_vm11, %v1461_v16 }
 0x2a7   :  { %849 = vst.msk [vmem:[%s1949_s6 + $0x4] sm:$0xf] %vm793_vm12, %v1461_v16 }
 0x2aa   :  { %v955_v36 = vpop.permute.xlu1 %954 }
 0x2ab   :  { %957 = vst.msk [vmem:[%s1949_s6 + $0xc] sm:$0xf] %vm789_vm10, %v955_v36 }
 0x2ac   :  { %958 = vst.msk [vmem:[%s1949_s6 + $0xc] sm:$0xf] %vm791_vm11, %v1461_v16 }
 0x2ad   :  { %959 = vst.msk [vmem:[%s1949_s6 + $0xc] sm:$0xf] %vm793_vm12, %v1461_v16 }
 0x2b0   :  { %v900_v56 = vpop.permute.xlu0 %899 }
 0x2b1   :  { %902 = vst.msk [vmem:[%s1949_s6 + $0x8] sm:$0xf] %vm789_vm10, %v900_v56 }
 0x2b2   :  { %903 = vst.msk [vmem:[%s1949_s6 + $0x8] sm:$0xf] %vm791_vm11, %v1461_v16 }
 0x2b3   :  { %904 = vst.msk [vmem:[%s1949_s6 + $0x8] sm:$0xf] %vm793_vm12, %v1461_v16 }
 0x2ba   :  { %v1065_v57 = vpop.permute.xlu1 %1064 }
 0x2bb   :  { %1067 = vst.msk [vmem:[%s1949_s6 + $0x14] sm:$0xf] %vm789_vm10, %v1065_v57 }
 0x2bc   :  { %1068 = vst.msk [vmem:[%s1949_s6 + $0x14] sm:$0xf] %vm791_vm11, %v1461_v16 }
 0x2bd   :  { %1069 = vst.msk [vmem:[%s1949_s6 + $0x14] sm:$0xf] %vm793_vm12, %v1461_v16 }
 0x2be   :  { %v1010_v61 = vpop.permute.xlu1 %1009 }
 0x2bf   :  { %1012 = vst.msk [vmem:[%s1949_s6 + $0x10] sm:$0xf] %vm789_vm10, %v1010_v61 }
 0x2c0   :  { %1013 = vst.msk [vmem:[%s1949_s6 + $0x10] sm:$0xf] %vm791_vm11, %v1461_v16 }
 0x2c1   :  { %1014 = vst.msk [vmem:[%s1949_s6 + $0x10] sm:$0xf] %vm793_vm12, %v1461_v16 }
 0x2c6   :  { %v1120_v63 = vpop.permute.xlu1 %1119 }
 0x2c7   :  { %1122 = vst.msk [vmem:[%s1949_s6 + $0x18] sm:$0xf] %vm789_vm10, %v1120_v63 }
 0x2c8   :  { %1123 = vst.msk [vmem:[%s1949_s6 + $0x18] sm:$0xf] %vm791_vm11, %v1461_v16 }
 0x2c9   :  { %1124 = vst.msk [vmem:[%s1949_s6 + $0x18] sm:$0xf] %vm793_vm12, %v1461_v16 }

// kernel: _lambda_.10
= control target key start
LH: loop header
LB: loop body
LE: loop exit
PB: predicated region body
PF: predicated region fallthrough
CT: control target
= control target key end

     0   :  { %v914_v1 = vmov 0.0   ;;  %s915_s25 = smov 127   ;;  %vm916_vm0 = vmmov 0   ;;  %s917_s30 = smov 126   ;;  %v918_v5 = vmov 0   ;;  %vm122_vm1 = vcmask 1043456   ;;  %s1228_s0 = inlined_call_operand.vmem [shape: bf16[56,14], index: 0, kind: input, shape index: {}]   ;;  %s1229_s1 = inlined_call_operand.vmem [shape: bf16[3,80,56], index: 1, kind: input, shape index: {}]   ;;  %s1230_s2 = inlined_call_operand.vmem [shape: f32[80,1], index: 2, kind: input, shape index: {}]   ;;  %s1231_s3 = inlined_call_operand.vmem [shape: f32[2,1], index: 3, kind: input, shape index: {}]   ;;  %s1232_s4 = inlined_call_operand.vmem [shape: f32[2,1], index: 4, kind: input, shape index: {}]   ;;  %s1233_s5 = inlined_call_operand.vmem [shape: f32[1,12], index: 5, kind: input, shape index: {}]   ;;  %s1234_s6 = inlined_call_operand.vmem [shape: bf16[32,14], index: 6, kind: output, shape index: {}]  }
   0x1   :  { %v958_v0 = vld [vmem:[%s1228_s0] sm:$0xff]   ;;  %783 = vmatprep.subr.bf16.mxu0 %v914_v1  ;;  %867 = vmatprep.subr.bf16.mxu1 %v914_v1  ;;  %v965_v2 = vld [vmem:[%s1228_s0 + $0x8] sm:$0xff]   ;;  %v971_v3 = vld [vmem:[%s1228_s0 + $0x10] sm:$0xff]   ;;  %vm106_vm2 = vcmask 457728   ;;  %vm525_vm3 = vcmask 97280   ;;  %s919_s9 = smov 1  }
   0x2   :  { %95 = vrot.lane.b32.xlu0 %v958_v0, %s915_s25  ;;  %799 = vmatprep.mubr.msk.bf16.mxu1 %vm916_vm0, %v914_v1  ;;  %v981_v4 = vld [vmem:[%s1228_s0 + $0x18] ss:$0 sps:$4 sm:$0xff]   ;;  %v458_v6 = vld [vmem:[%s1230_s2] sm:$0xff]  ;;  %v459_v7 = vld [vmem:[%s1230_s2 + $0x8] sm:$0xff]  ;;  %vm598_vm8 = vcmask 101384   ;;  %vm601_vm9 = vcmask 3072  }
   0x3   :  { %791 = vmatprep.mubr.msk.bf16.mxu0 %vm916_vm0, %v914_v1  ;;  %99 = vrot.lane.b32.xlu1 %v971_v3, %s915_s25  ;;  %v460_v8 = vld [vmem:[%s1230_s2 + $0x10] sm:$0xff]  ;;  %v461_v9 = vld [vmem:[%s1230_s2 + $0x18] sm:$0xff]  ;;  %v462_v10 = vld [vmem:[%s1230_s2 + $0x20] sm:$0xff]  ;;  %v241_v27 = vsel %vm122_vm1, %v981_v4, 0  ;;  %vm604_vm10 = vcmask 109672  }
   0x4   :  { %889 = vset.pattern.permute.xlu0 %v918_v5  ;;  %890 = vset.pattern.permute.xlu1 %v918_v5  ;;  %v463_v11 = vld [vmem:[%s1230_s2 + $0x28] sm:$0xff]  ;;  %v464_v12 = vld [vmem:[%s1230_s2 + $0x30] sm:$0xff]  ;;  %v465_v13 = vld [vmem:[%s1230_s2 + $0x38] sm:$0xff] }
   0x5   :  { %v895_v19 = vld [vmem:[%s1229_s1 + $0x38] sm:$0xff]   ;;  %v896_v20 = vld [vmem:[%s1229_s1 + $0x28] sm:$0xff]   ;;  %v897_v23 = vld [vmem:[%s1229_s1 + $0x40] sm:$0xff]  }
   0x6   :  { %97 = vrot.lane.b32.xlu0 %v965_v2, %s915_s25  ;;  %v898_v24 = vld [vmem:[%s1229_s1 + $0x30] sm:$0xff]   ;;  %v899_v29 = vld [vmem:[%s1229_s1 + $0x48] sm:$0xff]   ;;  %v900_v31 = vld [vmem:[%s1229_s1] sm:$0xff]  }
   0x7   :  { %101 = vrot.lane.b32.xlu1 %v981_v4, %s915_s25  ;;  %v901_v30 = vld [vmem:[%s1229_s1 + $0x50] sm:$0xff]   ;;  %v903_v32 = vld [vmem:[%s1229_s1 + $0x58] sm:$0xff]   ;;  %v902_v33 = vld [vmem:[%s1229_s1 + $0x8] sm:$0xff]  }
   0x8   :  { %v905_v34 = vld [vmem:[%s1229_s1 + $0x60] sm:$0xff]   ;;  %v904_v35 = vld [vmem:[%s1229_s1 + $0x10] sm:$0xff]   ;;  %v907_v36 = vld [vmem:[%s1229_s1 + $0x68] sm:$0xff]  }
   0x9   :  { %v906_v37 = vld [vmem:[%s1229_s1 + $0x18] sm:$0xff]   ;;  %v908_v38 = vld [vmem:[%s1229_s1 + $0x20] sm:$0xff]   ;;  %v909_v39 = vld [vmem:[%s1229_s1 + $0x70] sm:$0xff]  }
   0xa   :  { %350 = vrot.lane.b32.xlu0 %v958_v0, %s917_s30  ;;  %v564_v40 = vld [vmem:[%s1231_s3] sm:$0x1] }
   0xb   :  { %352 = vrot.lane.b32.xlu1 %v965_v2, %s917_s30  ;;  %v571_v41 = vld [vmem:[%s1232_s4] sm:$0x1]  ;;  %875 = vpush %v564_v40 }
   0xc   :  { %877 = vpush %v571_v41 }
   0xe   :  { %354 = vrot.lane.b32.xlu0 %v971_v3, %s917_s30 }
   0xf   :  { %356 = vrot.lane.b32.xlu1 %v981_v4, %s917_s30 }
  0x12   :  { %468 = vperm.xlu0 %889, %v458_v6  }
  0x13   :  { %473 = vperm.xlu1 %890, %v459_v7  }
  0x16   :  { %483 = vperm.xlu0 %889, %v461_v9  }
  0x17   :  { %478 = vperm.xlu1 %890, %v460_v8  }
  0x1a   :  { %493 = vperm.xlu0 %889, %v463_v11  }
  0x1b   :  { %488 = vperm.xlu1 %890, %v462_v10  }
  0x1e   :  { %503 = vperm.xlu0 %889, %v465_v13  }
  0x1f   :  { %498 = vperm.xlu1 %890, %v464_v12  }
  0x74   :  { %v96_v14 = vpop.permute.xlu0 %95 }
  0x75   :  { %784 = vmatpush3.bf16.msra.mxu0 %v96_v14  ;;  %871 = vmatpush3.bf16.msra.mxu1 %v96_v14  ;;  %v100_v15 = vpop.permute.xlu1 %99 }
  0x76   :  { %785 = vmatprep.subr.bf16.mxu0 %v914_v1  ;;  %868 = vmatprep.subr.bf16.mxu1 %v914_v1 }
  0x78   :  { %v98_v16 = vpop.permute.xlu0 %97 }
  0x79   :  { %786 = vmatpush3.bf16.msra.mxu0 %v98_v16  ;;  %872 = vmatpush3.bf16.msra.mxu1 %v98_v16  ;;  %v102_v17 = vpop.permute.xlu1 %101 }
  0x7a   :  { %787 = vmatprep.subr.bf16.mxu0 %v914_v1  ;;  %869 = vmatprep.subr.bf16.mxu1 %v914_v1  ;;  %v124_v18 = vsel %vm122_vm1, %v102_v17, 0 }
  0x7c   :  { %v351_v21 = vpop.permute.xlu0 %350 }
  0x7d   :  { %788 = vmatpush3.bf16.msra.mxu0 %v100_v15  ;;  %873 = vmatpush3.bf16.msra.mxu1 %v100_v15  ;;  %v353_v22 = vpop.permute.xlu1 %352 }
  0x7e   :  { %789 = vmatprep.subr.bf16.mxu0 %v914_v1  ;;  %870 = vmatprep.subr.bf16.mxu1 %v914_v1 }
  0x80   :  { %v355_v25 = vpop.permute.xlu0 %354 }
  0x81   :  { %790 = vmatpush3.bf16.msra.mxu0 %v124_v18  ;;  %874 = vmatpush3.bf16.msra.mxu1 %v124_v18  ;;  %v357_v26 = vpop.permute.xlu1 %356 }
  0x82   :  { %811 = vmatprep.subr.bf16.mxu1 %v914_v1  ;;  %839 = vmatprep.subr.bf16.mxu0 %v914_v1  ;;  %v377_v28 = vsel %vm122_vm1, %v357_v26, 0 }
  0x84   :  { %800 = vmatmul.mubr.msk.bf16.vlgmr.msra.gmra.mrb[0].mxu1 %vm106_vm2, %v895_v19  ;;  %792 = vmatmul.mubr.msk.bf16.vlgmr.msra.gmra.mrb[0].mxu0 %vm106_vm2, %v896_v20 }
  0x85   :  { %812 = vmatpush3.bf16.msra.mxu1 %v958_v0  ;;  %803 = vmatprep.mubr.msk.bf16.mxu1 %vm916_vm0, %v914_v1 }
  0x86   :  { %813 = vmatprep.subr.bf16.mxu1 %v914_v1  ;;  %840 = vmatpush3.bf16.msra.mxu0 %v351_v21 }
  0x87   :  { %841 = vmatprep.subr.bf16.mxu0 %v914_v1  ;;  %795 = vmatprep.mubr.msk.bf16.mxu0 %vm916_vm0, %v914_v1 }
  0x89   :  { %814 = vmatpush3.bf16.msra.mxu1 %v965_v2 }
  0x8a   :  { %815 = vmatprep.subr.bf16.mxu1 %v914_v1  ;;  %842 = vmatpush3.bf16.msra.mxu0 %v353_v22 }
  0x8b   :  { %843 = vmatprep.subr.bf16.mxu0 %v914_v1 }
  0x8c   :  { %804 = vmatmul.mubr.msk.bf16.gmra.mrb[4].mxu1 %vm106_vm2, %v897_v23  ;;  %796 = vmatmul.mubr.msk.bf16.gmra.mrb[4].mxu0 %vm106_vm2, %v898_v24 }
  0x8d   :  { %816 = vmatpush3.bf16.msra.mxu1 %v971_v3  ;;  %807 = vmatprep.mubr.msk.bf16.mxu1 %vm916_vm0, %v914_v1 }
  0x8e   :  { %844 = vmatpush3.bf16.msra.mxu0 %v355_v25  ;;  %817 = vmatprep.subr.bf16.mxu1 %v914_v1 }
  0x8f   :  { %845 = vmatprep.subr.bf16.mxu0 %v914_v1  ;;  %847 = vmatprep.mubr.msk.bf16.mxu0 %vm916_vm0, %v914_v1 }
  0x91   :  { %818 = vmatpush3.bf16.msra.mxu1 %v241_v27  ;;  %v469_v16 = vpop.permute.xlu0 %468 }
  0x92   :  { %846 = vmatpush3.bf16.msra.mxu0 %v377_v28  ;;  %v474_v15 = vpop.permute.xlu1 %473 }
  0x94   :  { %808 = vmatmul.mubr.msk.bf16.gmra.mrb[8].mxu1 %vm106_vm2, %v899_v29 }
  0x95   :  { %819 = vmatprep.mubr.msk.bf16.mxu1 %vm916_vm0, %v914_v1  ;;  %848 = vmatmul.mubr.msk.bf16.vlgmr.msra.gmra.mrb[8].mxu0 %vm106_vm2, %v901_v30 }
  0x96   :  { %851 = vmatprep.mubr.msk.bf16.mxu0 %vm916_vm0, %v914_v1  ;;  %v479_v27 = vpop.permute.xlu1 %478 }
  0x9c   :  { %820 = vmatmul.mubr.msk.bf16.vlgmr.msra.gmra.mrb[12].mxu1 %vm106_vm2, %v900_v31 }
  0x9d   :  { %823 = vmatprep.mubr.msk.bf16.mxu1 %vm916_vm0, %v914_v1  ;;  %852 = vmatmul.mubr.msk.bf16.gmra.mrb[12].mxu0 %vm106_vm2, %v903_v32  ;;  %v484_v32 = vpop.permute.xlu0 %483 }
  0x9e   :  { %855 = vmatprep.mubr.msk.bf16.mxu0 %vm916_vm0, %v914_v1 }
  0xa4   :  { %824 = vmatmul.mubr.msk.bf16.gmra.mrb[16].mxu1 %vm106_vm2, %v902_v33  ;;  %v1137_v33 = vld [vmem:[%s1233_s5] ss:$0 sm:$0xff] }
  0xa5   :  { %827 = vmatprep.mubr.msk.bf16.mxu1 %vm916_vm0, %v914_v1  ;;  %856 = vmatmul.mubr.msk.bf16.gmra.mrb[16].mxu0 %vm106_vm2, %v905_v34 }
  0xa6   :  { %859 = vmatprep.mubr.msk.bf16.mxu0 %vm916_vm0, %v914_v1 }
  0xac   :  { %828 = vmatmul.mubr.msk.bf16.gmra.mrb[20].mxu1 %vm106_vm2, %v904_v35 }
  0xad   :  { %831 = vmatprep.mubr.msk.bf16.mxu1 %vm916_vm0, %v914_v1  ;;  %860 = vmatmul.mubr.msk.bf16.gmra.mrb[20].mxu0 %vm106_vm2, %v907_v36 }
  0xae   :  { %863 = vmatprep.mubr.msk.bf16.mxu0 %vm916_vm0, %v914_v1 }
  0xb4   :  { %832 = vmatmul.mubr.msk.bf16.gmra.mrb[24].mxu1 %vm106_vm2, %v906_v37 }
  0xb5   :  { %835 = vmatprep.mubr.msk.bf16.mxu1 %vm916_vm0, %v914_v1  ;;  %864 = vmatmul.mubr.msk.bf16.gmra.mrb[24].mxu0 %vm106_vm2, %v909_v39 }
  0xbc   :  { %836 = vmatmul.mubr.msk.bf16.gmra.mrb[28].mxu1 %vm106_vm2, %v908_v38 }
 0x157   :  { %v176_v42 = vpop.f32.mrb[0].mxu1  ;;  %v160_v43 = vpop.f32.mrb[0].mxu0 }
 0x158   :  { %v801_v44 = vpop.f32.mrb[1].mxu1  ;;  %v793_v45 = vpop.f32.mrb[1].mxu0 }
 0x159   :  { %v1128_v46 = vpop.f32.mrb[2].mxu1  ;;  %v163_v47 = vpop.f32.mrb[2].mxu0 }
 0x15a   :  { %v802_v48 = vpop.f32.mrb[3].mxu1  ;;  %v794_v49 = vpop.f32.mrb[3].mxu0 }
 0x15f   :  { %v1130_v50 = vpop.f32.mrb[4].mxu1  ;;  %v168_v51 = vpop.f32.mrb[4].mxu0 }
 0x160   :  { %v805_v52 = vpop.f32.mrb[5].mxu1  ;;  %v797_v53 = vpop.f32.mrb[5].mxu0 }
 0x161   :  { %v1132_v54 = vpop.f32.mrb[6].mxu1  ;;  %v171_v55 = vpop.f32.mrb[6].mxu0 }
 0x162   :  { %v806_v56 = vpop.f32.mrb[7].mxu1  ;;  %v798_v57 = vpop.f32.mrb[7].mxu0 }
 0x167   :  { %v192_v58 = vpop.f32.mrb[8].mxu1 }
 0x168   :  { %v809_v59 = vpop.f32.mrb[9].mxu1  ;;  %v413_v60 = vpop.f32.mrb[8].mxu0 }
 0x169   :  { %v194_v61 = vpop.f32.mrb[10].mxu1  ;;  %v849_v62 = vpop.f32.mrb[9].mxu0 }
 0x16a   :  { %v810_v63 = vpop.f32.mrb[11].mxu1  ;;  %v416_v0 = vpop.f32.mrb[10].mxu0 }
 0x16b   :  { %v850_v1 = vpop.f32.mrb[11].mxu0  ;;  %v489_v59 = vpop.permute.xlu1 %488 }
 0x16c   :  { %v494_v61 = vpop.permute.xlu0 %493 }
 0x16f   :  { %v277_v2 = vpop.f32.mrb[12].mxu1 }
 0x170   :  { %v278_v3 = vadd.f32 %v277_v2, %v160_v43  ;;  %v821_v4 = vpop.f32.mrb[13].mxu1  ;;  %v421_v6 = vpop.f32.mrb[12].mxu0 }
 0x171   :  { %v280_v7 = vpop.f32.mrb[14].mxu1  ;;  %v853_v8 = vpop.f32.mrb[13].mxu0 }
 0x172   :  { %v450_v9 = vadd.f32 %v413_v60, %v278_v3  ;;  %v281_v10 = vadd.f32 %v280_v7, %v163_v47  ;;  %v822_v11 = vpop.f32.mrb[15].mxu1  ;;  %v424_v12 = vpop.f32.mrb[14].mxu0 }
 0x173   :  { %v854_v13 = vpop.f32.mrb[15].mxu0 }
 0x174   :  { %v451_v14 = vadd.f32 %v416_v0, %v281_v10  ;;  %v506_v29 = vadd.f32 %v469_v16, %v450_v9  ;;  %v504_v10 = vpop.permute.xlu0 %503 }
 0x176   :  { %v507_v34 = vadd.f32 %v474_v15, %v451_v14 }
 0x177   :  { %v285_v17 = vpop.f32.mrb[16].mxu1 }
 0x178   :  { %v286_v18 = vadd.f32 %v285_v17, %v168_v51  ;;  %v825_v19 = vpop.f32.mrb[17].mxu1  ;;  %v429_v20 = vpop.f32.mrb[16].mxu0 }
 0x179   :  { %v288_v21 = vpop.f32.mrb[18].mxu1  ;;  %v857_v22 = vpop.f32.mrb[17].mxu0  ;;  %v649_v19 = vld [vmem:[%s1231_s3 + $0x1] sm:$0x1]  ;;  %s876_s3 = spop %875 }
 0x17a   :  { %v452_v23 = vadd.f32 %v421_v6, %v286_v18  ;;  %v289_v24 = vadd.f32 %v288_v21, %v171_v55  ;;  %v826_v25 = vpop.f32.mrb[19].mxu1  ;;  %v432_v26 = vpop.f32.mrb[18].mxu0  ;;  %879 = vpush %v649_v19  ;;  %v656_v21 = vld [vmem:[%s1232_s4 + $0x1] sm:$0x1]  ;;  %s878_s4 = spop %877 }
 0x17b   :  { %v858_v28 = vpop.f32.mrb[19].mxu0  ;;  %v499_v6 = vpop.permute.xlu1 %498  ;;  %881 = vpush %v656_v21 }
 0x17c   :  { %v453_v30 = vadd.f32 %v424_v12, %v289_v24  ;;  %v508_v31 = vadd.f32 %v479_v27, %v452_v23 }
 0x17e   :  { %v1139_v35 = vmax.f32 %v506_v29, %v508_v31  ;;  %v509_v36 = vadd.f32 %v484_v32, %v453_v30 }
 0x17f   :  { %v293_v37 = vpop.f32.mrb[20].mxu1 }
 0x180   :  { %v1141_v38 = vmax.f32 %v507_v34, %v509_v36  ;;  %v294_v39 = vadd.f32 %v293_v37, %v176_v42  ;;  %v829_v40 = vpop.f32.mrb[21].mxu1  ;;  %v523_v41 = vmul.f32 %v1137_v33, %v1139_v35  ;;  %v437_v43 = vpop.f32.mrb[20].mxu0 }
 0x181   :  { %v296_v44 = vpop.f32.mrb[22].mxu1  ;;  %v861_v45 = vpop.f32.mrb[21].mxu0 }
 0x182   :  { %v454_v47 = vadd.f32 %v429_v20, %v294_v39  ;;  %v297_v48 = vadd.f32 %v296_v44, %v1128_v46  ;;  %v830_v49 = vpop.f32.mrb[23].mxu1  ;;  %v526_v51 = vsel %vm525_vm3, %v523_v41, 0.0  ;;  %v524_v52 = vmul.f32 %v1137_v33, %v1141_v38  ;;  %v440_v53 = vpop.f32.mrb[22].mxu0 }
 0x183   :  { %527 = vadd.xlane.f32.xlu1 %v526_v51  ;;  %v862_v55 = vpop.f32.mrb[23].mxu0  ;;  %v539_v58 = vmul.f32 %v523_v41, %v523_v41 }
 0x184   :  { %v455_v42 = vadd.f32 %v432_v26, %v297_v48  ;;  %v529_v56 = vsel %vm525_vm3, %v524_v52, 0.0  ;;  %v540_v57 = vmul.f32 %v524_v52, %v524_v52  ;;  %v510_v7 = vadd.f32 %v489_v59, %v454_v47 }
 0x185   :  { %530 = vadd.xlane.f32.xlu0 %v529_v56  ;;  %v541_v0 = vsel %vm525_vm3, %v539_v58, 0.0 }
 0x186   :  { %v544_v60 = vsel %vm525_vm3, %v540_v57, 0.0  ;;  %v511_v11 = vadd.f32 %v494_v61, %v455_v42 }
 0x187   :  { %v301_v46 = vpop.f32.mrb[24].mxu1  ;;  %545 = vadd.xlane.f32.xlu1 %v544_v60 }
 0x188   :  { %v302_v62 = vadd.f32 %v301_v46, %v1130_v50  ;;  %v833_v63 = vpop.f32.mrb[25].mxu1  ;;  %v445_v24 = vpop.f32.mrb[24].mxu0 }
 0x189   :  { %v304_v1 = vpop.f32.mrb[26].mxu1  ;;  %542 = vadd.xlane.f32.xlu0 %v541_v0  ;;  %v865_v26 = vpop.f32.mrb[25].mxu0  ;;  %v574_v24 = vstv %s878_s4 }
 0x18a   :  { %v456_v2 = vadd.f32 %v437_v43, %v302_v62  ;;  %v305_v3 = vadd.f32 %v304_v1, %v1132_v54  ;;  %v834_v4 = vpop.f32.mrb[27].mxu1  ;;  %v447_v28 = vpop.f32.mrb[26].mxu0 }
 0x18b   :  { %v866_v30 = vpop.f32.mrb[27].mxu0 }
 0x18c   :  { %v512_v8 = vadd.f32 %v499_v6, %v456_v2  ;;  %v457_v9 = vadd.f32 %v440_v53, %v305_v3 }
 0x18e   :  { %v513_v12 = vadd.f32 %v504_v10, %v457_v9  ;;  %v1154_v13 = vmax.f32 %v510_v7, %v512_v8 }
 0x18f   :  { %v309_v23 = vpop.f32.mrb[28].mxu1 }
 0x190   :  { %v609_v50 = vmul.f32 %v1137_v33, %v1154_v13  ;;  %v1158_v14 = vmax.f32 %v511_v11, %v513_v12  ;;  %v837_v25 = vpop.f32.mrb[29].mxu1 }
 0x191   :  { %v311_v27 = vpop.f32.mrb[30].mxu1 }
 0x192   :  { %v611_v15 = vsel %vm525_vm3, %v609_v50, 0.0  ;;  %v610_v54 = vmul.f32 %v1137_v33, %v1158_v14  ;;  %v624_v16 = vmul.f32 %v609_v50, %v609_v50  ;;  %v838_v29 = vpop.f32.mrb[31].mxu1 }
 0x193   :  { %612 = vadd.xlane.f32.xlu0 %v611_v15 }
 0x194   :  { %v614_v17 = vsel %vm525_vm3, %v610_v54, 0.0  ;;  %v625_v18 = vmul.f32 %v610_v54, %v610_v54  ;;  %v626_v20 = vsel %vm525_vm3, %v624_v16, 0.0 }
 0x195   :  { %615 = vadd.xlane.f32.xlu1 %v614_v17 }
 0x196   :  { %v629_v22 = vsel %vm525_vm3, %v625_v18, 0.0 }
 0x197   :  { %627 = vadd.xlane.f32.xlu0 %v626_v20  ;;  %v567_v20 = vstv %s876_s3 }
 0x199   :  { %630 = vadd.xlane.f32.xlu1 %v629_v22 }
 0x1ab   :  { %s880_s0 = spop %879 }
 0x1ac   :  { %s882_s10 = spop %881 }
 0x210   :  { %v528_v31 = vpop.xlane.xlu1 %527 }
 0x212   :  { %v531_v32 = vpop.xlane.xlu0 %530 }
 0x213   :  { %v532_v34 = vadd.f32 %v531_v32, %v528_v31 }
 0x214   :  { %v546_v37 = vpop.xlane.xlu1 %545 }
 0x215   :  { %v533_v36 = vrot.slane %v532_v34, 4 }
 0x216   :  { %v543_v39 = vpop.xlane.xlu0 %542 }
 0x217   :  { %v534_v40 = vadd.f32 %v533_v36, %v532_v34  ;;  %v547_v41 = vadd.f32 %v546_v37, %v543_v39 }
 0x219   :  { %v535_v43 = vrot.slane %v534_v40, 2  ;;  %v548_v44 = vrot.slane %v547_v41, 4 }
 0x21b   :  { %v536_v45 = vadd.f32 %v535_v43, %v534_v40  ;;  %v549_v47 = vadd.f32 %v548_v44, %v547_v41  ;;  %v652_v43 = vstv %s880_s0 }
 0x21d   :  { %v537_v48 = vrot.slane %v536_v45, 1  ;;  %v550_v49 = vrot.slane %v549_v47, 2 }
 0x21f   :  { %v538_v51 = vadd.f32 %v537_v48, %v536_v45  ;;  %v551_v52 = vadd.f32 %v550_v49, %v549_v47  ;;  %v659_v47 = vstv %s882_s10 }
 0x220   :  { %v613_v53 = vpop.xlane.xlu0 %612 }
 0x221   :  { %v554_v55 = vmul.f32 0.0078125, %v538_v51  ;;  %v552_v42 = vrot.slane %v551_v52, 1 }
 0x222   :  { %v616_v56 = vpop.xlane.xlu1 %615 }
 0x223   :  { %v553_v57 = vadd.f32 %v552_v42, %v551_v52  ;;  %v617_v58 = vadd.f32 %v616_v56, %v613_v53  ;;  %v556_v59 = vmul.f32 %v554_v55, %v554_v55  ;;  %v558_v54 = vsub.f32 %v1139_v35, %v554_v55 }
 0x224   :  { %v628_v46 = vpop.xlane.xlu0 %627  ;;  %v559_v16 = vsub.f32 %v1141_v38, %v554_v55 }
 0x225   :  { %v555_v60 = vmul.f32 0.0078125, %v553_v57  ;;  %v618_v61 = vrot.slane %v617_v58, 4 }
 0x226   :  { %v631_v62 = vpop.xlane.xlu1 %630 }
 0x227   :  { %v557_v63 = vsub.f32 %v555_v60, %v556_v59  ;;  %v619_v0 = vadd.f32 %v618_v61, %v617_v58  ;;  %v632_v1 = vadd.f32 %v631_v62, %v628_v46 }
 0x229   :  { %v560_v2 = vadd.f32 1e-05, %v557_v63  ;;  %v620_v3 = vrot.slane %v619_v0, 2  ;;  %v633_v4 = vrot.slane %v632_v1, 4 }
 0x22b   :  { %910 = vrsqrt.f32 %v560_v2  ;;  %v621_v6 = vadd.f32 %v620_v3, %v619_v0  ;;  %v634_v7 = vadd.f32 %v633_v4, %v632_v1 }
 0x22d   :  { %v622_v8 = vrot.slane %v621_v6, 1  ;;  %v635_v9 = vrot.slane %v634_v7, 2 }
 0x22f   :  { %v623_v10 = vadd.f32 %v622_v8, %v621_v6  ;;  %v636_v11 = vadd.f32 %v635_v9, %v634_v7 }
 0x231   :  { %v639_v12 = vmul.f32 0.0078125, %v623_v10  ;;  %v637_v50 = vrot.slane %v636_v11, 1 }
 0x233   :  { %v638_v15 = vadd.f32 %v637_v50, %v636_v11  ;;  %v641_v19 = vmul.f32 %v639_v12, %v639_v12  ;;  %v643_v39 = vsub.f32 %v1154_v13, %v639_v12  ;;  %v644_v40 = vsub.f32 %v1158_v14, %v639_v12 }
 0x235   :  { %v911_v17 = vpop.eup %910  ;;  %v640_v18 = vmul.f32 0.0078125, %v638_v15 }
 0x236   :  { %v562_v21 = vmul.f32 %v911_v17, %v558_v54  ;;  %v563_v22 = vmul.f32 %v911_v17, %v559_v16 }
 0x237   :  { %v642_v23 = vsub.f32 %v640_v18, %v641_v19 }
 0x238   :  { %v569_v25 = vmul.f32 %v567_v20, %v562_v21  ;;  %v570_v26 = vmul.f32 %v567_v20, %v563_v22 }
 0x239   :  { %v645_v27 = vadd.f32 1e-05, %v642_v23 }
 0x23a   :  { %v576_v28 = vadd.f32 %v574_v24, %v569_v25  ;;  %v577_v29 = vadd.f32 %v574_v24, %v570_v26 }
 0x23b   :  { %912 = vrsqrt.f32 %v645_v27 }
 0x23c   :  { %vm578_vm4 = vcmp.ge.f32.partialorder %v576_v28, 0.0  ;;  %vm579_vm5 = vcmp.ge.f32.partialorder %v577_v29, 0.0  ;;  %v580_v35 = vmul.f32 0.01, %v576_v28  ;;  %v581_v30 = vmul.f32 0.01, %v577_v29 }
 0x23e   :  { %v583_v38 = vsel %vm579_vm5, %v577_v29, %v581_v30  ;;  %v582_v31 = vsel %vm578_vm4, %v576_v28, %v580_v35 }
 0x23f   :  { %v585_v32 = vmul.f32 %v1137_v33, %v583_v38  ;;  %v584_v34 = vmul.f32 %v1137_v33, %v582_v31 }
 0x241   :  { %v753_v36 = vpack.c.bf16 %v585_v32, %v585_v32  ;;  %v752_v37 = vpack.c.bf16 %v584_v34, %v584_v34 }
 0x243   :  { %594 = vrot.lane.b32.xlu1 %v753_v36, %s919_s9  ;;  %592 = vrot.lane.b32.xlu0 %v752_v37, %s919_s9 }
 0x245   :  { %v913_v41 = vpop.eup %912 }
 0x246   :  { %v647_v44 = vmul.f32 %v913_v41, %v643_v39  ;;  %v648_v45 = vmul.f32 %v913_v41, %v644_v40 }
 0x248   :  { %v654_v48 = vmul.f32 %v652_v43, %v647_v44  ;;  %v655_v49 = vmul.f32 %v652_v43, %v648_v45 }
 0x24a   :  { %v661_v51 = vadd.f32 %v659_v47, %v654_v48  ;;  %v662_v52 = vadd.f32 %v659_v47, %v655_v49 }
 0x24c   :  { %vm663_vm6 = vcmp.ge.f32.partialorder %v661_v51, 0.0  ;;  %vm664_vm7 = vcmp.ge.f32.partialorder %v662_v52, 0.0  ;;  %v665_v53 = vmul.f32 0.01, %v661_v51  ;;  %v666_v55 = vmul.f32 0.01, %v662_v52 }
 0x24e   :  { %v667_v42 = vsel %vm663_vm6, %v661_v51, %v665_v53  ;;  %v668_v56 = vsel %vm664_vm7, %v662_v52, %v666_v55 }
 0x24f   :  { %v670_v13 = vmul.f32 %v1137_v33, %v668_v56  ;;  %v669_v14 = vmul.f32 %v1137_v33, %v667_v42 }
 0x251   :  { %v755_v57 = vpack.c.bf16 %v670_v13, %v670_v13  ;;  %v754_v58 = vpack.c.bf16 %v669_v14, %v669_v14 }
 0x253   :  { %679 = vrot.lane.b32.xlu0 %v755_v57, %s919_s9  ;;  %677 = vrot.lane.b32.xlu1 %v754_v58, %s919_s9 }
 0x2b5   :  { %v595_v59 = vpop.permute.xlu1 %594  ;;  %v593_v60 = vpop.permute.xlu0 %592 }
 0x2b6   :  { %600 = vst.msk [vmem:[%s1234_s6 + $0x4] sm:$0xf] %vm598_vm8, %v595_v59  ;;  %599 = vst.msk [vmem:[%s1234_s6] sm:$0xf] %vm598_vm8, %v593_v60 }
 0x2b7   :  { %603 = vst.msk [vmem:[%s1234_s6 + $0x4] sm:$0xf] %vm601_vm9, %v918_v5  ;;  %602 = vst.msk [vmem:[%s1234_s6] sm:$0xf] %vm601_vm9, %v918_v5 }
 0x2b8   :  { %606 = vst.msk [vmem:[%s1234_s6 + $0x4] sm:$0xf] %vm604_vm10, %v918_v5  ;;  %605 = vst.msk [vmem:[%s1234_s6] sm:$0xf] %vm604_vm10, %v918_v5 }
 0x2c5   :  { %v678_v33 = vpop.permute.xlu1 %677  ;;  %v680_v61 = vpop.permute.xlu0 %679 }
 0x2c6   :  { %683 = vst.msk [vmem:[%s1234_s6 + $0x8] sm:$0xf] %vm598_vm8, %v678_v33  ;;  %684 = vst.msk [vmem:[%s1234_s6 + $0xc] sm:$0xf] %vm598_vm8, %v680_v61 }
 0x2c7   :  { %685 = vst.msk [vmem:[%s1234_s6 + $0x8] sm:$0xf] %vm601_vm9, %v918_v5  ;;  %686 = vst.msk [vmem:[%s1234_s6 + $0xc] sm:$0xf] %vm601_vm9, %v918_v5 }
 0x2c8   :  { %687 = vst.msk [vmem:[%s1234_s6 + $0x8] sm:$0xf] %vm604_vm10, %v918_v5  ;;  %688 = vst.msk [vmem:[%s1234_s6 + $0xc] sm:$0xf] %vm604_vm10, %v918_v5 }

// kernel: _lambda_.12
= control target key start
LH: loop header
LB: loop body
LE: loop exit
PB: predicated region body
PF: predicated region fallthrough
CT: control target
= control target key end

     0   :  { %v235_v3 = vmov 0.0   ;;  %s236_s21 = smov 111   ;;  %vm79_vm0 = vcmask 1040384   ;;  %vm237_vm1 = vmmov 0   ;;  %v238_v11 = vmov 0   ;;  %s306_s1 = inlined_call_operand.vmem [shape: f32[32,34], index: 1, kind: input, shape index: {}]   ;;  %s307_s0 = inlined_call_operand.vmem [shape: f32[32,17], index: 0, kind: input, shape index: {}]   ;;  %s308_s2 = inlined_call_operand.vmem [shape: bf16[17,32], index: 2, kind: input, shape index: {}]   ;;  %s309_s3 = inlined_call_operand.vmem [shape: bf16[17,32], index: 3, kind: input, shape index: {}]   ;;  %s310_s4 = inlined_call_operand.vmem [shape: f32[16,32], index: 4, kind: output, shape index: {}]  }
   0x1   :  { %v28_v0 = vld [vmem:[%s306_s1 + $0x10] sm:$0xff]  ;;  %v26_v2 = vld [vmem:[%s306_s1] sm:$0xff]  ;;  %209 = vmatprep.subr.bf16.mxu0 %v235_v3  ;;  %201 = vmatprep.subr.bf16.mxu1 %v235_v3  ;;  %v29_v5 = vld [vmem:[%s306_s1 + $0x18] sm:$0xff]  ;;  %v81_v12 = vsel %vm79_vm0, 65535, %v238_v11  ;;  %vm75_vm2 = vcmask 138240   ;;  %vm182_vm3 = vcmask 261120  }
   0x2   :  { %v20_v1 = vld [vmem:[%s307_s0 + $0x10] sm:$0xff]  ;;  %42 = vrot.lane.b32.xlu1 %v28_v0, %s236_s21  ;;  %38 = vrot.lane.b32.xlu0 %v26_v2, %s236_s21  ;;  %v18_v4 = vld [vmem:[%s307_s0] sm:$0xff] }
   0x3   :  { %227 = vtanh.f32 %v20_v1  ;;  %v21_v6 = vld [vmem:[%s307_s0 + $0x18] sm:$0xff]  ;;  %v27_v7 = vld [vmem:[%s306_s1 + $0x8] sm:$0xff]  ;;  %213 = vmatprep.mubr.msk.bf16.mxu0 %vm237_vm1, %v235_v3  ;;  %205 = vmatprep.mubr.msk.bf16.mxu1 %vm237_vm1, %v235_v3  ;;  %v223_v9 = vld [vmem:[%s308_s2] sm:$0xff]  }
   0x4   :  { %229 = vtanh.f32 %v18_v4  ;;  %v19_v8 = vld [vmem:[%s307_s0 + $0x8] sm:$0xff]  ;;  %v224_v10 = vld [vmem:[%s309_s3] sm:$0xff]   ;;  %210 = vmatpush3.bf16.msra.mxu0 %v223_v9 }
   0x5   :  { %231 = vtanh.f32 %v21_v6  ;;  %v225_v13 = vld [vmem:[%s308_s2 + $0x8] ss:$0 sps:$4 sm:$0x11]   ;;  %202 = vmatpush3.bf16.msra.mxu1 %v224_v10  ;;  %211 = vmatprep.subr.bf16.mxu0 %v235_v3 }
   0x6   :  { %233 = vtanh.f32 %v19_v8  ;;  %44 = vrot.lane.b32.xlu1 %v29_v5, %s236_s21  ;;  %40 = vrot.lane.b32.xlu0 %v27_v7, %s236_s21  ;;  %v226_v14 = vld [vmem:[%s309_s3 + $0x8] ss:$0 sps:$4 sm:$0x11]   ;;  %v139_v15 = vand.u32 %v225_v13, %v81_v12 }
   0x7   :  { %203 = vmatprep.subr.bf16.mxu1 %v235_v3  ;;  %v83_v16 = vand.u32 %v226_v14, %v81_v12 }
   0x8   :  { %212 = vmatpush3.bf16.msra.mxu0 %v139_v15 }
   0x9   :  { %204 = vmatpush3.bf16.msra.mxu1 %v83_v16 }
   0xd   :  { %v228_v17 = vpop.eup %227 }
   0xe   :  { %v230_v18 = vpop.eup %229  ;;  %v32_v19 = vmul.f32 %v228_v17, %v28_v0 }
   0xf   :  { %v232_v20 = vpop.eup %231  ;;  %v30_v21 = vmul.f32 %v230_v18, %v26_v2 }
  0x10   :  { %v234_v22 = vpop.eup %233  ;;  %v33_v23 = vmul.f32 %v232_v20, %v29_v5 }
  0x11   :  { %v54_v24 = vadd.f32 %v32_v19, %v30_v21  ;;  %v31_v25 = vmul.f32 %v234_v22, %v27_v7 }
  0x13   :  { %v55_v26 = vadd.f32 %v33_v23, %v31_v25 }
  0x15   :  { %v58_v27 = vpack.c.bf16 %v55_v26, %v54_v24 }
  0x17   :  { %214 = vmatmul.mubr.msk.bf16.vlgmr.msra.gmra.mrb[0].mxu0 %vm75_vm2, %v58_v27 }
  0x74   :  { %v43_v28 = vpop.permute.xlu1 %42  ;;  %v39_v29 = vpop.permute.xlu0 %38 }
  0x75   :  { %v52_v30 = vmul.f32 %v228_v17, %v43_v28  ;;  %v50_v31 = vmul.f32 %v230_v18, %v39_v29 }
  0x77   :  { %v56_v36 = vadd.f32 %v52_v30, %v50_v31 }
  0x78   :  { %v45_v32 = vpop.permute.xlu1 %44  ;;  %v41_v33 = vpop.permute.xlu0 %40 }
  0x79   :  { %v53_v34 = vmul.f32 %v232_v20, %v45_v32  ;;  %v51_v35 = vmul.f32 %v234_v22, %v41_v33 }
  0x7b   :  { %v57_v37 = vadd.f32 %v53_v34, %v51_v35 }
  0x7d   :  { %v62_v38 = vpack.c.bf16 %v57_v37, %v56_v36 }
  0x7f   :  { %206 = vmatmul.mubr.msk.bf16.vlgmr.msra.gmra.mrb[0].mxu1 %vm75_vm2, %v62_v38 }
  0xea   :  { %v175_v39 = vpop.f32.mrb[0].mxu0 }
  0xeb   :  { %v215_v40 = vpop.f32.mrb[1].mxu0 }
  0xec   :  { %v178_v41 = vpop.f32.mrb[2].mxu0 }
  0xed   :  { %v216_v42 = vpop.f32.mrb[3].mxu0 }
 0x152   :  { %v119_v43 = vpop.f32.mrb[0].mxu1 }
 0x153   :  { %v176_v44 = vadd.f32 %v175_v39, %v119_v43  ;;  %v207_v45 = vpop.f32.mrb[1].mxu1 }
 0x154   :  { %v122_v46 = vpop.f32.mrb[2].mxu1 }
 0x155   :  { %183 = vst.msk [vmem:[%s310_s4] sm:$0xff] %vm182_vm3, %v176_v44  ;;  %v179_v47 = vadd.f32 %v178_v41, %v122_v46  ;;  %v208_v48 = vpop.f32.mrb[3].mxu1 }
 0x157   :  { %184 = vst.msk [vmem:[%s310_s4 + $0x8] sm:$0xff] %vm182_vm3, %v179_v47 }

// kernel: _lambda_.15
= control target key start
LH: loop header
LB: loop body
LE: loop exit
PB: predicated region body
PF: predicated region fallthrough
CT: control target
= control target key end

     0   :  { %v247_v2 = vmov 0   ;;  %s310_s0 = inlined_call_operand.vmem [shape: bf16[16,256], index: 0, kind: input, shape index: {}]   ;;  %s311_s1 = inlined_call_operand.vmem [shape: bf16[2,2,16], index: 1, kind: input, shape index: {}]   ;;  %s312_s2 = inlined_call_operand.vmem [shape: f32[2,2,1], index: 2, kind: input, shape index: {}]   ;;  %s313_s3 = inlined_call_operand.vmem [shape: f32[2,2,256], index: 3, kind: input, shape index: {}]   ;;  %s314_s4 = inlined_call_operand.hbm [shape: f32[2,256], index: 4, kind: output, shape index: {}]  }
   0x1   :  { %v212_v0 = vld [vmem:[%s310_s0 + $0x4] ss:$8 sps:$4 sm:$0xff]   ;;  %v214_v1 = vld [vmem:[%s310_s0] ss:$8 sps:$4 sm:$0xff]   ;;  %74 = vmatprep.mubr.bf16.mxu0 %v247_v2  ;;  %145 = vmatprep.mubr.bf16.mxu1 %v247_v2 }
   0x2   :  { %42 = vmatprep.subr.bf16.mxu0 %v212_v0  ;;  %113 = vmatprep.subr.bf16.mxu1 %v212_v0  ;;  %v22_v3 = vld [vmem:[%s312_s2] sm:$0x3] }
   0x3   :  { %9 = vsyncpa [#allocation3], 0  ;;  %43 = vmatpush1.bf16.msra.mxu0 %v214_v1  ;;  %114 = vmatpush1.bf16.msra.mxu1 %v214_v1  ;;  %v21_v4 = vld [vmem:[%s311_s1] sm:$0x1]  ;;  %vm38_vm0 = vcmask 130048   ;;  %s248_s28 = smov [#allocation2]  }
   0x4   :  { %v203_v5 = vld [vmem:[%s311_s1 + $0x1] sm:$0x1]  ;;  %211 = vset.pattern.permute.xlu0 %v247_v2  ;;  %v204_v6 = vld [vmem:[%s312_s2 + $0x2] sm:$0x3]  ;;  %s191_s29 = sshll.u32 %s248_s28, 4  ;;  %s192_s29 = int_to_ptr.vmem [resolvable:$true] %s191_s29 }
   0x5   :  { %25 = vperm.xlu0 %211, %v22_v3   ;;  %v202_v21 = vld.sshfl [vmem:[%s313_s3] sm:$0x33 pattern:$0x76325410]  ;;  %s223_s30 = scalar_lea.vmem %s192_s29, 64  ;;  %p228_p1 = scmp.lt.s32.totalorder %s192_s29, %s192_s29 }
   0x6   :  { %201 = vmatmul.mubr.msk.bf16.vlgmr.msra.gmra.mrb[0].mxu0 %vm38_vm0, %v21_v4  ;;  %205 = vmatmul.mubr.msk.bf16.vlgmr.msra.gmra.mrb[0].mxu1 %vm38_vm0, %v203_v5  ;;  %v207_v22 = vld.sshfl [vmem:[%s313_s3 + $0x4] sm:$0x33 pattern:$0x76325410]  ;;  %v94_v23 = vcombine.high %v202_v21, %v202_v21  ;;  %p224_p0 = scmp.ne.s32.totalorder %s192_s29, %s223_s30  ;;  %p229_p2 = scmp.lt.s32.totalorder %s223_s30, %s223_s30 }
   0x7   :  { %v166_v25 = vcombine.high %v207_v22, %v207_v22 }
   0x8   :  { %p230_p3 = por %p229_p2, %p228_p1 }
   0x9   :  { %107 = vperm.xlu0 %211, %v204_v6  }
   0xa   :  { %p231_p4 = pnand %p230_p3, %p224_p0 }
  0x84   :  { %v26_v7 = vpop.permute.xlu0 %25 }
  0x88   :  { %v108_v8 = vpop.permute.xlu0 %107 }
  0xd9   :  { %v76_v9 = vpop.f32.mrb[0].mxu0  ;;  %v147_v10 = vpop.f32.mrb[0].mxu1 }
  0xda   :  { %v77_v11 = vadd.f32 %v76_v9, %v26_v7  ;;  %v148_v12 = vadd.f32 %v147_v10, %v108_v8  ;;  %v78_v13 = vpop.f32.mrb[1].mxu0  ;;  %v149_v14 = vpop.f32.mrb[1].mxu1 }
  0xdb   :  { %v79_v15 = vadd.f32 %v78_v13, %v26_v7  ;;  %v150_v16 = vadd.f32 %v149_v14, %v108_v8  ;;  %v80_v17 = vpop.f32.mrb[2].mxu0  ;;  %v151_v18 = vpop.f32.mrb[2].mxu1 }
  0xdc   :  { %215 = vtanh.f32 %v77_v11  ;;  %v81_v19 = vpop.f32.mrb[3].mxu0  ;;  %v152_v20 = vpop.f32.mrb[3].mxu1 }
  0xdd   :  { %217 = vtanh.f32 %v148_v12 }
  0xde   :  { %219 = vtanh.f32 %v79_v15 }
  0xdf   :  { %221 = vtanh.f32 %v150_v16 }
  0xe6   :  { %v216_v24 = vpop.eup %215 }
  0xe7   :  { %v218_v26 = vpop.eup %217  ;;  %v97_v27 = vmul.f32 %v216_v24, %v202_v21 }
  0xe8   :  { %v220_v28 = vpop.eup %219  ;;  %v169_v29 = vmul.f32 %v218_v26, %v207_v22 }
  0xe9   :  { %v222_v30 = vpop.eup %221  ;;  %v98_v31 = vmul.f32 %v220_v28, %v94_v23 }
  0xea   :  { %v170_v32 = vmul.f32 %v222_v30, %v166_v25  ;;  %v171_v33 = vadd.f32 %v169_v29, %v97_v27 }
  0xec   :  { %v172_v34 = vadd.f32 %v170_v32, %v98_v31 }
  0xee   :  { %v175_v35 = vcombine.low %v171_v33, %v172_v34 }
  0xf0   :  { %208 = vst.sshfl [vmem:[#allocation2] sm:$0x33 pattern:$0x76325410] %v175_v35 }
  0xf1   :  { %234 = shalt.err (!%p231_p4)
}
  0xf2   :  { %s235_s6 = scalar_lea.hbm %s314_s4, 64 }
  0xf3   :  { %p236_p5 = scmp.ne.s32.totalorder %s314_s4, %s235_s6  ;;  %p239_p6 = scmp.lt.u32.totalorder %s235_s6, %s314_s4 }
  0xf5   :  { %p241_p7 = pnand %p239_p6, %p236_p5 }
  0xf7   :  { %244 = shalt.err (!%p241_p7)
}
  0xf8   :  { %194 = dma.vmem_to_hbm [thread:$0]  %s192_s29, 64, %s314_s4, [#allocation3]  }
  0xf9   :  { %245 = dma.done.wait [#allocation3], 64  }
  0xfa   :  { %246 = vsyncadd [#allocation3], 4294967232 }
  0xfb   :  { %198 = vsyncpa [#allocation3], 1 }

// kernel: _lambda_.14
= control target key start
LH: loop header
LB: loop body
LE: loop exit
PB: predicated region body
PF: predicated region fallthrough
CT: control target
= control target key end

     0   :  { %v653_v2 = vmov 0.0   ;;  %vm654_vm0 = vmmov 0   ;;  %s655_s25 = smov 127   ;;  %v656_v4 = vmov 0   ;;  %vm57_vm1 = vcmask 1043456   ;;  %s835_s0 = inlined_call_operand.vmem [shape: bf16[8,262], index: 0, kind: input, shape index: {}]   ;;  %s836_s1 = inlined_call_operand.vmem [shape: bf16[3,16,8], index: 1, kind: input, shape index: {}]   ;;  %s837_s2 = inlined_call_operand.vmem [shape: f32[16,1], index: 2, kind: input, shape index: {}]   ;;  %s838_s3 = inlined_call_operand.vmem [shape: f32[16,1], index: 3, kind: input, shape index: {}]   ;;  %s839_s5 = inlined_call_operand.vmem [shape: f32[1,260], index: 5, kind: input, shape index: {}]   ;;  %s840_s4 = inlined_call_operand.vmem [shape: f32[16,1], index: 4, kind: input, shape index: {}]   ;;  %s841_s6 = inlined_call_operand.vmem [shape: bf16[16,262], index: 6, kind: output, shape index: {}]  }
   0x1   :  { %v643_v0 = vld [vmem:[%s835_s0 + $0x8] ss:$0 sps:$4 sm:$0xff]   ;;  %v26_v1 = vld [vmem:[%s835_s0] sm:$0xff]  ;;  %609 = vmatprep.subr.bf16.mxu1 %v653_v2  ;;  %611 = vmatprep.mubr.msk.bf16.mxu1 %vm654_vm0, %v653_v2  ;;  %s657_s0 = smov 126   ;;  %vm53_vm2 = vcmask 64512   ;;  %vm50_vm3 = vcmask 1039360   ;;  %v391_v42 = vlaneseq }
   0x2   :  { %v579_v3 = vcombine.low %v26_v1, %v26_v1  ;;  %48 = vrot.lane.b32.xlu1 %v643_v0, %s655_s25  ;;  %99 = vmatprep.mubr.bf16.mxu0 %v656_v4  ;;  %v580_v5 = vcombine.high %v26_v1, %v26_v1  ;;  %v371_v6 = vld [vmem:[%s837_s2] sm:$0xff]  ;;  %v372_v7 = vld [vmem:[%s837_s2 + $0x8] sm:$0xff]  ;;  %v166_v14 = vsel %vm57_vm1, %v643_v0, 0  ;;  %vm266_vm4 = vcmask 1031168   ;;  %v648_v26 = vld [vmem:[%s836_s1 + $0x10] sm:$0xff]  }
   0x3   :  { %642 = vset.pattern.permute.xlu1 %v656_v4  ;;  %641 = vset.pattern.permute.xlu0 %v656_v4  ;;  %v464_v8 = vld [vmem:[%s838_s3 + $0x8] sm:$0xff]  ;;  %v463_v9 = vld [vmem:[%s838_s3] sm:$0xff]  ;;  %v392_v46 = vshrl.u32 %v391_v42, 7  ;;  %vm413_vm5 = vcmask 31744   ;;  %vm558_vm12 = vcmask 1043464   ;;  %vm559_vm13 = vcmask 1047556  }
   0x4   :  { %44 = vrot.lane.b32.xlu0 %v579_v3, %s655_s25  ;;  %v646_v13 = vld [vmem:[%s836_s1 + $0x8] sm:$0xff]   ;;  %v160_v21 = vsel %vm57_vm1, %v579_v3, 0  ;;  %v647_v22 = vld [vmem:[%s836_s1] sm:$0xff]   ;;  %vm549_vm14 = vcmask 7168   ;;  %vm560_vm15 = vmor %vm559_vm13, %vm558_vm12 }
   0x5   :  { %v393_v47 = vsub.s32 0, %v392_v46  ;;  %v401_v48 = vsub.s32 2, %v392_v46  ;;  %v389_v51 = vld [vmem:[%s839_s5] sm:$0x7]  ;;  %v397_v52 = vsub.s32 1, %v392_v46 }
   0x6   :  { %260 = vrot.lane.b32.xlu1 %v579_v3, %s657_s0 }
   0x7   :  { %v759_v55 = vrot.slane %v389_v51, %v393_v47  ;;  %v761_v56 = vrot.slane %v389_v51, %v401_v48  ;;  %v763_v58 = vrot.slane %v389_v51, %v397_v52 }
   0x8   :  { %46 = vrot.lane.b32.xlu0 %v580_v5, %s655_s25 }
   0xa   :  { %264 = vrot.lane.b32.xlu1 %v643_v0, %s657_s0 }
   0xc   :  { %262 = vrot.lane.b32.xlu0 %v580_v5, %s657_s0 }
   0xe   :  { %380 = vperm.xlu1 %642, %v372_v7  }
  0x10   :  { %375 = vperm.xlu0 %641, %v371_v6  }
  0x12   :  { %472 = vperm.xlu1 %642, %v464_v8  }
  0x14   :  { %467 = vperm.xlu0 %641, %v463_v9  }
  0x74   :  { %v49_v10 = vpop.permute.xlu1 %48 }
  0x75   :  { %v65_v12 = vsel %vm57_vm1, %v49_v10, 0 }
  0x76   :  { %v45_v11 = vpop.permute.xlu0 %44  ;;  %610 = vmatpush3.bf16.msra.mxu1 %v65_v12 }
  0x77   :  { %615 = vmatprep.subr.bf16.mxu1 %v653_v2 }
  0x78   :  { %v261_v15 = vpop.permute.xlu1 %260 }
  0x79   :  { %612 = vmatmul.mubr.msk.bf16.vlgmr.msra.gmra.mrb[0].mxu1 %vm53_vm2, %v646_v13 }
  0x7a   :  { %v47_v16 = vpop.permute.xlu0 %46  ;;  %616 = vmatpush3.bf16.msra.mxu1 %v166_v14  ;;  %617 = vmatprep.mubr.msk.bf16.mxu1 %vm654_vm0, %v653_v2 }
  0x7b   :  { %v52_v17 = vsel %vm50_vm3, %v47_v16, %v49_v10  ;;  %v51_v18 = vsel %vm50_vm3, %v45_v11, %v47_v16  ;;  %621 = vmatprep.subr.bf16.mxu1 %v653_v2 }
  0x7c   :  { %582 = vmatprep.subr.msk.bf16.mxu0 %vm57_vm1, %v52_v17  ;;  %v59_v19 = vsel %vm57_vm1, %v51_v18, 0  ;;  %v265_v20 = vpop.permute.xlu1 %264 }
  0x7d   :  { %68 = vmatpush1.bf16.msra.mxu0 %v59_v19  ;;  %v279_v25 = vsel %vm57_vm1, %v265_v20, 0 }
  0x7e   :  { %586 = vmatprep.subr.msk.bf16.mxu0 %vm57_vm1, %v580_v5  ;;  %v263_v23 = vpop.permute.xlu0 %262 }
  0x7f   :  { %v268_v24 = vsel %vm266_vm4, %v263_v23, %v265_v20  ;;  %v267_v27 = vsel %vm266_vm4, %v261_v15, %v263_v23 }
  0x80   :  { %583 = vmatmul.mubr.msk.bf16.vlgmr.msra.gmra.mrb[0].mxu0 %vm53_vm2, %v646_v13  ;;  %v273_v28 = vsel %vm57_vm1, %v267_v27, 0  ;;  %v481_v27 = vld [vmem:[%s840_s4] sm:$0xff] }
  0x81   :  { %169 = vmatpush1.bf16.msra.mxu0 %v160_v21  ;;  %200 = vmatprep.mubr.bf16.mxu0 %v656_v4 }
  0x82   :  { %618 = vmatmul.mubr.msk.bf16.vlgmr.msra.gmra.mrb[4].mxu1 %vm53_vm2, %v647_v22  ;;  %592 = vmatprep.subr.msk.bf16.mxu0 %vm57_vm1, %v268_v24  ;;  %vm562_vm1 = vcmask 35840  }
  0x83   :  { %622 = vmatpush3.bf16.msra.mxu1 %v279_v25  ;;  %623 = vmatprep.mubr.msk.bf16.mxu1 %vm654_vm0, %v653_v2  ;;  %vm566_vm0 = vcmask 3072  }
  0x8a   :  { %624 = vmatmul.mubr.msk.bf16.vlgmr.msra.gmra.mrb[8].mxu1 %vm53_vm2, %v648_v26 }
  0x8c   :  { %587 = vmatmul.mubr.msk.bf16.vlgmr.msra.gmra.mrb[0].mxu0 %vm53_vm2, %v647_v22 }
  0x8d   :  { %282 = vmatpush1.bf16.msra.mxu0 %v273_v28  ;;  %313 = vmatprep.mubr.bf16.mxu0 %v656_v4  ;;  %v381_v50 = vpop.permute.xlu1 %380  ;;  %v482_v28 = vld [vmem:[%s840_s4 + $0x8] sm:$0xff]  ;;  %s658_s4 = smov 1  }
  0x8f   :  { %v376_v49 = vpop.permute.xlu0 %375 }
  0x98   :  { %593 = vmatmul.mubr.msk.bf16.vlgmr.msra.gmra.mrb[0].mxu0 %vm53_vm2, %v648_v26  ;;  %vm569_vm2 = vcmask 44072  }
 0x14c   :  { %v144_v29 = vpop.f32.mrb[0].mxu1 }
 0x14d   :  { %v613_v30 = vpop.f32.mrb[1].mxu1 }
 0x14e   :  { %v147_v31 = vpop.f32.mrb[2].mxu1  ;;  %v468_v30 = vpop.permute.xlu0 %467 }
 0x14f   :  { %v614_v32 = vpop.f32.mrb[3].mxu1 }
 0x155   :  { %v245_v33 = vpop.f32.mrb[4].mxu1 }
 0x156   :  { %v246_v34 = vadd.f32 %v245_v33, %v144_v29  ;;  %v619_v35 = vpop.f32.mrb[5].mxu1  ;;  %v473_v29 = vpop.permute.xlu1 %472 }
 0x157   :  { %v248_v36 = vpop.f32.mrb[6].mxu1 }
 0x158   :  { %v249_v37 = vadd.f32 %v248_v36, %v147_v31  ;;  %v620_v38 = vpop.f32.mrb[7].mxu1 }
 0x15d   :  { %v358_v39 = vpop.f32.mrb[8].mxu1 }
 0x15e   :  { %v367_v40 = vadd.f32 %v358_v39, %v246_v34  ;;  %v625_v41 = vpop.f32.mrb[9].mxu1 }
 0x15f   :  { %v361_v43 = vpop.f32.mrb[10].mxu1 }
 0x160   :  { %v370_v44 = vadd.f32 %v361_v43, %v249_v37  ;;  %v626_v45 = vpop.f32.mrb[11].mxu1  ;;  %v755_v53 = vadd.f32 %v376_v49, %v367_v40 }
 0x162   :  { %v757_v54 = vadd.f32 %v381_v50, %v370_v44  ;;  %v408_v2 = vmul.f32 %v761_v56, %v755_v53 }
 0x164   :  { %v411_v3 = vmul.f32 %v761_v56, %v757_v54  ;;  %v414_v13 = vsel %vm413_vm5, %v408_v2, 0.0  ;;  %v425_v19 = vmul.f32 %v408_v2, %v408_v2 }
 0x166   :  { %v428_v14 = vmul.f32 %v411_v3, %v411_v3  ;;  %v419_v18 = vsel %vm413_vm5, %v411_v3, 0.0  ;;  %v430_v25 = vsel %vm413_vm5, %v425_v19, 0.0 }
 0x168   :  { %v435_v23 = vsel %vm413_vm5, %v428_v14, 0.0 }
 0x16b   :  { %v315_v57 = vpop.f32.mrb[0].mxu0 }
 0x16c   :  { %v765_v59 = vadd.f32 %v376_v49, %v315_v57  ;;  %v317_v60 = vpop.f32.mrb[1].mxu0 }
 0x16d   :  { %v767_v61 = vadd.f32 %v376_v49, %v317_v60  ;;  %v319_v62 = vpop.f32.mrb[2].mxu0 }
 0x16e   :  { %v406_v63 = vmul.f32 %v759_v55, %v765_v59  ;;  %v771_v0 = vadd.f32 %v381_v50, %v319_v62  ;;  %v321_v1 = vpop.f32.mrb[3].mxu0 }
 0x16f   :  { %v407_v5 = vmul.f32 %v763_v58, %v767_v61  ;;  %v387_v6 = vadd.f32 %v381_v50, %v321_v1 }
 0x170   :  { %v409_v7 = vmul.f32 %v759_v55, %v771_v0  ;;  %v423_v8 = vmul.f32 %v406_v63, %v406_v63 }
 0x171   :  { %v424_v9 = vmul.f32 %v407_v5, %v407_v5  ;;  %v410_v10 = vmul.f32 %v763_v58, %v387_v6  ;;  %v412_v11 = vadd.f32 %v407_v5, %v406_v63 }
 0x172   :  { %v426_v12 = vmul.f32 %v409_v7, %v409_v7 }
 0x173   :  { %v427_v15 = vmul.f32 %v410_v10, %v410_v10  ;;  %v415_v16 = vadd.f32 %v414_v13, %v412_v11  ;;  %v418_v17 = vadd.f32 %v410_v10, %v409_v7  ;;  %v429_v22 = vadd.f32 %v424_v9, %v423_v8 }
 0x175   :  { %416 = vadd.xlane.f32.xlu1 %v415_v16  ;;  %v420_v20 = vadd.f32 %v419_v18, %v418_v17  ;;  %v434_v21 = vadd.f32 %v427_v15, %v426_v12  ;;  %v431_v26 = vadd.f32 %v430_v25, %v429_v22 }
 0x177   :  { %421 = vadd.xlane.f32.xlu0 %v420_v20  ;;  %v436_v24 = vadd.f32 %v435_v23, %v434_v21 }
 0x179   :  { %437 = vadd.xlane.f32.xlu1 %v436_v24 }
 0x17b   :  { %432 = vadd.xlane.f32.xlu0 %v431_v26 }
 0x18a   :  { %485 = vperm.xlu1 %642, %v481_v27  }
 0x191   :  { %490 = vperm.xlu0 %641, %v482_v28  }
 0x202   :  { %v417_v31 = vpop.xlane.xlu1 %416 }
 0x203   :  { %v439_v33 = vmul.f32 0.00390625, %v417_v31 }
 0x204   :  { %v422_v32 = vpop.xlane.xlu0 %421 }
 0x205   :  { %v440_v34 = vmul.f32 0.00390625, %v422_v32  ;;  %v443_v39 = vmul.f32 %v439_v33, %v439_v33  ;;  %v447_v49 = vsub.f32 %v765_v59, %v439_v33  ;;  %v448_v50 = vsub.f32 %v767_v61, %v439_v33 }
 0x206   :  { %v438_v35 = vpop.xlane.xlu1 %437  ;;  %v449_v51 = vsub.f32 %v755_v53, %v439_v33 }
 0x207   :  { %v442_v36 = vmul.f32 0.00390625, %v438_v35  ;;  %v444_v37 = vmul.f32 %v440_v34, %v440_v34  ;;  %v450_v45 = vsub.f32 %v771_v0, %v440_v34  ;;  %v451_v46 = vsub.f32 %v387_v6, %v440_v34 }
 0x208   :  { %v433_v38 = vpop.xlane.xlu0 %432  ;;  %v452_v47 = vsub.f32 %v757_v54, %v440_v34 }
 0x209   :  { %v441_v40 = vmul.f32 0.00390625, %v433_v38  ;;  %v446_v41 = vsub.f32 %v442_v36, %v444_v37 }
 0x20a   :  { %v486_v9 = vpop.permute.xlu1 %485 }
 0x20b   :  { %v445_v42 = vsub.f32 %v441_v40, %v443_v39  ;;  %v454_v43 = vadd.f32 1e-05, %v446_v41 }
 0x20d   :  { %v453_v44 = vadd.f32 1e-05, %v445_v42  ;;  %649 = vrsqrt.f32 %v454_v43 }
 0x20f   :  { %651 = vrsqrt.f32 %v453_v44 }
 0x210   :  { %v491_v8 = vpop.permute.xlu0 %490 }
 0x217   :  { %v650_v48 = vpop.eup %649 }
 0x218   :  { %v460_v57 = vmul.f32 %v650_v48, %v450_v45  ;;  %v461_v60 = vmul.f32 %v650_v48, %v451_v46  ;;  %v462_v62 = vmul.f32 %v650_v48, %v452_v47 }
 0x219   :  { %v652_v52 = vpop.eup %651 }
 0x21a   :  { %v457_v63 = vmul.f32 %v652_v52, %v447_v49  ;;  %v458_v1 = vmul.f32 %v652_v52, %v448_v50  ;;  %v459_v2 = vmul.f32 %v652_v52, %v449_v51  ;;  %v478_v3 = vmul.f32 %v473_v29, %v460_v57 }
 0x21b   :  { %v479_v5 = vmul.f32 %v473_v29, %v461_v60  ;;  %v480_v0 = vmul.f32 %v473_v29, %v462_v62 }
 0x21c   :  { %v475_v6 = vmul.f32 %v468_v30, %v457_v63  ;;  %v476_v7 = vmul.f32 %v468_v30, %v458_v1  ;;  %v477_v54 = vmul.f32 %v468_v30, %v459_v2  ;;  %v496_v59 = vadd.f32 %v491_v8, %v478_v3 }
 0x21d   :  { %v497_v10 = vadd.f32 %v491_v8, %v479_v5  ;;  %v498_v61 = vadd.f32 %v491_v8, %v480_v0 }
 0x21e   :  { %v493_v11 = vadd.f32 %v486_v9, %v475_v6  ;;  %v494_v53 = vadd.f32 %v486_v9, %v476_v7  ;;  %v495_v12 = vadd.f32 %v486_v9, %v477_v54  ;;  %vm502_vm6 = vcmp.ge.f32.partialorder %v496_v59, 0.0 }
 0x21f   :  { %vm503_vm7 = vcmp.ge.f32.partialorder %v497_v10, 0.0  ;;  %v508_v13 = vmul.f32 0.01, %v496_v59  ;;  %v509_v14 = vmul.f32 0.01, %v497_v10  ;;  %vm504_vm10 = vcmp.ge.f32.partialorder %v498_v61, 0.0 }
 0x220   :  { %vm499_vm8 = vcmp.ge.f32.partialorder %v493_v11, 0.0  ;;  %vm500_vm9 = vcmp.ge.f32.partialorder %v494_v53, 0.0  ;;  %v505_v15 = vmul.f32 0.01, %v493_v11  ;;  %v506_v16 = vmul.f32 0.01, %v494_v53 }
 0x221   :  { %v507_v17 = vmul.f32 0.01, %v495_v12  ;;  %v510_v18 = vmul.f32 0.01, %v498_v61  ;;  %v514_v19 = vsel %vm502_vm6, %v496_v59, %v508_v13  ;;  %v515_v20 = vsel %vm503_vm7, %v497_v10, %v509_v14 }
 0x222   :  { %v520_v21 = vmul.f32 %v514_v19, %v759_v55  ;;  %v521_v22 = vmul.f32 %v515_v20, %v763_v58  ;;  %v511_v23 = vsel %vm499_vm8, %v493_v11, %v505_v15  ;;  %v512_v24 = vsel %vm500_vm9, %v494_v53, %v506_v16 }
 0x223   :  { %v517_v25 = vmul.f32 %v511_v23, %v759_v55  ;;  %v518_v26 = vmul.f32 %v512_v24, %v763_v58  ;;  %vm501_vm11 = vcmp.ge.f32.partialorder %v495_v12, 0.0  ;;  %v516_v28 = vsel %vm504_vm10, %v498_v61, %v510_v18 }
 0x224   :  { %v601_v27 = vpack.c.bf16 %v521_v22, %v520_v21  ;;  %v513_v29 = vsel %vm501_vm11, %v495_v12, %v507_v17  ;;  %v522_v31 = vmul.f32 %v516_v28, %v761_v56 }
 0x225   :  { %v599_v30 = vpack.c.bf16 %v518_v26, %v517_v25  ;;  %v519_v32 = vmul.f32 %v513_v29, %v761_v56 }
 0x226   :  { %543 = vrot.lane.b32.xlu0 %v601_v27, %s658_s4  ;;  %v602_v33 = vpack.c.bf16 %v522_v31, %v522_v31 }
 0x227   :  { %539 = vrot.lane.b32.xlu1 %v599_v30, %s658_s4  ;;  %v600_v34 = vpack.c.bf16 %v519_v32, %v519_v32 }
 0x22a   :  { %545 = vrot.lane.b32.xlu0 %v602_v33, %s658_s4 }
 0x22b   :  { %541 = vrot.lane.b32.xlu1 %v600_v34, %s658_s4 }
 0x298   :  { %v544_v55 = vpop.permute.xlu0 %543 }
 0x299   :  { %v548_v58 = vrot.slane %v544_v55, 4  ;;  %v540_v35 = vpop.permute.xlu1 %539 }
 0x29a   :  { %v547_v36 = vrot.slane %v540_v35, 4 }
 0x29b   :  { %v552_v37 = vsel %vm549_vm14, %v548_v58, %v544_v55 }
 0x29c   :  { %564 = vst.msk [vmem:[%s841_s6 + $0xc] sm:$0xff] %vm560_vm15, %v552_v37  ;;  %v550_v56 = vsel %vm549_vm14, %v547_v36, %v540_v35  ;;  %v546_v38 = vpop.permute.xlu0 %545 }
 0x29d   :  { %568 = vst.msk [vmem:[%s841_s6 + $0xc] sm:$0xf] %vm566_vm0, %v656_v4  ;;  %v553_v39 = vsel %vm549_vm14, %v548_v58, %v546_v38  ;;  %v542_v40 = vpop.permute.xlu1 %541 }
 0x29e   :  { %561 = vst.msk [vmem:[%s841_s6] sm:$0xff] %vm560_vm15, %v550_v56  ;;  %v551_v41 = vsel %vm549_vm14, %v547_v36, %v542_v40 }
 0x29f   :  { %567 = vst.msk [vmem:[%s841_s6] sm:$0xf] %vm566_vm0, %v656_v4 }
 0x2a0   :  { %565 = vst.msk [vmem:[%s841_s6 + $0x14] sm:$0xf] %vm562_vm1, %v553_v39  ;;  %563 = vst.msk [vmem:[%s841_s6 + $0x8] sm:$0xf] %vm562_vm1, %v551_v41 }
 0x2a1   :  { %571 = vst.msk [vmem:[%s841_s6 + $0x14] sm:$0xf] %vm569_vm2, %v656_v4  ;;  %570 = vst.msk [vmem:[%s841_s6 + $0x8] sm:$0xf] %vm569_vm2, %v656_v4 }

// kernel: _lambda_.13
= control target key start
LH: loop header
LB: loop body
LE: loop exit
PB: predicated region body
PF: predicated region fallthrough
CT: control target
= control target key end

     0   :  { %v516_v1 = vmov 0.0   ;;  %vm517_vm0 = vmmov 0   ;;  %s518_s25 = smov 127   ;;  %v519_v4 = vmov 0   ;;  %s520_s26 = smov 126   ;;  %vm50_vm1 = vcmask 1042432   ;;  %s625_s0 = inlined_call_operand.vmem [shape: bf16[6,262], index: 0, kind: input, shape index: {}]   ;;  %s626_s2 = inlined_call_operand.vmem [shape: f32[8,1], index: 2, kind: input, shape index: {}]   ;;  %s627_s1 = inlined_call_operand.vmem [shape: bf16[3,8,6], index: 1, kind: input, shape index: {}]   ;;  %s628_s5 = inlined_call_operand.vmem [shape: f32[1,260], index: 5, kind: input, shape index: {}]   ;;  %s629_s3 = inlined_call_operand.vmem [shape: f32[8,1], index: 3, kind: input, shape index: {}]   ;;  %s630_s4 = inlined_call_operand.vmem [shape: f32[8,1], index: 4, kind: input, shape index: {}]   ;;  %s631_s6 = inlined_call_operand.vmem [shape: bf16[8,262], index: 6, kind: output, shape index: {}]  }
   0x1   :  { %v511_v0 = vld [vmem:[%s625_s0 + $0x8] ss:$0 sps:$4 sm:$0x77]   ;;  %485 = vmatprep.subr.bf16.mxu1 %v516_v1  ;;  %487 = vmatprep.mubr.msk.bf16.mxu1 %vm517_vm0, %v516_v1  ;;  %v25_v2 = vld [vmem:[%s625_s0] sm:$0x77]  ;;  %vm46_vm2 = vcmask 48128   ;;  %v352_v38 = vlaneseq }
   0x2   :  { %41 = vrot.lane.b32.xlu1 %v511_v0, %s518_s25  ;;  %v462_v3 = vcombine.low %v25_v2, %v25_v2  ;;  %92 = vmatprep.mubr.bf16.mxu0 %v519_v4  ;;  %v463_v5 = vcombine.high %v25_v2, %v25_v2  ;;  %v341_v6 = vld [vmem:[%s626_s2] sm:$0xff]  ;;  %v151_v11 = vsel %vm50_vm1, %v511_v0, 0  ;;  %vm43_vm3 = vcmask 1039360   ;;  %v471_v25 = vld [vmem:[%s627_s1 + $0x8] sm:$0xf] }
   0x3   :  { %509 = vset.pattern.permute.xlu0 %v519_v4  ;;  %510 = vset.pattern.permute.xlu1 %v519_v4  ;;  %v461_v10 = vld [vmem:[%s627_s1 + $0x4] sm:$0xf]  ;;  %vm242_vm4 = vcmask 1031168   ;;  %v24_v20 = vld [vmem:[%s627_s1] sm:$0xf]  ;;  %v353_v40 = vshrl.u32 %v352_v38, 7 }
   0x4   :  { %37 = vrot.lane.b32.xlu0 %v462_v3, %s518_s25  ;;  %v145_v18 = vsel %vm50_vm1, %v462_v3, 0  ;;  %v350_v53 = vld [vmem:[%s628_s5] sm:$0x7]  ;;  %vm371_vm5 = vcmask 31744   ;;  %vm447_vm9 = vcmask 1043464   ;;  %vm448_vm10 = vcmask 1047556  }
   0x5   :  { %v362_v51 = vsub.s32 2, %v353_v40  ;;  %v354_v55 = vsub.s32 0, %v353_v40  ;;  %v358_v56 = vsub.s32 1, %v353_v40  ;;  %vm442_vm11 = vcmask 7168   ;;  %vm449_vm12 = vmor %vm448_vm10, %vm447_vm9 }
   0x6   :  { %236 = vrot.lane.b32.xlu1 %v462_v3, %s520_s26  ;;  %vm453_vm13 = vcmask 3072   ;;  %vm451_vm14 = vcmask 35840   ;;  %vm455_vm15 = vcmask 44072  }
   0x7   :  { %v601_v58 = vrot.slane %v350_v53, %v362_v51  ;;  %v355_v61 = vrot.slane %v350_v53, %v354_v55 }
   0x8   :  { %39 = vrot.lane.b32.xlu0 %v463_v5, %s518_s25 }
   0xa   :  { %240 = vrot.lane.b32.xlu1 %v511_v0, %s520_s26  ;;  %v359_v0 = vrot.slane %v350_v53, %v358_v56 }
   0xc   :  { %238 = vrot.lane.b32.xlu0 %v463_v5, %s520_s26 }
  0x10   :  { %344 = vperm.xlu0 %509, %v341_v6  }
  0x74   :  { %v42_v7 = vpop.permute.xlu1 %41 }
  0x75   :  { %v58_v8 = vsel %vm50_vm1, %v42_v7, 0 }
  0x76   :  { %v38_v9 = vpop.permute.xlu0 %37  ;;  %486 = vmatpush3.bf16.msra.mxu1 %v58_v8 }
  0x77   :  { %491 = vmatprep.subr.bf16.mxu1 %v516_v1 }
  0x78   :  { %v237_v12 = vpop.permute.xlu1 %236 }
  0x79   :  { %488 = vmatmul.mubr.msk.bf16.vlgmr.msra.gmra.mrb[0].mxu1 %vm46_vm2, %v461_v10 }
  0x7a   :  { %v40_v13 = vpop.permute.xlu0 %39  ;;  %492 = vmatpush3.bf16.msra.mxu1 %v151_v11  ;;  %493 = vmatprep.mubr.msk.bf16.mxu1 %vm517_vm0, %v516_v1 }
  0x7b   :  { %v45_v14 = vsel %vm43_vm3, %v40_v13, %v42_v7  ;;  %v44_v15 = vsel %vm43_vm3, %v38_v9, %v40_v13  ;;  %497 = vmatprep.subr.bf16.mxu1 %v516_v1 }
  0x7c   :  { %465 = vmatprep.subr.msk.bf16.mxu0 %vm50_vm1, %v45_v14  ;;  %v52_v16 = vsel %vm50_vm1, %v44_v15, 0  ;;  %v241_v17 = vpop.permute.xlu1 %240 }
  0x7d   :  { %61 = vmatpush1.bf16.msra.mxu0 %v52_v16  ;;  %v255_v22 = vsel %vm50_vm1, %v241_v17, 0 }
  0x7e   :  { %468 = vmatprep.subr.msk.bf16.mxu0 %vm50_vm1, %v463_v5  ;;  %v239_v19 = vpop.permute.xlu0 %238 }
  0x7f   :  { %v244_v21 = vsel %vm242_vm4, %v239_v19, %v241_v17  ;;  %v243_v23 = vsel %vm242_vm4, %v237_v12, %v239_v19  ;;  %v405_v19 = vld [vmem:[%s630_s4] sm:$0xff] }
  0x80   :  { %466 = vmatmul.mubr.msk.bf16.vlgmr.msra.gmra.mrb[0].mxu0 %vm46_vm2, %v461_v10  ;;  %v249_v24 = vsel %vm50_vm1, %v243_v23, 0 }
  0x81   :  { %154 = vmatpush1.bf16.msra.mxu0 %v145_v18  ;;  %494 = vmatmul.mubr.msk.bf16.vlgmr.msra.gmra.mrb[4].mxu1 %vm46_vm2, %v24_v20  ;;  %v396_v18 = vld [vmem:[%s629_s3] sm:$0xff]  ;;  %s521_s3 = smov 1  }
  0x82   :  { %185 = vmatprep.mubr.bf16.mxu0 %v519_v4  ;;  %472 = vmatprep.subr.msk.bf16.mxu0 %vm50_vm1, %v244_v21 }
  0x83   :  { %498 = vmatpush3.bf16.msra.mxu1 %v255_v22  ;;  %499 = vmatprep.mubr.msk.bf16.mxu1 %vm517_vm0, %v516_v1 }
  0x88   :  { %469 = vmatmul.mubr.msk.bf16.vlgmr.msra.gmra.mrb[4].mxu0 %vm46_vm2, %v24_v20 }
  0x89   :  { %258 = vmatpush1.bf16.msra.mxu0 %v249_v24  ;;  %500 = vmatmul.mubr.msk.bf16.vlgmr.msra.gmra.mrb[8].mxu1 %vm46_vm2, %v471_v25 }
  0x8a   :  { %289 = vmatprep.mubr.bf16.mxu0 %v519_v4 }
  0x8f   :  { %v345_v52 = vpop.permute.xlu0 %344 }
  0x90   :  { %473 = vmatmul.mubr.msk.bf16.vlgmr.msra.gmra.mrb[8].mxu0 %vm46_vm2, %v471_v25 }
 0x14c   :  { %v135_v26 = vpop.f32.mrb[0].mxu1 }
 0x14d   :  { %v489_v27 = vpop.f32.mrb[1].mxu1 }
 0x14e   :  { %v138_v28 = vpop.f32.mrb[2].mxu1 }
 0x14f   :  { %v490_v29 = vpop.f32.mrb[3].mxu1 }
 0x153   :  { %v94_v30 = vpop.f32.mrb[0].mxu0 }
 0x154   :  { %v96_v31 = vpop.f32.mrb[1].mxu0  ;;  %v228_v32 = vpop.f32.mrb[4].mxu1 }
 0x155   :  { %v98_v33 = vpop.f32.mrb[2].mxu0  ;;  %v229_v34 = vadd.f32 %v228_v32, %v135_v26  ;;  %v495_v35 = vpop.f32.mrb[5].mxu1 }
 0x156   :  { %v99_v36 = vpop.f32.mrb[3].mxu0  ;;  %v231_v37 = vpop.f32.mrb[6].mxu1 }
 0x157   :  { %v496_v39 = vpop.f32.mrb[7].mxu1 }
 0x15b   :  { %v187_v41 = vpop.f32.mrb[4].mxu0 }
 0x15c   :  { %v188_v42 = vadd.f32 %v187_v41, %v94_v30  ;;  %v189_v43 = vpop.f32.mrb[5].mxu0  ;;  %v332_v44 = vpop.f32.mrb[8].mxu1 }
 0x15d   :  { %v190_v45 = vadd.f32 %v189_v43, %v96_v31  ;;  %v191_v46 = vpop.f32.mrb[6].mxu0  ;;  %v340_v47 = vadd.f32 %v332_v44, %v229_v34  ;;  %v501_v48 = vpop.f32.mrb[9].mxu1 }
 0x15e   :  { %v192_v49 = vpop.f32.mrb[7].mxu0  ;;  %v335_v50 = vpop.f32.mrb[10].mxu1 }
 0x15f   :  { %v502_v54 = vpop.f32.mrb[11].mxu1  ;;  %v349_v57 = vadd.f32 %v345_v52, %v340_v47 }
 0x161   :  { %v369_v5 = vmul.f32 %v601_v58, %v349_v57 }
 0x163   :  { %v291_v59 = vpop.f32.mrb[8].mxu0  ;;  %v378_v10 = vmul.f32 %v369_v5, %v369_v5  ;;  %v372_v13 = vsel %vm371_vm5, %v369_v5, 0.0 }
 0x164   :  { %v338_v60 = vadd.f32 %v291_v59, %v188_v42  ;;  %v293_v62 = vpop.f32.mrb[9].mxu0 }
 0x165   :  { %v339_v63 = vadd.f32 %v293_v62, %v190_v45  ;;  %v295_v1 = vpop.f32.mrb[10].mxu0  ;;  %v380_v16 = vsel %vm371_vm5, %v378_v10, 0.0 }
 0x166   :  { %v347_v2 = vadd.f32 %v345_v52, %v338_v60  ;;  %v296_v3 = vpop.f32.mrb[11].mxu0 }
 0x167   :  { %v348_v6 = vadd.f32 %v345_v52, %v339_v63 }
 0x168   :  { %v367_v7 = vmul.f32 %v355_v61, %v347_v2 }
 0x169   :  { %v368_v8 = vmul.f32 %v359_v0, %v348_v6 }
 0x16a   :  { %v376_v9 = vmul.f32 %v367_v7, %v367_v7 }
 0x16b   :  { %v370_v11 = vadd.f32 %v368_v8, %v367_v7  ;;  %v377_v12 = vmul.f32 %v368_v8, %v368_v8 }
 0x16d   :  { %v373_v14 = vadd.f32 %v372_v13, %v370_v11  ;;  %v379_v15 = vadd.f32 %v377_v12, %v376_v9 }
 0x16f   :  { %374 = vadd.xlane.f32.xlu1 %v373_v14  ;;  %v381_v17 = vadd.f32 %v380_v16, %v379_v15 }
 0x171   :  { %382 = vadd.xlane.f32.xlu0 %v381_v17 }
 0x180   :  { %399 = vperm.xlu1 %510, %v396_v18  }
 0x187   :  { %408 = vperm.xlu0 %509, %v405_v19  }
 0x1fc   :  { %v375_v20 = vpop.xlane.xlu1 %374 }
 0x1fd   :  { %v384_v21 = vmul.f32 0.00390625, %v375_v20 }
 0x1fe   :  { %v383_v22 = vpop.xlane.xlu0 %382 }
 0x1ff   :  { %v385_v23 = vmul.f32 0.00390625, %v383_v22  ;;  %v386_v24 = vmul.f32 %v384_v21, %v384_v21  ;;  %v388_v27 = vsub.f32 %v347_v2, %v384_v21  ;;  %v389_v28 = vsub.f32 %v348_v6, %v384_v21 }
 0x200   :  { %v390_v29 = vsub.f32 %v349_v57, %v384_v21  ;;  %v400_v31 = vpop.permute.xlu1 %399 }
 0x201   :  { %v387_v25 = vsub.f32 %v385_v23, %v386_v24 }
 0x203   :  { %v391_v26 = vadd.f32 1e-05, %v387_v25 }
 0x205   :  { %514 = vrsqrt.f32 %v391_v26 }
 0x206   :  { %v409_v38 = vpop.permute.xlu0 %408 }
 0x20f   :  { %v515_v30 = vpop.eup %514 }
 0x210   :  { %v393_v32 = vmul.f32 %v515_v30, %v388_v27  ;;  %v394_v33 = vmul.f32 %v515_v30, %v389_v28  ;;  %v395_v34 = vmul.f32 %v515_v30, %v390_v29 }
 0x212   :  { %v402_v35 = vmul.f32 %v400_v31, %v393_v32  ;;  %v403_v36 = vmul.f32 %v400_v31, %v394_v33  ;;  %v404_v37 = vmul.f32 %v400_v31, %v395_v34 }
 0x214   :  { %v411_v39 = vadd.f32 %v409_v38, %v402_v35  ;;  %v412_v40 = vadd.f32 %v409_v38, %v403_v36  ;;  %v413_v41 = vadd.f32 %v409_v38, %v404_v37 }
 0x216   :  { %v417_v42 = vmul.f32 0.01, %v411_v39  ;;  %v418_v43 = vmul.f32 0.01, %v412_v40  ;;  %vm414_vm6 = vcmp.ge.f32.partialorder %v411_v39, 0.0  ;;  %vm415_vm7 = vcmp.ge.f32.partialorder %v412_v40, 0.0 }
 0x217   :  { %vm416_vm8 = vcmp.ge.f32.partialorder %v413_v41, 0.0  ;;  %v419_v44 = vmul.f32 0.01, %v413_v41 }
 0x218   :  { %v420_v45 = vsel %vm414_vm6, %v411_v39, %v417_v42  ;;  %v421_v46 = vsel %vm415_vm7, %v412_v40, %v418_v43 }
 0x219   :  { %v423_v47 = vmul.f32 %v420_v45, %v355_v61  ;;  %v424_v48 = vmul.f32 %v421_v46, %v359_v0  ;;  %v422_v49 = vsel %vm416_vm8, %v413_v41, %v419_v44 }
 0x21a   :  { %v425_v51 = vmul.f32 %v422_v49, %v601_v58 }
 0x21b   :  { %v477_v50 = vpack.c.bf16 %v424_v48, %v423_v47 }
 0x21c   :  { %v478_v52 = vpack.c.bf16 %v425_v51, %v425_v51 }
 0x21d   :  { %437 = vrot.lane.b32.xlu1 %v477_v50, %s521_s3 }
 0x221   :  { %439 = vrot.lane.b32.xlu1 %v478_v52, %s521_s3 }
 0x28f   :  { %v438_v53 = vpop.permute.xlu1 %437 }
 0x290   :  { %v441_v54 = vrot.slane %v438_v53, 4 }
 0x292   :  { %v443_v55 = vsel %vm442_vm11, %v441_v54, %v438_v53 }
 0x293   :  { %450 = vst.msk [vmem:[%s631_s6] sm:$0xff] %vm449_vm12, %v443_v55  ;;  %v440_v56 = vpop.permute.xlu1 %439 }
 0x294   :  { %454 = vst.msk [vmem:[%s631_s6] sm:$0xf] %vm453_vm13, %v519_v4  ;;  %v444_v57 = vsel %vm442_vm11, %v441_v54, %v440_v56 }
 0x295   :  { %452 = vst.msk [vmem:[%s631_s6 + $0x8] sm:$0xf] %vm451_vm14, %v444_v57 }
 0x296   :  { %456 = vst.msk [vmem:[%s631_s6 + $0x8] sm:$0xf] %vm455_vm15, %v519_v4 }

</bundles_post_ra>
